<compile_context>
chip_gen: v5e
topology: v5e:2x2
jax: 0.10.0
libtpu: 0.0.40
codegen_flags: <defaults>
</compile_context>

<pallas_src>
import jax
import jax.numpy as jnp
from jax import lax
from jax.experimental import pallas as pl
from jax.experimental.pallas import tpu as pltpu


def _iota_f32(shape, dim):
    return lax.broadcasted_iota(jnp.int32, shape, dim).astype(jnp.float32)


# ----------------------------------------------------------------------------
# Pallas kernel: one full SEB block (3 CBAM branches + residual) per image
# ----------------------------------------------------------------------------
def _make_seb_kernel(C, H, W, k):
    p = k // 2
    HW = H * W
    f32 = jnp.float32
    inv_w = 1.0 / float(W)

    def kernel(x_ref, m_ref, cw_ref, w1t_ref, w2_ref, o_ref):
        x = x_ref[0]                                   # (C, HW), lane-dense
        o_ref[0] = x                                   # residual, accumulate in-place

        # ---------- hoisted, branch-independent precompute ------------------
        # bin masks are {0,1}  =>  max_c(bin*x) == bin * max_c(x)
        chanmax = jnp.max(x, axis=0, keepdims=True)    # (1, HW)

        # selector matrices for flat <-> (H, W) conversion (iota-built, applied
        # via the MXU; no reshapes / rolls / padded scratch).
        i_f = _iota_f32((H, HW), 0)
        n_f = _iota_f32((H, HW), 1)
        d_f = n_f - i_f * float(W)
        fsel = ((d_f >= 0.0) & (d_f < float(W))).astype(f32)   # [n // W == i]

        n_g = _iota_f32((HW, W), 0)
        j_g = _iota_f32((HW, W), 1)
        c_g = n_g - jnp.floor(n_g * inv_w) * float(W)           # n % W
        gt = (jnp.abs(c_g - j_g) < 0.5).astype(f32)             # (HW, W)

        # (H, W) view of the channel max (one small matmul); gt dies here.
        chanmax2d = jnp.dot(fsel * chanmax, gt,
                            preferred_element_type=f32)         # (H, W)

        j_s = _iota_f32((W, HW), 0)
        n_s = _iota_f32((W, HW), 1)
        c_s = n_s - jnp.floor(n_s * inv_w) * float(W)
        gsel = (jnp.abs(c_s - j_s) < 0.5).astype(f32)           # (W, HW)

        # banded / shift matrices of the k x k 'same' conv (zero padding is
        # encoded by the zero rows/cols of the bands).  Built ONCE.
        a_w = _iota_f32((W, W), 0)
        j_w = _iota_f32((W, W), 1)
        colband = [(a_w - j_w == float(dj - p)).astype(f32) for dj in range(k)]
        i_hh = _iota_f32((H, H), 0)
        r_hh = _iota_f32((H, H), 1)
        rowshift = [(r_hh - i_hh == float(di - p)).astype(f32) for di in range(k)]

        # ---------- three CBAM branches --------------------------------------
        for b in range(3):
            m2d = m_ref[0, b]                          # (H, W) 0/1 bin mask
            smax2d = m2d * chanmax2d                   # == max_c(bin_b * x)

            # k x k cross-correlation, zero 'same' padding:
            #   conv = sum_di rowshift[di] @ (smax2d @ T_b_di)
            conv = None
            for di in range(k):
                base = (b * k + di) * k                # SMEM scalar taps
                t = colband[0] * cw_ref[base]
                for dj in range(1, k):
                    t = t + colband[dj] * cw_ref[base + dj]
                tmp = jnp.dot(smax2d, t, preferred_element_type=f32)
                term = jnp.dot(rowshift[di], tmp, preferred_element_type=f32)
                conv = term if conv is None else conv + term

            sa2d = jax.nn.sigmoid(conv)                # spatial attention (H, W)

            # flatten (bin * sa) back to the lane-dense layout: one matmul +
            # one sublane reduction.
            msa = jnp.sum(fsel * jnp.dot(m2d * sa2d, gsel,
                                         preferred_element_type=f32),
                          axis=0, keepdims=True)       # (1, HW)
            y = x * msa                                # sa(bin*x) * (bin*x), (C, HW)

            # channel attention: global max-pool -> fc(2) -> relu -> fc(C) -> sigmoid
            cmax = jnp.max(y, axis=1, keepdims=True)                           # (C, 1)
            h = jnp.maximum(
                jnp.sum(w1t_ref[b] * cmax, axis=0, keepdims=True), 0.0)        # (1, 2)
            ca = jax.nn.sigmoid(
                jnp.sum(w2_ref[b] * h, axis=1, keepdims=True))                 # (C, 1)

            o_ref[0] += ca * y                         # accumulate into output block

    return kernel


def seb_pallas(x, masks, conv_w, w1, w2, k):
    """One SEB block (after bin interpolation).

    x: (B, C, H, W) f32, masks: (B, 3, H, W) f32 in {0,1},
    conv_w: (3, k, k), w1: (3, 2, C), w2: (3, C, 2).
    """
    B, C, H, W = x.shape
    HW = H * W
    kernel = _make_seb_kernel(C, H, W, k)

    x_flat = x.reshape(B, C, HW).astype(jnp.float32)            # lane-dense layout
    masks = masks.astype(jnp.float32)                           # (B, 3, H, W)
    cw_flat = conv_w.reshape(3 * k * k).astype(jnp.float32)     # SMEM scalar taps
    w1t = jnp.transpose(w1, (0, 2, 1)).astype(jnp.float32)      # (3, C, 2)
    w2 = w2.astype(jnp.float32)                                 # (3, C, 2)

    out_flat = pl.pallas_call(
        kernel,
        out_shape=jax.ShapeDtypeStruct((B, C, HW), jnp.float32),
        grid=(B,),
        in_specs=[
            pl.BlockSpec((1, C, HW), lambda b: (b, 0, 0)),          # features (flat)
            pl.BlockSpec((1, 3, H, W), lambda b: (b, 0, 0, 0)),     # bin masks (2-D)
            pl.BlockSpec(memory_space=pltpu.MemorySpace.SMEM),      # conv taps (scalars)
            pl.BlockSpec((3, C, 2), lambda b: (0, 0, 0)),           # fc1^T
            pl.BlockSpec((3, C, 2), lambda b: (0, 0, 0)),           # fc2
        ],
        out_specs=pl.BlockSpec((1, C, HW), lambda b: (b, 0, 0)),
        compiler_params=pltpu.CompilerParams(
            dimension_semantics=("parallel",)),   # batch items independent (v7x 2 TCs)
    )(x_flat, masks, cw_flat, w1t, w2)
    return out_flat.reshape(B, C, H, W)


# ----------------------------------------------------------------------------
# Glue (plain JAX): bilinear align_corners=True resize of bins, bool masking
# ----------------------------------------------------------------------------
def resize_bilinear_align_corners(x, out_hw):
    B, C, Hs, Ws = x.shape
    Ho, Wo = out_hw

    def coords(out_size, in_size):
        if out_size == 1:
            return jnp.zeros((out_size,), jnp.float32)
        return jnp.arange(out_size, dtype=jnp.float32) * ((in_size - 1) / (out_size - 1))

    ys, xs = coords(Ho, Hs), coords(Wo, Ws)
    y0 = jnp.clip(jnp.floor(ys), 0, Hs - 1).astype(jnp.int32)
    y1 = jnp.clip(y0 + 1, 0, Hs - 1)
    wy = ys - y0.astype(jnp.float32)
    x0 = jnp.clip(jnp.floor(xs), 0, Ws - 1).astype(jnp.int32)
    x1 = jnp.clip(x0 + 1, 0, Ws - 1)
    wx = xs - x0.astype(jnp.float32)

    top, bot = x[:, :, y0, :], x[:, :, y1, :]
    row = top * (1 - wy)[None, None, :, None] + bot * wy[None, None, :, None]
    left, right = row[:, :, :, x0], row[:, :, :, x1]
    return left * (1 - wx) + right * wx


# ----------------------------------------------------------------------------
# Pure-JAX reference of one SEB (for correctness check of the kernel)
# ----------------------------------------------------------------------------
def seb_ref(x, masks, conv_w, w1, w2, k):
    p = k // 2
    out = x
    for b in range(3):
        xm = x * masks[:, b:b + 1]
        smax = jnp.max(xm, axis=1, keepdims=True)
        conv = lax.conv_general_dilated(
            smax, conv_w[b][None, None], (1, 1), [(p, p), (p, p)],
            dimension_numbers=('NCHW', 'OIHW', 'NCHW'))
        y = xm * jax.nn.sigmoid(conv)
        cmax = jnp.max(y, axis=(2, 3))                    # (B, C)
        h = jnp.maximum(cmax @ w1[b].T, 0.0)              # (B, 2)
        ca = jax.nn.sigmoid(h @ jnp.transpose(w2[b]))     # (B, C)
        out = out + ca[:, :, None, None] * y
    return out


def sem_apply(feats, bins, params, use_pallas=True):
    """SEM forward: one SEB per pyramid level, bins resized per level."""
    outs = []
    fn = seb_pallas if use_pallas else seb_ref
    for x, prm in zip(feats, params):
        H, W = x.shape[2], x.shape[3]
        interp = resize_bilinear_align_corners(bins, (H, W))
        masks = (interp != 0).astype(jnp.float32)         # .bool() semantics
        outs.append(fn(x, masks, prm['conv_w'], prm['w1'], prm['w2'], prm['k']))
    return tuple(outs)


# ----------------------------------------------------------------------------
if __name__ == "__main__":
    key = jax.random.PRNGKey(0)

    # Small synthetic config (PyTorch default dim=256; here dim=8 for speed).
    dim = 8
    channels = [dim, dim * 2, dim * 4, dim * 8]       # per-level C of feats
    ksizes = [9, 7, 5, 3]                             # SEM kernel sizes
    spatial = [(16, 16), (8, 8), (8, 8), (4, 4)]

    key, kb = jax.random.split(key)
    bins = jax.random.bernoulli(kb, 0.6, (2, 3, 8, 8)).astype(jnp.float32)

    feats = []
    for C, (H, W) in zip(channels, spatial):
        key, kf = jax.random.split(key)
        feats.append(jax.random.normal(kf, (2, C, H, W), jnp.float32))

    # Deterministic parameter init (3 CBAMs per SEB: spatial conv + 2 fc each).
    params = []
    for C, k in zip(channels, ksizes):
        key, k1, k2, k3 = jax.random.split(key, 4)
        params.append(dict(
            k=k,
            conv_w=0.1 * jax.random.normal(k1, (3, k, k), jnp.float32),   # SpatialAttention conv
            w1=0.25 * jax.random.normal(k2, (3, 2, C), jnp.float32),      # ChannelAttention fc1
            w2=0.25 * jax.random.normal(k3, (3, C, 2), jnp.float32),      # ChannelAttention fc2
        ))

    outs = sem_apply(feats, bins, params, use_pallas=True)
    outs = jax.block_until_ready(outs)

    refs = sem_apply(feats, bins, params, use_pallas=False)
    # Tolerance accounts for MXU / XLA default-precision matmul & conv paths.
    for o, r in zip(outs, refs):
        assert o.shape == r.shape
        err = float(jnp.max(jnp.abs(o - r)))
        assert jnp.allclose(o, r, atol=2e-2, rtol=2e-2), f"max abs err {err}"

    print("KERNEL_OK")
</pallas_src>

<mosaic_0001>
module attributes {stable_mosaic.version = 11 : i64} {
  func.func @kernel(%arg0: i32, %arg1: memref<1x8x256xf32, #tpu.memory_space<vmem>>, %arg2: memref<1x3x16x16xf32, #tpu.memory_space<vmem>>, %arg3: memref<243xf32, #tpu.memory_space<smem>>, %arg4: memref<3x8x2xf32, #tpu.memory_space<vmem>>, %arg5: memref<3x8x2xf32, #tpu.memory_space<vmem>>, %arg6: memref<1x8x256xf32, #tpu.memory_space<vmem>>) attributes {dimension_semantics = [#tpu.dimension_semantics<parallel>], iteration_bounds = array<i64: 2>, scalar_prefetch = 0 : i64, scratch_operands = 0 : i64, tpu.core_type = #tpu.core_type<tc>, window_params = [{transform_indices = @transform_0, window_bounds = array<i64: 1, 8, 256>}, {transform_indices = @transform_1, window_bounds = array<i64: 1, 3, 16, 16>}, {transform_indices = @transform_2, window_bounds = array<i64: 243>}, {pipeline_mode = #tpu.pipeline_mode<synchronous>, transform_indices = @transform_3, window_bounds = array<i64: 3, 8, 2>}, {pipeline_mode = #tpu.pipeline_mode<synchronous>, transform_indices = @transform_4, window_bounds = array<i64: 3, 8, 2>}, {transform_indices = @transform_5, window_bounds = array<i64: 1, 8, 256>}]} {
    %c0 = arith.constant 0 : index
    %c0_0 = arith.constant 0 : index
    %c0_1 = arith.constant 0 : index
    %0 = vector.load %arg1[%c0, %c0_0, %c0_1] : memref<1x8x256xf32, #tpu.memory_space<vmem>>, vector<1x8x256xf32>
    %1 = vector.shape_cast %0 : vector<1x8x256xf32> to vector<8x256xf32>
    %c0_2 = arith.constant 0 : index
    %c0_3 = arith.constant 0 : index
    %c0_4 = arith.constant 0 : index
    %2 = vector.load %arg6[%c0_2, %c0_3, %c0_4] : memref<1x8x256xf32, #tpu.memory_space<vmem>>, vector<1x8x256xf32>
    %3 = vector.shape_cast %2 : vector<1x8x256xf32> to vector<8x256xf32>
    %4 = vector.shape_cast %1 : vector<8x256xf32> to vector<1x8x256xf32>
    tpu.vector_store %arg6[%c0_2, %c0_3, %c0_4], %4 {strides = array<i32>} : memref<1x8x256xf32, #tpu.memory_space<vmem>>, vector<1x8x256xf32>,
    %cst = arith.constant dense<0xFF800000> : vector<256xf32>
    %5 = vector.multi_reduction <maximumf>, %1, %cst [0] : vector<8x256xf32> to vector<256xf32>
    %6 = vector.shape_cast %5 : vector<256xf32> to vector<1x256xf32>
    %7 = tpu.iota {dimensions = array<i32: 0>} : vector<16x256xi32>
    %8 = arith.sitofp %7 : vector<16x256xi32> to vector<16x256xf32>
    %9 = tpu.iota {dimensions = array<i32: 1>} : vector<16x256xi32>
    %10 = arith.sitofp %9 : vector<16x256xi32> to vector<16x256xf32>
    %cst_5 = arith.constant 1.600000e+01 : f32
    %11 = vector.broadcast %cst_5 : f32 to vector<16x256xf32>
    %12 = arith.mulf %8, %11 : vector<16x256xf32>
    %13 = arith.subf %10, %12 : vector<16x256xf32>
    %cst_6 = arith.constant 0.000000e+00 : f32
    %14 = vector.broadcast %cst_6 : f32 to vector<16x256xf32>
    %15 = arith.cmpf oge, %13, %14 : vector<16x256xf32>
    %cst_7 = arith.constant 1.600000e+01 : f32
    %16 = vector.broadcast %cst_7 : f32 to vector<16x256xf32>
    %17 = arith.cmpf olt, %13, %16 : vector<16x256xf32>
    %18 = arith.andi %15, %17 : vector<16x256xi1>
    %19 = arith.extui %18 : vector<16x256xi1> to vector<16x256xi32>
    %20 = arith.sitofp %19 : vector<16x256xi32> to vector<16x256xf32>
    %21 = tpu.iota {dimensions = array<i32: 0>} : vector<256x16xi32>
    %22 = arith.sitofp %21 : vector<256x16xi32> to vector<256x16xf32>
    %23 = tpu.iota {dimensions = array<i32: 1>} : vector<256x16xi32>
    %24 = arith.sitofp %23 : vector<256x16xi32> to vector<256x16xf32>
    %cst_8 = arith.constant 6.250000e-02 : f32
    %25 = vector.broadcast %cst_8 : f32 to vector<256x16xf32>
    %26 = arith.mulf %22, %25 : vector<256x16xf32>
    %27 = math.floor %26 : vector<256x16xf32>
    %cst_9 = arith.constant 1.600000e+01 : f32
    %28 = vector.broadcast %cst_9 : f32 to vector<256x16xf32>
    %29 = arith.mulf %27, %28 : vector<256x16xf32>
    %30 = arith.subf %22, %29 : vector<256x16xf32>
    %31 = arith.subf %30, %24 : vector<256x16xf32>
    %32 = math.absf %31 : vector<256x16xf32>
    %cst_10 = arith.constant 5.000000e-01 : f32
    %33 = vector.broadcast %cst_10 : f32 to vector<256x16xf32>
    %34 = arith.cmpf olt, %32, %33 : vector<256x16xf32>
    %35 = arith.extui %34 : vector<256x16xi1> to vector<256x16xi32>
    %36 = arith.sitofp %35 : vector<256x16xi32> to vector<256x16xf32>
    %37 = vector.broadcast %6 : vector<1x256xf32> to vector<16x256xf32>
    %38 = arith.mulf %20, %37 : vector<16x256xf32>
    %cst_11 = arith.constant dense<0.000000e+00> : vector<16x16xf32>
    %39 = tpu.matmul %38, %36, %cst_11 {dimension_numbers = #tpu.dot_dimension_numbers<[1], [0], [0], [1], [0, 0, 1, 1], [], []>} : vector<16x256xf32>, vector<256x16xf32>, vector<16x16xf32> -> vector<16x16xf32>
    %40 = tpu.iota {dimensions = array<i32: 0>} : vector<16x256xi32>
    %41 = arith.sitofp %40 : vector<16x256xi32> to vector<16x256xf32>
    %42 = tpu.iota {dimensions = array<i32: 1>} : vector<16x256xi32>
    %43 = arith.sitofp %42 : vector<16x256xi32> to vector<16x256xf32>
    %cst_12 = arith.constant 6.250000e-02 : f32
    %44 = vector.broadcast %cst_12 : f32 to vector<16x256xf32>
    %45 = arith.mulf %43, %44 : vector<16x256xf32>
    %46 = math.floor %45 : vector<16x256xf32>
    %cst_13 = arith.constant 1.600000e+01 : f32
    %47 = vector.broadcast %cst_13 : f32 to vector<16x256xf32>
    %48 = arith.mulf %46, %47 : vector<16x256xf32>
    %49 = arith.subf %43, %48 : vector<16x256xf32>
    %50 = arith.subf %49, %41 : vector<16x256xf32>
    %51 = math.absf %50 : vector<16x256xf32>
    %cst_14 = arith.constant 5.000000e-01 : f32
    %52 = vector.broadcast %cst_14 : f32 to vector<16x256xf32>
    %53 = arith.cmpf olt, %51, %52 : vector<16x256xf32>
    %54 = arith.extui %53 : vector<16x256xi1> to vector<16x256xi32>
    %55 = arith.sitofp %54 : vector<16x256xi32> to vector<16x256xf32>
    %56 = tpu.iota {dimensions = array<i32: 0>} : vector<16x16xi32>
    %57 = arith.sitofp %56 : vector<16x16xi32> to vector<16x16xf32>
    %58 = tpu.iota {dimensions = array<i32: 1>} : vector<16x16xi32>
    %59 = arith.sitofp %58 : vector<16x16xi32> to vector<16x16xf32>
    %60 = arith.subf %57, %59 : vector<16x16xf32>
    %cst_15 = arith.constant -4.000000e+00 : f32
    %61 = vector.broadcast %cst_15 : f32 to vector<16x16xf32>
    %62 = arith.cmpf oeq, %60, %61 : vector<16x16xf32>
    %63 = arith.extui %62 : vector<16x16xi1> to vector<16x16xi32>
    %64 = arith.sitofp %63 : vector<16x16xi32> to vector<16x16xf32>
    %65 = arith.subf %57, %59 : vector<16x16xf32>
    %cst_16 = arith.constant -3.000000e+00 : f32
    %66 = vector.broadcast %cst_16 : f32 to vector<16x16xf32>
    %67 = arith.cmpf oeq, %65, %66 : vector<16x16xf32>
    %68 = arith.extui %67 : vector<16x16xi1> to vector<16x16xi32>
    %69 = arith.sitofp %68 : vector<16x16xi32> to vector<16x16xf32>
    %70 = arith.subf %57, %59 : vector<16x16xf32>
    %cst_17 = arith.constant -2.000000e+00 : f32
    %71 = vector.broadcast %cst_17 : f32 to vector<16x16xf32>
    %72 = arith.cmpf oeq, %70, %71 : vector<16x16xf32>
    %73 = arith.extui %72 : vector<16x16xi1> to vector<16x16xi32>
    %74 = arith.sitofp %73 : vector<16x16xi32> to vector<16x16xf32>
    %75 = arith.subf %57, %59 : vector<16x16xf32>
    %cst_18 = arith.constant -1.000000e+00 : f32
    %76 = vector.broadcast %cst_18 : f32 to vector<16x16xf32>
    %77 = arith.cmpf oeq, %75, %76 : vector<16x16xf32>
    %78 = arith.extui %77 : vector<16x16xi1> to vector<16x16xi32>
    %79 = arith.sitofp %78 : vector<16x16xi32> to vector<16x16xf32>
    %80 = arith.subf %57, %59 : vector<16x16xf32>
    %cst_19 = arith.constant 0.000000e+00 : f32
    %81 = vector.broadcast %cst_19 : f32 to vector<16x16xf32>
    %82 = arith.cmpf oeq, %80, %81 : vector<16x16xf32>
    %83 = arith.extui %82 : vector<16x16xi1> to vector<16x16xi32>
    %84 = arith.sitofp %83 : vector<16x16xi32> to vector<16x16xf32>
    %85 = arith.subf %57, %59 : vector<16x16xf32>
    %cst_20 = arith.constant 1.000000e+00 : f32
    %86 = vector.broadcast %cst_20 : f32 to vector<16x16xf32>
    %87 = arith.cmpf oeq, %85, %86 : vector<16x16xf32>
    %88 = arith.extui %87 : vector<16x16xi1> to vector<16x16xi32>
    %89 = arith.sitofp %88 : vector<16x16xi32> to vector<16x16xf32>
    %90 = arith.subf %57, %59 : vector<16x16xf32>
    %cst_21 = arith.constant 2.000000e+00 : f32
    %91 = vector.broadcast %cst_21 : f32 to vector<16x16xf32>
    %92 = arith.cmpf oeq, %90, %91 : vector<16x16xf32>
    %93 = arith.extui %92 : vector<16x16xi1> to vector<16x16xi32>
    %94 = arith.sitofp %93 : vector<16x16xi32> to vector<16x16xf32>
    %95 = arith.subf %57, %59 : vector<16x16xf32>
    %cst_22 = arith.constant 3.000000e+00 : f32
    %96 = vector.broadcast %cst_22 : f32 to vector<16x16xf32>
    %97 = arith.cmpf oeq, %95, %96 : vector<16x16xf32>
    %98 = arith.extui %97 : vector<16x16xi1> to vector<16x16xi32>
    %99 = arith.sitofp %98 : vector<16x16xi32> to vector<16x16xf32>
    %100 = arith.subf %57, %59 : vector<16x16xf32>
    %cst_23 = arith.constant 4.000000e+00 : f32
    %101 = vector.broadcast %cst_23 : f32 to vector<16x16xf32>
    %102 = arith.cmpf oeq, %100, %101 : vector<16x16xf32>
    %103 = arith.extui %102 : vector<16x16xi1> to vector<16x16xi32>
    %104 = arith.sitofp %103 : vector<16x16xi32> to vector<16x16xf32>
    %105 = tpu.iota {dimensions = array<i32: 0>} : vector<16x16xi32>
    %106 = arith.sitofp %105 : vector<16x16xi32> to vector<16x16xf32>
    %107 = tpu.iota {dimensions = array<i32: 1>} : vector<16x16xi32>
    %108 = arith.sitofp %107 : vector<16x16xi32> to vector<16x16xf32>
    %109 = arith.subf %108, %106 : vector<16x16xf32>
    %cst_24 = arith.constant -4.000000e+00 : f32
    %110 = vector.broadcast %cst_24 : f32 to vector<16x16xf32>
    %111 = arith.cmpf oeq, %109, %110 : vector<16x16xf32>
    %112 = arith.extui %111 : vector<16x16xi1> to vector<16x16xi32>
    %113 = arith.sitofp %112 : vector<16x16xi32> to vector<16x16xf32>
    %114 = arith.subf %108, %106 : vector<16x16xf32>
    %cst_25 = arith.constant -3.000000e+00 : f32
    %115 = vector.broadcast %cst_25 : f32 to vector<16x16xf32>
    %116 = arith.cmpf oeq, %114, %115 : vector<16x16xf32>
    %117 = arith.extui %116 : vector<16x16xi1> to vector<16x16xi32>
    %118 = arith.sitofp %117 : vector<16x16xi32> to vector<16x16xf32>
    %119 = arith.subf %108, %106 : vector<16x16xf32>
    %cst_26 = arith.constant -2.000000e+00 : f32
    %120 = vector.broadcast %cst_26 : f32 to vector<16x16xf32>
    %121 = arith.cmpf oeq, %119, %120 : vector<16x16xf32>
    %122 = arith.extui %121 : vector<16x16xi1> to vector<16x16xi32>
    %123 = arith.sitofp %122 : vector<16x16xi32> to vector<16x16xf32>
    %124 = arith.subf %108, %106 : vector<16x16xf32>
    %cst_27 = arith.constant -1.000000e+00 : f32
    %125 = vector.broadcast %cst_27 : f32 to vector<16x16xf32>
    %126 = arith.cmpf oeq, %124, %125 : vector<16x16xf32>
    %127 = arith.extui %126 : vector<16x16xi1> to vector<16x16xi32>
    %128 = arith.sitofp %127 : vector<16x16xi32> to vector<16x16xf32>
    %129 = arith.subf %108, %106 : vector<16x16xf32>
    %cst_28 = arith.constant 0.000000e+00 : f32
    %130 = vector.broadcast %cst_28 : f32 to vector<16x16xf32>
    %131 = arith.cmpf oeq, %129, %130 : vector<16x16xf32>
    %132 = arith.extui %131 : vector<16x16xi1> to vector<16x16xi32>
    %133 = arith.sitofp %132 : vector<16x16xi32> to vector<16x16xf32>
    %134 = arith.subf %108, %106 : vector<16x16xf32>
    %cst_29 = arith.constant 1.000000e+00 : f32
    %135 = vector.broadcast %cst_29 : f32 to vector<16x16xf32>
    %136 = arith.cmpf oeq, %134, %135 : vector<16x16xf32>
    %137 = arith.extui %136 : vector<16x16xi1> to vector<16x16xi32>
    %138 = arith.sitofp %137 : vector<16x16xi32> to vector<16x16xf32>
    %139 = arith.subf %108, %106 : vector<16x16xf32>
    %cst_30 = arith.constant 2.000000e+00 : f32
    %140 = vector.broadcast %cst_30 : f32 to vector<16x16xf32>
    %141 = arith.cmpf oeq, %139, %140 : vector<16x16xf32>
    %142 = arith.extui %141 : vector<16x16xi1> to vector<16x16xi32>
    %143 = arith.sitofp %142 : vector<16x16xi32> to vector<16x16xf32>
    %144 = arith.subf %108, %106 : vector<16x16xf32>
    %cst_31 = arith.constant 3.000000e+00 : f32
    %145 = vector.broadcast %cst_31 : f32 to vector<16x16xf32>
    %146 = arith.cmpf oeq, %144, %145 : vector<16x16xf32>
    %147 = arith.extui %146 : vector<16x16xi1> to vector<16x16xi32>
    %148 = arith.sitofp %147 : vector<16x16xi32> to vector<16x16xf32>
    %149 = arith.subf %108, %106 : vector<16x16xf32>
    %cst_32 = arith.constant 4.000000e+00 : f32
    %150 = vector.broadcast %cst_32 : f32 to vector<16x16xf32>
    %151 = arith.cmpf oeq, %149, %150 : vector<16x16xf32>
    %152 = arith.extui %151 : vector<16x16xi1> to vector<16x16xi32>
    %153 = arith.sitofp %152 : vector<16x16xi32> to vector<16x16xf32>
    %c0_33 = arith.constant 0 : index
    %c0_34 = arith.constant 0 : index
    %c0_35 = arith.constant 0 : index
    %c0_36 = arith.constant 0 : index
    %154 = vector.load %arg2[%c0_33, %c0_34, %c0_35, %c0_36] : memref<1x3x16x16xf32, #tpu.memory_space<vmem>>, vector<1x1x16x16xf32>
    %155 = vector.shape_cast %154 : vector<1x1x16x16xf32> to vector<16x16xf32>
    %156 = arith.mulf %155, %39 : vector<16x16xf32>
    %c0_37 = arith.constant 0 : index
    %157 = memref.load %arg3[%c0_37] : memref<243xf32, #tpu.memory_space<smem>>
    %158 = vector.broadcast %157 : f32 to vector<16x16xf32>
    %159 = arith.mulf %64, %158 : vector<16x16xf32>
    %c1 = arith.constant 1 : index
    %160 = memref.load %arg3[%c1] : memref<243xf32, #tpu.memory_space<smem>>
    %161 = vector.broadcast %160 : f32 to vector<16x16xf32>
    %162 = arith.mulf %69, %161 : vector<16x16xf32>
    %163 = arith.addf %159, %162 : vector<16x16xf32>
    %c2 = arith.constant 2 : index
    %164 = memref.load %arg3[%c2] : memref<243xf32, #tpu.memory_space<smem>>
    %165 = vector.broadcast %164 : f32 to vector<16x16xf32>
    %166 = arith.mulf %74, %165 : vector<16x16xf32>
    %167 = arith.addf %163, %166 : vector<16x16xf32>
    %c3 = arith.constant 3 : index
    %168 = memref.load %arg3[%c3] : memref<243xf32, #tpu.memory_space<smem>>
    %169 = vector.broadcast %168 : f32 to vector<16x16xf32>
    %170 = arith.mulf %79, %169 : vector<16x16xf32>
    %171 = arith.addf %167, %170 : vector<16x16xf32>
    %c4 = arith.constant 4 : index
    %172 = memref.load %arg3[%c4] : memref<243xf32, #tpu.memory_space<smem>>
    %173 = vector.broadcast %172 : f32 to vector<16x16xf32>
    %174 = arith.mulf %84, %173 : vector<16x16xf32>
    %175 = arith.addf %171, %174 : vector<16x16xf32>
    %c5 = arith.constant 5 : index
    %176 = memref.load %arg3[%c5] : memref<243xf32, #tpu.memory_space<smem>>
    %177 = vector.broadcast %176 : f32 to vector<16x16xf32>
    %178 = arith.mulf %89, %177 : vector<16x16xf32>
    %179 = arith.addf %175, %178 : vector<16x16xf32>
    %c6 = arith.constant 6 : index
    %180 = memref.load %arg3[%c6] : memref<243xf32, #tpu.memory_space<smem>>
    %181 = vector.broadcast %180 : f32 to vector<16x16xf32>
    %182 = arith.mulf %94, %181 : vector<16x16xf32>
    %183 = arith.addf %179, %182 : vector<16x16xf32>
    %c7 = arith.constant 7 : index
    %184 = memref.load %arg3[%c7] : memref<243xf32, #tpu.memory_space<smem>>
    %185 = vector.broadcast %184 : f32 to vector<16x16xf32>
    %186 = arith.mulf %99, %185 : vector<16x16xf32>
    %187 = arith.addf %183, %186 : vector<16x16xf32>
    %c8 = arith.constant 8 : index
    %188 = memref.load %arg3[%c8] : memref<243xf32, #tpu.memory_space<smem>>
    %189 = vector.broadcast %188 : f32 to vector<16x16xf32>
    %190 = arith.mulf %104, %189 : vector<16x16xf32>
    %191 = arith.addf %187, %190 : vector<16x16xf32>
    %cst_38 = arith.constant dense<0.000000e+00> : vector<16x16xf32>
    %192 = tpu.matmul %156, %191, %cst_38 {dimension_numbers = #tpu.dot_dimension_numbers<[1], [0], [0], [1], [0, 0, 1, 1], [], []>} : vector<16x16xf32>, vector<16x16xf32>, vector<16x16xf32> -> vector<16x16xf32>
    %cst_39 = arith.constant dense<0.000000e+00> : vector<16x16xf32>
    %193 = tpu.matmul %113, %192, %cst_39 {dimension_numbers = #tpu.dot_dimension_numbers<[1], [0], [0], [1], [0, 0, 1, 1], [], []>} : vector<16x16xf32>, vector<16x16xf32>, vector<16x16xf32> -> vector<16x16xf32>
    %c9 = arith.constant 9 : index
    %194 = memref.load %arg3[%c9] : memref<243xf32, #tpu.memory_space<smem>>
    %195 = vector.broadcast %194 : f32 to vector<16x16xf32>
    %196 = arith.mulf %64, %195 : vector<16x16xf32>
    %c10 = arith.constant 10 : index
    %197 = memref.load %arg3[%c10] : memref<243xf32, #tpu.memory_space<smem>>
    %198 = vector.broadcast %197 : f32 to vector<16x16xf32>
    %199 = arith.mulf %69, %198 : vector<16x16xf32>
    %200 = arith.addf %196, %199 : vector<16x16xf32>
    %c11 = arith.constant 11 : index
    %201 = memref.load %arg3[%c11] : memref<243xf32, #tpu.memory_space<smem>>
    %202 = vector.broadcast %201 : f32 to vector<16x16xf32>
    %203 = arith.mulf %74, %202 : vector<16x16xf32>
    %204 = arith.addf %200, %203 : vector<16x16xf32>
    %c12 = arith.constant 12 : index
    %205 = memref.load %arg3[%c12] : memref<243xf32, #tpu.memory_space<smem>>
    %206 = vector.broadcast %205 : f32 to vector<16x16xf32>
    %207 = arith.mulf %79, %206 : vector<16x16xf32>
    %208 = arith.addf %204, %207 : vector<16x16xf32>
    %c13 = arith.constant 13 : index
    %209 = memref.load %arg3[%c13] : memref<243xf32, #tpu.memory_space<smem>>
    %210 = vector.broadcast %209 : f32 to vector<16x16xf32>
    %211 = arith.mulf %84, %210 : vector<16x16xf32>
    %212 = arith.addf %208, %211 : vector<16x16xf32>
    %c14 = arith.constant 14 : index
    %213 = memref.load %arg3[%c14] : memref<243xf32, #tpu.memory_space<smem>>
    %214 = vector.broadcast %213 : f32 to vector<16x16xf32>
    %215 = arith.mulf %89, %214 : vector<16x16xf32>
    %216 = arith.addf %212, %215 : vector<16x16xf32>
    %c15 = arith.constant 15 : index
    %217 = memref.load %arg3[%c15] : memref<243xf32, #tpu.memory_space<smem>>
    %218 = vector.broadcast %217 : f32 to vector<16x16xf32>
    %219 = arith.mulf %94, %218 : vector<16x16xf32>
    %220 = arith.addf %216, %219 : vector<16x16xf32>
    %c16 = arith.constant 16 : index
    %221 = memref.load %arg3[%c16] : memref<243xf32, #tpu.memory_space<smem>>
    %222 = vector.broadcast %221 : f32 to vector<16x16xf32>
    %223 = arith.mulf %99, %222 : vector<16x16xf32>
    %224 = arith.addf %220, %223 : vector<16x16xf32>
    %c17 = arith.constant 17 : index
    %225 = memref.load %arg3[%c17] : memref<243xf32, #tpu.memory_space<smem>>
    %226 = vector.broadcast %225 : f32 to vector<16x16xf32>
    %227 = arith.mulf %104, %226 : vector<16x16xf32>
    %228 = arith.addf %224, %227 : vector<16x16xf32>
    %cst_40 = arith.constant dense<0.000000e+00> : vector<16x16xf32>
    %229 = tpu.matmul %156, %228, %cst_40 {dimension_numbers = #tpu.dot_dimension_numbers<[1], [0], [0], [1], [0, 0, 1, 1], [], []>} : vector<16x16xf32>, vector<16x16xf32>, vector<16x16xf32> -> vector<16x16xf32>
    %cst_41 = arith.constant dense<0.000000e+00> : vector<16x16xf32>
    %230 = tpu.matmul %118, %229, %cst_41 {dimension_numbers = #tpu.dot_dimension_numbers<[1], [0], [0], [1], [0, 0, 1, 1], [], []>} : vector<16x16xf32>, vector<16x16xf32>, vector<16x16xf32> -> vector<16x16xf32>
    %231 = arith.addf %193, %230 : vector<16x16xf32>
    %c18 = arith.constant 18 : index
    %232 = memref.load %arg3[%c18] : memref<243xf32, #tpu.memory_space<smem>>
    %233 = vector.broadcast %232 : f32 to vector<16x16xf32>
    %234 = arith.mulf %64, %233 : vector<16x16xf32>
    %c19 = arith.constant 19 : index
    %235 = memref.load %arg3[%c19] : memref<243xf32, #tpu.memory_space<smem>>
    %236 = vector.broadcast %235 : f32 to vector<16x16xf32>
    %237 = arith.mulf %69, %236 : vector<16x16xf32>
    %238 = arith.addf %234, %237 : vector<16x16xf32>
    %c20 = arith.constant 20 : index
    %239 = memref.load %arg3[%c20] : memref<243xf32, #tpu.memory_space<smem>>
    %240 = vector.broadcast %239 : f32 to vector<16x16xf32>
    %241 = arith.mulf %74, %240 : vector<16x16xf32>
    %242 = arith.addf %238, %241 : vector<16x16xf32>
    %c21 = arith.constant 21 : index
    %243 = memref.load %arg3[%c21] : memref<243xf32, #tpu.memory_space<smem>>
    %244 = vector.broadcast %243 : f32 to vector<16x16xf32>
    %245 = arith.mulf %79, %244 : vector<16x16xf32>
    %246 = arith.addf %242, %245 : vector<16x16xf32>
    %c22 = arith.constant 22 : index
    %247 = memref.load %arg3[%c22] : memref<243xf32, #tpu.memory_space<smem>>
    %248 = vector.broadcast %247 : f32 to vector<16x16xf32>
    %249 = arith.mulf %84, %248 : vector<16x16xf32>
    %250 = arith.addf %246, %249 : vector<16x16xf32>
    %c23 = arith.constant 23 : index
    %251 = memref.load %arg3[%c23] : memref<243xf32, #tpu.memory_space<smem>>
    %252 = vector.broadcast %251 : f32 to vector<16x16xf32>
    %253 = arith.mulf %89, %252 : vector<16x16xf32>
    %254 = arith.addf %250, %253 : vector<16x16xf32>
    %c24 = arith.constant 24 : index
    %255 = memref.load %arg3[%c24] : memref<243xf32, #tpu.memory_space<smem>>
    %256 = vector.broadcast %255 : f32 to vector<16x16xf32>
    %257 = arith.mulf %94, %256 : vector<16x16xf32>
    %258 = arith.addf %254, %257 : vector<16x16xf32>
    %c25 = arith.constant 25 : index
    %259 = memref.load %arg3[%c25] : memref<243xf32, #tpu.memory_space<smem>>
    %260 = vector.broadcast %259 : f32 to vector<16x16xf32>
    %261 = arith.mulf %99, %260 : vector<16x16xf32>
    %262 = arith.addf %258, %261 : vector<16x16xf32>
    %c26 = arith.constant 26 : index
    %263 = memref.load %arg3[%c26] : memref<243xf32, #tpu.memory_space<smem>>
    %264 = vector.broadcast %263 : f32 to vector<16x16xf32>
    %265 = arith.mulf %104, %264 : vector<16x16xf32>
    %266 = arith.addf %262, %265 : vector<16x16xf32>
    %cst_42 = arith.constant dense<0.000000e+00> : vector<16x16xf32>
    %267 = tpu.matmul %156, %266, %cst_42 {dimension_numbers = #tpu.dot_dimension_numbers<[1], [0], [0], [1], [0, 0, 1, 1], [], []>} : vector<16x16xf32>, vector<16x16xf32>, vector<16x16xf32> -> vector<16x16xf32>
    %cst_43 = arith.constant dense<0.000000e+00> : vector<16x16xf32>
    %268 = tpu.matmul %123, %267, %cst_43 {dimension_numbers = #tpu.dot_dimension_numbers<[1], [0], [0], [1], [0, 0, 1, 1], [], []>} : vector<16x16xf32>, vector<16x16xf32>, vector<16x16xf32> -> vector<16x16xf32>
    %269 = arith.addf %231, %268 : vector<16x16xf32>
    %c27 = arith.constant 27 : index
    %270 = memref.load %arg3[%c27] : memref<243xf32, #tpu.memory_space<smem>>
    %271 = vector.broadcast %270 : f32 to vector<16x16xf32>
    %272 = arith.mulf %64, %271 : vector<16x16xf32>
    %c28 = arith.constant 28 : index
    %273 = memref.load %arg3[%c28] : memref<243xf32, #tpu.memory_space<smem>>
    %274 = vector.broadcast %273 : f32 to vector<16x16xf32>
    %275 = arith.mulf %69, %274 : vector<16x16xf32>
    %276 = arith.addf %272, %275 : vector<16x16xf32>
    %c29 = arith.constant 29 : index
    %277 = memref.load %arg3[%c29] : memref<243xf32, #tpu.memory_space<smem>>
    %278 = vector.broadcast %277 : f32 to vector<16x16xf32>
    %279 = arith.mulf %74, %278 : vector<16x16xf32>
    %280 = arith.addf %276, %279 : vector<16x16xf32>
    %c30 = arith.constant 30 : index
    %281 = memref.load %arg3[%c30] : memref<243xf32, #tpu.memory_space<smem>>
    %282 = vector.broadcast %281 : f32 to vector<16x16xf32>
    %283 = arith.mulf %79, %282 : vector<16x16xf32>
    %284 = arith.addf %280, %283 : vector<16x16xf32>
    %c31 = arith.constant 31 : index
    %285 = memref.load %arg3[%c31] : memref<243xf32, #tpu.memory_space<smem>>
    %286 = vector.broadcast %285 : f32 to vector<16x16xf32>
    %287 = arith.mulf %84, %286 : vector<16x16xf32>
    %288 = arith.addf %284, %287 : vector<16x16xf32>
    %c32 = arith.constant 32 : index
    %289 = memref.load %arg3[%c32] : memref<243xf32, #tpu.memory_space<smem>>
    %290 = vector.broadcast %289 : f32 to vector<16x16xf32>
    %291 = arith.mulf %89, %290 : vector<16x16xf32>
    %292 = arith.addf %288, %291 : vector<16x16xf32>
    %c33 = arith.constant 33 : index
    %293 = memref.load %arg3[%c33] : memref<243xf32, #tpu.memory_space<smem>>
    %294 = vector.broadcast %293 : f32 to vector<16x16xf32>
    %295 = arith.mulf %94, %294 : vector<16x16xf32>
    %296 = arith.addf %292, %295 : vector<16x16xf32>
    %c34 = arith.constant 34 : index
    %297 = memref.load %arg3[%c34] : memref<243xf32, #tpu.memory_space<smem>>
    %298 = vector.broadcast %297 : f32 to vector<16x16xf32>
    %299 = arith.mulf %99, %298 : vector<16x16xf32>
    %300 = arith.addf %296, %299 : vector<16x16xf32>
    %c35 = arith.constant 35 : index
    %301 = memref.load %arg3[%c35] : memref<243xf32, #tpu.memory_space<smem>>
    %302 = vector.broadcast %301 : f32 to vector<16x16xf32>
    %303 = arith.mulf %104, %302 : vector<16x16xf32>
    %304 = arith.addf %300, %303 : vector<16x16xf32>
    %cst_44 = arith.constant dense<0.000000e+00> : vector<16x16xf32>
    %305 = tpu.matmul %156, %304, %cst_44 {dimension_numbers = #tpu.dot_dimension_numbers<[1], [0], [0], [1], [0, 0, 1, 1], [], []>} : vector<16x16xf32>, vector<16x16xf32>, vector<16x16xf32> -> vector<16x16xf32>
    %cst_45 = arith.constant dense<0.000000e+00> : vector<16x16xf32>
    %306 = tpu.matmul %128, %305, %cst_45 {dimension_numbers = #tpu.dot_dimension_numbers<[1], [0], [0], [1], [0, 0, 1, 1], [], []>} : vector<16x16xf32>, vector<16x16xf32>, vector<16x16xf32> -> vector<16x16xf32>
    %307 = arith.addf %269, %306 : vector<16x16xf32>
    %c36 = arith.constant 36 : index
    %308 = memref.load %arg3[%c36] : memref<243xf32, #tpu.memory_space<smem>>
    %309 = vector.broadcast %308 : f32 to vector<16x16xf32>
    %310 = arith.mulf %64, %309 : vector<16x16xf32>
    %c37 = arith.constant 37 : index
    %311 = memref.load %arg3[%c37] : memref<243xf32, #tpu.memory_space<smem>>
    %312 = vector.broadcast %311 : f32 to vector<16x16xf32>
    %313 = arith.mulf %69, %312 : vector<16x16xf32>
    %314 = arith.addf %310, %313 : vector<16x16xf32>
    %c38 = arith.constant 38 : index
    %315 = memref.load %arg3[%c38] : memref<243xf32, #tpu.memory_space<smem>>
    %316 = vector.broadcast %315 : f32 to vector<16x16xf32>
    %317 = arith.mulf %74, %316 : vector<16x16xf32>
    %318 = arith.addf %314, %317 : vector<16x16xf32>
    %c39 = arith.constant 39 : index
    %319 = memref.load %arg3[%c39] : memref<243xf32, #tpu.memory_space<smem>>
    %320 = vector.broadcast %319 : f32 to vector<16x16xf32>
    %321 = arith.mulf %79, %320 : vector<16x16xf32>
    %322 = arith.addf %318, %321 : vector<16x16xf32>
    %c40 = arith.constant 40 : index
    %323 = memref.load %arg3[%c40] : memref<243xf32, #tpu.memory_space<smem>>
    %324 = vector.broadcast %323 : f32 to vector<16x16xf32>
    %325 = arith.mulf %84, %324 : vector<16x16xf32>
    %326 = arith.addf %322, %325 : vector<16x16xf32>
    %c41 = arith.constant 41 : index
    %327 = memref.load %arg3[%c41] : memref<243xf32, #tpu.memory_space<smem>>
    %328 = vector.broadcast %327 : f32 to vector<16x16xf32>
    %329 = arith.mulf %89, %328 : vector<16x16xf32>
    %330 = arith.addf %326, %329 : vector<16x16xf32>
    %c42 = arith.constant 42 : index
    %331 = memref.load %arg3[%c42] : memref<243xf32, #tpu.memory_space<smem>>
    %332 = vector.broadcast %331 : f32 to vector<16x16xf32>
    %333 = arith.mulf %94, %332 : vector<16x16xf32>
    %334 = arith.addf %330, %333 : vector<16x16xf32>
    %c43 = arith.constant 43 : index
    %335 = memref.load %arg3[%c43] : memref<243xf32, #tpu.memory_space<smem>>
    %336 = vector.broadcast %335 : f32 to vector<16x16xf32>
    %337 = arith.mulf %99, %336 : vector<16x16xf32>
    %338 = arith.addf %334, %337 : vector<16x16xf32>
    %c44 = arith.constant 44 : index
    %339 = memref.load %arg3[%c44] : memref<243xf32, #tpu.memory_space<smem>>
    %340 = vector.broadcast %339 : f32 to vector<16x16xf32>
    %341 = arith.mulf %104, %340 : vector<16x16xf32>
    %342 = arith.addf %338, %341 : vector<16x16xf32>
    %cst_46 = arith.constant dense<0.000000e+00> : vector<16x16xf32>
    %343 = tpu.matmul %156, %342, %cst_46 {dimension_numbers = #tpu.dot_dimension_numbers<[1], [0], [0], [1], [0, 0, 1, 1], [], []>} : vector<16x16xf32>, vector<16x16xf32>, vector<16x16xf32> -> vector<16x16xf32>
    %cst_47 = arith.constant dense<0.000000e+00> : vector<16x16xf32>
    %344 = tpu.matmul %133, %343, %cst_47 {dimension_numbers = #tpu.dot_dimension_numbers<[1], [0], [0], [1], [0, 0, 1, 1], [], []>} : vector<16x16xf32>, vector<16x16xf32>, vector<16x16xf32> -> vector<16x16xf32>
    %345 = arith.addf %307, %344 : vector<16x16xf32>
    %c45 = arith.constant 45 : index
    %346 = memref.load %arg3[%c45] : memref<243xf32, #tpu.memory_space<smem>>
    %347 = vector.broadcast %346 : f32 to vector<16x16xf32>
    %348 = arith.mulf %64, %347 : vector<16x16xf32>
    %c46 = arith.constant 46 : index
    %349 = memref.load %arg3[%c46] : memref<243xf32, #tpu.memory_space<smem>>
    %350 = vector.broadcast %349 : f32 to vector<16x16xf32>
    %351 = arith.mulf %69, %350 : vector<16x16xf32>
    %352 = arith.addf %348, %351 : vector<16x16xf32>
    %c47 = arith.constant 47 : index
    %353 = memref.load %arg3[%c47] : memref<243xf32, #tpu.memory_space<smem>>
    %354 = vector.broadcast %353 : f32 to vector<16x16xf32>
    %355 = arith.mulf %74, %354 : vector<16x16xf32>
    %356 = arith.addf %352, %355 : vector<16x16xf32>
    %c48 = arith.constant 48 : index
    %357 = memref.load %arg3[%c48] : memref<243xf32, #tpu.memory_space<smem>>
    %358 = vector.broadcast %357 : f32 to vector<16x16xf32>
    %359 = arith.mulf %79, %358 : vector<16x16xf32>
    %360 = arith.addf %356, %359 : vector<16x16xf32>
    %c49 = arith.constant 49 : index
    %361 = memref.load %arg3[%c49] : memref<243xf32, #tpu.memory_space<smem>>
    %362 = vector.broadcast %361 : f32 to vector<16x16xf32>
    %363 = arith.mulf %84, %362 : vector<16x16xf32>
    %364 = arith.addf %360, %363 : vector<16x16xf32>
    %c50 = arith.constant 50 : index
    %365 = memref.load %arg3[%c50] : memref<243xf32, #tpu.memory_space<smem>>
    %366 = vector.broadcast %365 : f32 to vector<16x16xf32>
    %367 = arith.mulf %89, %366 : vector<16x16xf32>
    %368 = arith.addf %364, %367 : vector<16x16xf32>
    %c51 = arith.constant 51 : index
    %369 = memref.load %arg3[%c51] : memref<243xf32, #tpu.memory_space<smem>>
    %370 = vector.broadcast %369 : f32 to vector<16x16xf32>
    %371 = arith.mulf %94, %370 : vector<16x16xf32>
    %372 = arith.addf %368, %371 : vector<16x16xf32>
    %c52 = arith.constant 52 : index
    %373 = memref.load %arg3[%c52] : memref<243xf32, #tpu.memory_space<smem>>
    %374 = vector.broadcast %373 : f32 to vector<16x16xf32>
    %375 = arith.mulf %99, %374 : vector<16x16xf32>
    %376 = arith.addf %372, %375 : vector<16x16xf32>
    %c53 = arith.constant 53 : index
    %377 = memref.load %arg3[%c53] : memref<243xf32, #tpu.memory_space<smem>>
    %378 = vector.broadcast %377 : f32 to vector<16x16xf32>
    %379 = arith.mulf %104, %378 : vector<16x16xf32>
    %380 = arith.addf %376, %379 : vector<16x16xf32>
    %cst_48 = arith.constant dense<0.000000e+00> : vector<16x16xf32>
    %381 = tpu.matmul %156, %380, %cst_48 {dimension_numbers = #tpu.dot_dimension_numbers<[1], [0], [0], [1], [0, 0, 1, 1], [], []>} : vector<16x16xf32>, vector<16x16xf32>, vector<16x16xf32> -> vector<16x16xf32>
    %cst_49 = arith.constant dense<0.000000e+00> : vector<16x16xf32>
    %382 = tpu.matmul %138, %381, %cst_49 {dimension_numbers = #tpu.dot_dimension_numbers<[1], [0], [0], [1], [0, 0, 1, 1], [], []>} : vector<16x16xf32>, vector<16x16xf32>, vector<16x16xf32> -> vector<16x16xf32>
    %383 = arith.addf %345, %382 : vector<16x16xf32>
    %c54 = arith.constant 54 : index
    %384 = memref.load %arg3[%c54] : memref<243xf32, #tpu.memory_space<smem>>
    %385 = vector.broadcast %384 : f32 to vector<16x16xf32>
    %386 = arith.mulf %64, %385 : vector<16x16xf32>
    %c55 = arith.constant 55 : index
    %387 = memref.load %arg3[%c55] : memref<243xf32, #tpu.memory_space<smem>>
    %388 = vector.broadcast %387 : f32 to vector<16x16xf32>
    %389 = arith.mulf %69, %388 : vector<16x16xf32>
    %390 = arith.addf %386, %389 : vector<16x16xf32>
    %c56 = arith.constant 56 : index
    %391 = memref.load %arg3[%c56] : memref<243xf32, #tpu.memory_space<smem>>
    %392 = vector.broadcast %391 : f32 to vector<16x16xf32>
    %393 = arith.mulf %74, %392 : vector<16x16xf32>
    %394 = arith.addf %390, %393 : vector<16x16xf32>
    %c57 = arith.constant 57 : index
    %395 = memref.load %arg3[%c57] : memref<243xf32, #tpu.memory_space<smem>>
    %396 = vector.broadcast %395 : f32 to vector<16x16xf32>
    %397 = arith.mulf %79, %396 : vector<16x16xf32>
    %398 = arith.addf %394, %397 : vector<16x16xf32>
    %c58 = arith.constant 58 : index
    %399 = memref.load %arg3[%c58] : memref<243xf32, #tpu.memory_space<smem>>
    %400 = vector.broadcast %399 : f32 to vector<16x16xf32>
    %401 = arith.mulf %84, %400 : vector<16x16xf32>
    %402 = arith.addf %398, %401 : vector<16x16xf32>
    %c59 = arith.constant 59 : index
    %403 = memref.load %arg3[%c59] : memref<243xf32, #tpu.memory_space<smem>>
    %404 = vector.broadcast %403 : f32 to vector<16x16xf32>
    %405 = arith.mulf %89, %404 : vector<16x16xf32>
    %406 = arith.addf %402, %405 : vector<16x16xf32>
    %c60 = arith.constant 60 : index
    %407 = memref.load %arg3[%c60] : memref<243xf32, #tpu.memory_space<smem>>
    %408 = vector.broadcast %407 : f32 to vector<16x16xf32>
    %409 = arith.mulf %94, %408 : vector<16x16xf32>
    %410 = arith.addf %406, %409 : vector<16x16xf32>
    %c61 = arith.constant 61 : index
    %411 = memref.load %arg3[%c61] : memref<243xf32, #tpu.memory_space<smem>>
    %412 = vector.broadcast %411 : f32 to vector<16x16xf32>
    %413 = arith.mulf %99, %412 : vector<16x16xf32>
    %414 = arith.addf %410, %413 : vector<16x16xf32>
    %c62 = arith.constant 62 : index
    %415 = memref.load %arg3[%c62] : memref<243xf32, #tpu.memory_space<smem>>
    %416 = vector.broadcast %415 : f32 to vector<16x16xf32>
    %417 = arith.mulf %104, %416 : vector<16x16xf32>
    %418 = arith.addf %414, %417 : vector<16x16xf32>
    %cst_50 = arith.constant dense<0.000000e+00> : vector<16x16xf32>
    %419 = tpu.matmul %156, %418, %cst_50 {dimension_numbers = #tpu.dot_dimension_numbers<[1], [0], [0], [1], [0, 0, 1, 1], [], []>} : vector<16x16xf32>, vector<16x16xf32>, vector<16x16xf32> -> vector<16x16xf32>
    %cst_51 = arith.constant dense<0.000000e+00> : vector<16x16xf32>
    %420 = tpu.matmul %143, %419, %cst_51 {dimension_numbers = #tpu.dot_dimension_numbers<[1], [0], [0], [1], [0, 0, 1, 1], [], []>} : vector<16x16xf32>, vector<16x16xf32>, vector<16x16xf32> -> vector<16x16xf32>
    %421 = arith.addf %383, %420 : vector<16x16xf32>
    %c63 = arith.constant 63 : index
    %422 = memref.load %arg3[%c63] : memref<243xf32, #tpu.memory_space<smem>>
    %423 = vector.broadcast %422 : f32 to vector<16x16xf32>
    %424 = arith.mulf %64, %423 : vector<16x16xf32>
    %c64 = arith.constant 64 : index
    %425 = memref.load %arg3[%c64] : memref<243xf32, #tpu.memory_space<smem>>
    %426 = vector.broadcast %425 : f32 to vector<16x16xf32>
    %427 = arith.mulf %69, %426 : vector<16x16xf32>
    %428 = arith.addf %424, %427 : vector<16x16xf32>
    %c65 = arith.constant 65 : index
    %429 = memref.load %arg3[%c65] : memref<243xf32, #tpu.memory_space<smem>>
    %430 = vector.broadcast %429 : f32 to vector<16x16xf32>
    %431 = arith.mulf %74, %430 : vector<16x16xf32>
    %432 = arith.addf %428, %431 : vector<16x16xf32>
    %c66 = arith.constant 66 : index
    %433 = memref.load %arg3[%c66] : memref<243xf32, #tpu.memory_space<smem>>
    %434 = vector.broadcast %433 : f32 to vector<16x16xf32>
    %435 = arith.mulf %79, %434 : vector<16x16xf32>
    %436 = arith.addf %432, %435 : vector<16x16xf32>
    %c67 = arith.constant 67 : index
    %437 = memref.load %arg3[%c67] : memref<243xf32, #tpu.memory_space<smem>>
    %438 = vector.broadcast %437 : f32 to vector<16x16xf32>
    %439 = arith.mulf %84, %438 : vector<16x16xf32>
    %440 = arith.addf %436, %439 : vector<16x16xf32>
    %c68 = arith.constant 68 : index
    %441 = memref.load %arg3[%c68] : memref<243xf32, #tpu.memory_space<smem>>
    %442 = vector.broadcast %441 : f32 to vector<16x16xf32>
    %443 = arith.mulf %89, %442 : vector<16x16xf32>
    %444 = arith.addf %440, %443 : vector<16x16xf32>
    %c69 = arith.constant 69 : index
    %445 = memref.load %arg3[%c69] : memref<243xf32, #tpu.memory_space<smem>>
    %446 = vector.broadcast %445 : f32 to vector<16x16xf32>
    %447 = arith.mulf %94, %446 : vector<16x16xf32>
    %448 = arith.addf %444, %447 : vector<16x16xf32>
    %c70 = arith.constant 70 : index
    %449 = memref.load %arg3[%c70] : memref<243xf32, #tpu.memory_space<smem>>
    %450 = vector.broadcast %449 : f32 to vector<16x16xf32>
    %451 = arith.mulf %99, %450 : vector<16x16xf32>
    %452 = arith.addf %448, %451 : vector<16x16xf32>
    %c71 = arith.constant 71 : index
    %453 = memref.load %arg3[%c71] : memref<243xf32, #tpu.memory_space<smem>>
    %454 = vector.broadcast %453 : f32 to vector<16x16xf32>
    %455 = arith.mulf %104, %454 : vector<16x16xf32>
    %456 = arith.addf %452, %455 : vector<16x16xf32>
    %cst_52 = arith.constant dense<0.000000e+00> : vector<16x16xf32>
    %457 = tpu.matmul %156, %456, %cst_52 {dimension_numbers = #tpu.dot_dimension_numbers<[1], [0], [0], [1], [0, 0, 1, 1], [], []>} : vector<16x16xf32>, vector<16x16xf32>, vector<16x16xf32> -> vector<16x16xf32>
    %cst_53 = arith.constant dense<0.000000e+00> : vector<16x16xf32>
    %458 = tpu.matmul %148, %457, %cst_53 {dimension_numbers = #tpu.dot_dimension_numbers<[1], [0], [0], [1], [0, 0, 1, 1], [], []>} : vector<16x16xf32>, vector<16x16xf32>, vector<16x16xf32> -> vector<16x16xf32>
    %459 = arith.addf %421, %458 : vector<16x16xf32>
    %c72 = arith.constant 72 : index
    %460 = memref.load %arg3[%c72] : memref<243xf32, #tpu.memory_space<smem>>
    %461 = vector.broadcast %460 : f32 to vector<16x16xf32>
    %462 = arith.mulf %64, %461 : vector<16x16xf32>
    %c73 = arith.constant 73 : index
    %463 = memref.load %arg3[%c73] : memref<243xf32, #tpu.memory_space<smem>>
    %464 = vector.broadcast %463 : f32 to vector<16x16xf32>
    %465 = arith.mulf %69, %464 : vector<16x16xf32>
    %466 = arith.addf %462, %465 : vector<16x16xf32>
    %c74 = arith.constant 74 : index
    %467 = memref.load %arg3[%c74] : memref<243xf32, #tpu.memory_space<smem>>
    %468 = vector.broadcast %467 : f32 to vector<16x16xf32>
    %469 = arith.mulf %74, %468 : vector<16x16xf32>
    %470 = arith.addf %466, %469 : vector<16x16xf32>
    %c75 = arith.constant 75 : index
    %471 = memref.load %arg3[%c75] : memref<243xf32, #tpu.memory_space<smem>>
    %472 = vector.broadcast %471 : f32 to vector<16x16xf32>
    %473 = arith.mulf %79, %472 : vector<16x16xf32>
    %474 = arith.addf %470, %473 : vector<16x16xf32>
    %c76 = arith.constant 76 : index
    %475 = memref.load %arg3[%c76] : memref<243xf32, #tpu.memory_space<smem>>
    %476 = vector.broadcast %475 : f32 to vector<16x16xf32>
    %477 = arith.mulf %84, %476 : vector<16x16xf32>
    %478 = arith.addf %474, %477 : vector<16x16xf32>
    %c77 = arith.constant 77 : index
    %479 = memref.load %arg3[%c77] : memref<243xf32, #tpu.memory_space<smem>>
    %480 = vector.broadcast %479 : f32 to vector<16x16xf32>
    %481 = arith.mulf %89, %480 : vector<16x16xf32>
    %482 = arith.addf %478, %481 : vector<16x16xf32>
    %c78 = arith.constant 78 : index
    %483 = memref.load %arg3[%c78] : memref<243xf32, #tpu.memory_space<smem>>
    %484 = vector.broadcast %483 : f32 to vector<16x16xf32>
    %485 = arith.mulf %94, %484 : vector<16x16xf32>
    %486 = arith.addf %482, %485 : vector<16x16xf32>
    %c79 = arith.constant 79 : index
    %487 = memref.load %arg3[%c79] : memref<243xf32, #tpu.memory_space<smem>>
    %488 = vector.broadcast %487 : f32 to vector<16x16xf32>
    %489 = arith.mulf %99, %488 : vector<16x16xf32>
    %490 = arith.addf %486, %489 : vector<16x16xf32>
    %c80 = arith.constant 80 : index
    %491 = memref.load %arg3[%c80] : memref<243xf32, #tpu.memory_space<smem>>
    %492 = vector.broadcast %491 : f32 to vector<16x16xf32>
    %493 = arith.mulf %104, %492 : vector<16x16xf32>
    %494 = arith.addf %490, %493 : vector<16x16xf32>
    %cst_54 = arith.constant dense<0.000000e+00> : vector<16x16xf32>
    %495 = tpu.matmul %156, %494, %cst_54 {dimension_numbers = #tpu.dot_dimension_numbers<[1], [0], [0], [1], [0, 0, 1, 1], [], []>} : vector<16x16xf32>, vector<16x16xf32>, vector<16x16xf32> -> vector<16x16xf32>
    %cst_55 = arith.constant dense<0.000000e+00> : vector<16x16xf32>
    %496 = tpu.matmul %153, %495, %cst_55 {dimension_numbers = #tpu.dot_dimension_numbers<[1], [0], [0], [1], [0, 0, 1, 1], [], []>} : vector<16x16xf32>, vector<16x16xf32>, vector<16x16xf32> -> vector<16x16xf32>
    %497 = arith.addf %459, %496 : vector<16x16xf32>
    %498 = arith.negf %497 : vector<16x16xf32>
    %499 = math.exp %498 : vector<16x16xf32>
    %cst_56 = arith.constant 1.000000e+00 : f32
    %500 = vector.broadcast %cst_56 : f32 to vector<16x16xf32>
    %501 = arith.addf %500, %499 : vector<16x16xf32>
    %502 = arith.divf %500, %501 : vector<16x16xf32>
    %503 = arith.mulf %155, %502 : vector<16x16xf32>
    %cst_57 = arith.constant dense<0.000000e+00> : vector<16x256xf32>
    %504 = tpu.matmul %503, %55, %cst_57 {dimension_numbers = #tpu.dot_dimension_numbers<[1], [0], [0], [1], [0, 0, 1, 1], [], []>} : vector<16x16xf32>, vector<16x256xf32>, vector<16x256xf32> -> vector<16x256xf32>
    %505 = arith.mulf %20, %504 : vector<16x256xf32>
    %cst_58 = arith.constant dense<0.000000e+00> : vector<256xf32>
    %506 = vector.multi_reduction <add>, %505, %cst_58 [0] : vector<16x256xf32> to vector<256xf32>
    %507 = vector.shape_cast %506 : vector<256xf32> to vector<1x256xf32>
    %508 = vector.broadcast %507 : vector<1x256xf32> to vector<8x256xf32>
    %509 = arith.mulf %1, %508 : vector<8x256xf32>
    %cst_59 = arith.constant dense<0xFF800000> : vector<8xf32>
    %510 = vector.multi_reduction <maximumf>, %509, %cst_59 [1] : vector<8x256xf32> to vector<8xf32>
    %511 = vector.shape_cast %510 : vector<8xf32> to vector<8x1xf32>
    %c0_60 = arith.constant 0 : index
    %c0_61 = arith.constant 0 : index
    %c0_62 = arith.constant 0 : index
    %512 = vector.load %arg4[%c0_60, %c0_61, %c0_62] : memref<3x8x2xf32, #tpu.memory_space<vmem>>, vector<1x8x2xf32>
    %513 = vector.shape_cast %512 : vector<1x8x2xf32> to vector<8x2xf32>
    %514 = vector.broadcast %511 : vector<8x1xf32> to vector<8x2xf32>
    %515 = arith.mulf %513, %514 : vector<8x2xf32>
    %cst_63 = arith.constant dense<0.000000e+00> : vector<2xf32>
    %516 = vector.multi_reduction <add>, %515, %cst_63 [0] : vector<8x2xf32> to vector<2xf32>
    %517 = vector.shape_cast %516 : vector<2xf32> to vector<1x2xf32>
    %cst_64 = arith.constant 0.000000e+00 : f32
    %518 = vector.broadcast %cst_64 : f32 to vector<1x2xf32>
    %519 = arith.maximumf %517, %518 : vector<1x2xf32>
    %c0_65 = arith.constant 0 : index
    %c0_66 = arith.constant 0 : index
    %c0_67 = arith.constant 0 : index
    %520 = vector.load %arg5[%c0_65, %c0_66, %c0_67] : memref<3x8x2xf32, #tpu.memory_space<vmem>>, vector<1x8x2xf32>
    %521 = vector.shape_cast %520 : vector<1x8x2xf32> to vector<8x2xf32>
    %522 = vector.broadcast %519 : vector<1x2xf32> to vector<8x2xf32>
    %523 = arith.mulf %521, %522 : vector<8x2xf32>
    %cst_68 = arith.constant dense<0.000000e+00> : vector<8xf32>
    %524 = vector.multi_reduction <add>, %523, %cst_68 [1] : vector<8x2xf32> to vector<8xf32>
    %525 = vector.shape_cast %524 : vector<8xf32> to vector<8x1xf32>
    %526 = arith.negf %525 : vector<8x1xf32>
    %527 = math.exp %526 : vector<8x1xf32>
    %cst_69 = arith.constant 1.000000e+00 : f32
    %528 = vector.broadcast %cst_69 : f32 to vector<8x1xf32>
    %529 = arith.addf %528, %527 : vector<8x1xf32>
    %530 = arith.divf %528, %529 : vector<8x1xf32>
    %c0_70 = arith.constant 0 : index
    %c0_71 = arith.constant 0 : index
    %c0_72 = arith.constant 0 : index
    %531 = vector.load %arg6[%c0_70, %c0_71, %c0_72] : memref<1x8x256xf32, #tpu.memory_space<vmem>>, vector<1x8x256xf32>
    %532 = vector.shape_cast %531 : vector<1x8x256xf32> to vector<8x256xf32>
    %533 = vector.broadcast %530 : vector<8x1xf32> to vector<8x256xf32>
    %534 = arith.mulf %533, %509 : vector<8x256xf32>
    %535 = arith.addf %532, %534 : vector<8x256xf32>
    %c0_73 = arith.constant 0 : index
    %c0_74 = arith.constant 0 : index
    %c0_75 = arith.constant 0 : index
    %536 = vector.load %arg6[%c0_73, %c0_74, %c0_75] : memref<1x8x256xf32, #tpu.memory_space<vmem>>, vector<1x8x256xf32>
    %537 = vector.shape_cast %536 : vector<1x8x256xf32> to vector<8x256xf32>
    %538 = vector.shape_cast %535 : vector<8x256xf32> to vector<1x8x256xf32>
    tpu.vector_store %arg6[%c0_73, %c0_74, %c0_75], %538 {strides = array<i32>} : memref<1x8x256xf32, #tpu.memory_space<vmem>>, vector<1x8x256xf32>,
    %c0_76 = arith.constant 0 : index
    %c1_77 = arith.constant 1 : index
    %c0_78 = arith.constant 0 : index
    %c0_79 = arith.constant 0 : index
    %539 = vector.load %arg2[%c0_76, %c1_77, %c0_78, %c0_79] : memref<1x3x16x16xf32, #tpu.memory_space<vmem>>, vector<1x1x16x16xf32>
    %540 = vector.shape_cast %539 : vector<1x1x16x16xf32> to vector<16x16xf32>
    %541 = arith.mulf %540, %39 : vector<16x16xf32>
    %c81 = arith.constant 81 : index
    %542 = memref.load %arg3[%c81] : memref<243xf32, #tpu.memory_space<smem>>
    %543 = vector.broadcast %542 : f32 to vector<16x16xf32>
    %544 = arith.mulf %64, %543 : vector<16x16xf32>
    %c82 = arith.constant 82 : index
    %545 = memref.load %arg3[%c82] : memref<243xf32, #tpu.memory_space<smem>>
    %546 = vector.broadcast %545 : f32 to vector<16x16xf32>
    %547 = arith.mulf %69, %546 : vector<16x16xf32>
    %548 = arith.addf %544, %547 : vector<16x16xf32>
    %c83 = arith.constant 83 : index
    %549 = memref.load %arg3[%c83] : memref<243xf32, #tpu.memory_space<smem>>
    %550 = vector.broadcast %549 : f32 to vector<16x16xf32>
    %551 = arith.mulf %74, %550 : vector<16x16xf32>
    %552 = arith.addf %548, %551 : vector<16x16xf32>
    %c84 = arith.constant 84 : index
    %553 = memref.load %arg3[%c84] : memref<243xf32, #tpu.memory_space<smem>>
    %554 = vector.broadcast %553 : f32 to vector<16x16xf32>
    %555 = arith.mulf %79, %554 : vector<16x16xf32>
    %556 = arith.addf %552, %555 : vector<16x16xf32>
    %c85 = arith.constant 85 : index
    %557 = memref.load %arg3[%c85] : memref<243xf32, #tpu.memory_space<smem>>
    %558 = vector.broadcast %557 : f32 to vector<16x16xf32>
    %559 = arith.mulf %84, %558 : vector<16x16xf32>
    %560 = arith.addf %556, %559 : vector<16x16xf32>
    %c86 = arith.constant 86 : index
    %561 = memref.load %arg3[%c86] : memref<243xf32, #tpu.memory_space<smem>>
    %562 = vector.broadcast %561 : f32 to vector<16x16xf32>
    %563 = arith.mulf %89, %562 : vector<16x16xf32>
    %564 = arith.addf %560, %563 : vector<16x16xf32>
    %c87 = arith.constant 87 : index
    %565 = memref.load %arg3[%c87] : memref<243xf32, #tpu.memory_space<smem>>
    %566 = vector.broadcast %565 : f32 to vector<16x16xf32>
    %567 = arith.mulf %94, %566 : vector<16x16xf32>
    %568 = arith.addf %564, %567 : vector<16x16xf32>
    %c88 = arith.constant 88 : index
    %569 = memref.load %arg3[%c88] : memref<243xf32, #tpu.memory_space<smem>>
    %570 = vector.broadcast %569 : f32 to vector<16x16xf32>
    %571 = arith.mulf %99, %570 : vector<16x16xf32>
    %572 = arith.addf %568, %571 : vector<16x16xf32>
    %c89 = arith.constant 89 : index
    %573 = memref.load %arg3[%c89] : memref<243xf32, #tpu.memory_space<smem>>
    %574 = vector.broadcast %573 : f32 to vector<16x16xf32>
    %575 = arith.mulf %104, %574 : vector<16x16xf32>
    %576 = arith.addf %572, %575 : vector<16x16xf32>
    %cst_80 = arith.constant dense<0.000000e+00> : vector<16x16xf32>
    %577 = tpu.matmul %541, %576, %cst_80 {dimension_numbers = #tpu.dot_dimension_numbers<[1], [0], [0], [1], [0, 0, 1, 1], [], []>} : vector<16x16xf32>, vector<16x16xf32>, vector<16x16xf32> -> vector<16x16xf32>
    %cst_81 = arith.constant dense<0.000000e+00> : vector<16x16xf32>
    %578 = tpu.matmul %113, %577, %cst_81 {dimension_numbers = #tpu.dot_dimension_numbers<[1], [0], [0], [1], [0, 0, 1, 1], [], []>} : vector<16x16xf32>, vector<16x16xf32>, vector<16x16xf32> -> vector<16x16xf32>
    %c90 = arith.constant 90 : index
    %579 = memref.load %arg3[%c90] : memref<243xf32, #tpu.memory_space<smem>>
    %580 = vector.broadcast %579 : f32 to vector<16x16xf32>
    %581 = arith.mulf %64, %580 : vector<16x16xf32>
    %c91 = arith.constant 91 : index
    %582 = memref.load %arg3[%c91] : memref<243xf32, #tpu.memory_space<smem>>
    %583 = vector.broadcast %582 : f32 to vector<16x16xf32>
    %584 = arith.mulf %69, %583 : vector<16x16xf32>
    %585 = arith.addf %581, %584 : vector<16x16xf32>
    %c92 = arith.constant 92 : index
    %586 = memref.load %arg3[%c92] : memref<243xf32, #tpu.memory_space<smem>>
    %587 = vector.broadcast %586 : f32 to vector<16x16xf32>
    %588 = arith.mulf %74, %587 : vector<16x16xf32>
    %589 = arith.addf %585, %588 : vector<16x16xf32>
    %c93 = arith.constant 93 : index
    %590 = memref.load %arg3[%c93] : memref<243xf32, #tpu.memory_space<smem>>
    %591 = vector.broadcast %590 : f32 to vector<16x16xf32>
    %592 = arith.mulf %79, %591 : vector<16x16xf32>
    %593 = arith.addf %589, %592 : vector<16x16xf32>
    %c94 = arith.constant 94 : index
    %594 = memref.load %arg3[%c94] : memref<243xf32, #tpu.memory_space<smem>>
    %595 = vector.broadcast %594 : f32 to vector<16x16xf32>
    %596 = arith.mulf %84, %595 : vector<16x16xf32>
    %597 = arith.addf %593, %596 : vector<16x16xf32>
    %c95 = arith.constant 95 : index
    %598 = memref.load %arg3[%c95] : memref<243xf32, #tpu.memory_space<smem>>
    %599 = vector.broadcast %598 : f32 to vector<16x16xf32>
    %600 = arith.mulf %89, %599 : vector<16x16xf32>
    %601 = arith.addf %597, %600 : vector<16x16xf32>
    %c96 = arith.constant 96 : index
    %602 = memref.load %arg3[%c96] : memref<243xf32, #tpu.memory_space<smem>>
    %603 = vector.broadcast %602 : f32 to vector<16x16xf32>
    %604 = arith.mulf %94, %603 : vector<16x16xf32>
    %605 = arith.addf %601, %604 : vector<16x16xf32>
    %c97 = arith.constant 97 : index
    %606 = memref.load %arg3[%c97] : memref<243xf32, #tpu.memory_space<smem>>
    %607 = vector.broadcast %606 : f32 to vector<16x16xf32>
    %608 = arith.mulf %99, %607 : vector<16x16xf32>
    %609 = arith.addf %605, %608 : vector<16x16xf32>
    %c98 = arith.constant 98 : index
    %610 = memref.load %arg3[%c98] : memref<243xf32, #tpu.memory_space<smem>>
    %611 = vector.broadcast %610 : f32 to vector<16x16xf32>
    %612 = arith.mulf %104, %611 : vector<16x16xf32>
    %613 = arith.addf %609, %612 : vector<16x16xf32>
    %cst_82 = arith.constant dense<0.000000e+00> : vector<16x16xf32>
    %614 = tpu.matmul %541, %613, %cst_82 {dimension_numbers = #tpu.dot_dimension_numbers<[1], [0], [0], [1], [0, 0, 1, 1], [], []>} : vector<16x16xf32>, vector<16x16xf32>, vector<16x16xf32> -> vector<16x16xf32>
    %cst_83 = arith.constant dense<0.000000e+00> : vector<16x16xf32>
    %615 = tpu.matmul %118, %614, %cst_83 {dimension_numbers = #tpu.dot_dimension_numbers<[1], [0], [0], [1], [0, 0, 1, 1], [], []>} : vector<16x16xf32>, vector<16x16xf32>, vector<16x16xf32> -> vector<16x16xf32>
    %616 = arith.addf %578, %615 : vector<16x16xf32>
    %c99 = arith.constant 99 : index
    %617 = memref.load %arg3[%c99] : memref<243xf32, #tpu.memory_space<smem>>
    %618 = vector.broadcast %617 : f32 to vector<16x16xf32>
    %619 = arith.mulf %64, %618 : vector<16x16xf32>
    %c100 = arith.constant 100 : index
    %620 = memref.load %arg3[%c100] : memref<243xf32, #tpu.memory_space<smem>>
    %621 = vector.broadcast %620 : f32 to vector<16x16xf32>
    %622 = arith.mulf %69, %621 : vector<16x16xf32>
    %623 = arith.addf %619, %622 : vector<16x16xf32>
    %c101 = arith.constant 101 : index
    %624 = memref.load %arg3[%c101] : memref<243xf32, #tpu.memory_space<smem>>
    %625 = vector.broadcast %624 : f32 to vector<16x16xf32>
    %626 = arith.mulf %74, %625 : vector<16x16xf32>
    %627 = arith.addf %623, %626 : vector<16x16xf32>
    %c102 = arith.constant 102 : index
    %628 = memref.load %arg3[%c102] : memref<243xf32, #tpu.memory_space<smem>>
    %629 = vector.broadcast %628 : f32 to vector<16x16xf32>
    %630 = arith.mulf %79, %629 : vector<16x16xf32>
    %631 = arith.addf %627, %630 : vector<16x16xf32>
    %c103 = arith.constant 103 : index
    %632 = memref.load %arg3[%c103] : memref<243xf32, #tpu.memory_space<smem>>
    %633 = vector.broadcast %632 : f32 to vector<16x16xf32>
    %634 = arith.mulf %84, %633 : vector<16x16xf32>
    %635 = arith.addf %631, %634 : vector<16x16xf32>
    %c104 = arith.constant 104 : index
    %636 = memref.load %arg3[%c104] : memref<243xf32, #tpu.memory_space<smem>>
    %637 = vector.broadcast %636 : f32 to vector<16x16xf32>
    %638 = arith.mulf %89, %637 : vector<16x16xf32>
    %639 = arith.addf %635, %638 : vector<16x16xf32>
    %c105 = arith.constant 105 : index
    %640 = memref.load %arg3[%c105] : memref<243xf32, #tpu.memory_space<smem>>
    %641 = vector.broadcast %640 : f32 to vector<16x16xf32>
    %642 = arith.mulf %94, %641 : vector<16x16xf32>
    %643 = arith.addf %639, %642 : vector<16x16xf32>
    %c106 = arith.constant 106 : index
    %644 = memref.load %arg3[%c106] : memref<243xf32, #tpu.memory_space<smem>>
    %645 = vector.broadcast %644 : f32 to vector<16x16xf32>
    %646 = arith.mulf %99, %645 : vector<16x16xf32>
    %647 = arith.addf %643, %646 : vector<16x16xf32>
    %c107 = arith.constant 107 : index
    %648 = memref.load %arg3[%c107] : memref<243xf32, #tpu.memory_space<smem>>
    %649 = vector.broadcast %648 : f32 to vector<16x16xf32>
    %650 = arith.mulf %104, %649 : vector<16x16xf32>
    %651 = arith.addf %647, %650 : vector<16x16xf32>
    %cst_84 = arith.constant dense<0.000000e+00> : vector<16x16xf32>
    %652 = tpu.matmul %541, %651, %cst_84 {dimension_numbers = #tpu.dot_dimension_numbers<[1], [0], [0], [1], [0, 0, 1, 1], [], []>} : vector<16x16xf32>, vector<16x16xf32>, vector<16x16xf32> -> vector<16x16xf32>
    %cst_85 = arith.constant dense<0.000000e+00> : vector<16x16xf32>
    %653 = tpu.matmul %123, %652, %cst_85 {dimension_numbers = #tpu.dot_dimension_numbers<[1], [0], [0], [1], [0, 0, 1, 1], [], []>} : vector<16x16xf32>, vector<16x16xf32>, vector<16x16xf32> -> vector<16x16xf32>
    %654 = arith.addf %616, %653 : vector<16x16xf32>
    %c108 = arith.constant 108 : index
    %655 = memref.load %arg3[%c108] : memref<243xf32, #tpu.memory_space<smem>>
    %656 = vector.broadcast %655 : f32 to vector<16x16xf32>
    %657 = arith.mulf %64, %656 : vector<16x16xf32>
    %c109 = arith.constant 109 : index
    %658 = memref.load %arg3[%c109] : memref<243xf32, #tpu.memory_space<smem>>
    %659 = vector.broadcast %658 : f32 to vector<16x16xf32>
    %660 = arith.mulf %69, %659 : vector<16x16xf32>
    %661 = arith.addf %657, %660 : vector<16x16xf32>
    %c110 = arith.constant 110 : index
    %662 = memref.load %arg3[%c110] : memref<243xf32, #tpu.memory_space<smem>>
    %663 = vector.broadcast %662 : f32 to vector<16x16xf32>
    %664 = arith.mulf %74, %663 : vector<16x16xf32>
    %665 = arith.addf %661, %664 : vector<16x16xf32>
    %c111 = arith.constant 111 : index
    %666 = memref.load %arg3[%c111] : memref<243xf32, #tpu.memory_space<smem>>
    %667 = vector.broadcast %666 : f32 to vector<16x16xf32>
    %668 = arith.mulf %79, %667 : vector<16x16xf32>
    %669 = arith.addf %665, %668 : vector<16x16xf32>
    %c112 = arith.constant 112 : index
    %670 = memref.load %arg3[%c112] : memref<243xf32, #tpu.memory_space<smem>>
    %671 = vector.broadcast %670 : f32 to vector<16x16xf32>
    %672 = arith.mulf %84, %671 : vector<16x16xf32>
    %673 = arith.addf %669, %672 : vector<16x16xf32>
    %c113 = arith.constant 113 : index
    %674 = memref.load %arg3[%c113] : memref<243xf32, #tpu.memory_space<smem>>
    %675 = vector.broadcast %674 : f32 to vector<16x16xf32>
    %676 = arith.mulf %89, %675 : vector<16x16xf32>
    %677 = arith.addf %673, %676 : vector<16x16xf32>
    %c114 = arith.constant 114 : index
    %678 = memref.load %arg3[%c114] : memref<243xf32, #tpu.memory_space<smem>>
    %679 = vector.broadcast %678 : f32 to vector<16x16xf32>
    %680 = arith.mulf %94, %679 : vector<16x16xf32>
    %681 = arith.addf %677, %680 : vector<16x16xf32>
    %c115 = arith.constant 115 : index
    %682 = memref.load %arg3[%c115] : memref<243xf32, #tpu.memory_space<smem>>
    %683 = vector.broadcast %682 : f32 to vector<16x16xf32>
    %684 = arith.mulf %99, %683 : vector<16x16xf32>
    %685 = arith.addf %681, %684 : vector<16x16xf32>
    %c116 = arith.constant 116 : index
    %686 = memref.load %arg3[%c116] : memref<243xf32, #tpu.memory_space<smem>>
    %687 = vector.broadcast %686 : f32 to vector<16x16xf32>
    %688 = arith.mulf %104, %687 : vector<16x16xf32>
    %689 = arith.addf %685, %688 : vector<16x16xf32>
    %cst_86 = arith.constant dense<0.000000e+00> : vector<16x16xf32>
    %690 = tpu.matmul %541, %689, %cst_86 {dimension_numbers = #tpu.dot_dimension_numbers<[1], [0], [0], [1], [0, 0, 1, 1], [], []>} : vector<16x16xf32>, vector<16x16xf32>, vector<16x16xf32> -> vector<16x16xf32>
    %cst_87 = arith.constant dense<0.000000e+00> : vector<16x16xf32>
    %691 = tpu.matmul %128, %690, %cst_87 {dimension_numbers = #tpu.dot_dimension_numbers<[1], [0], [0], [1], [0, 0, 1, 1], [], []>} : vector<16x16xf32>, vector<16x16xf32>, vector<16x16xf32> -> vector<16x16xf32>
    %692 = arith.addf %654, %691 : vector<16x16xf32>
    %c117 = arith.constant 117 : index
    %693 = memref.load %arg3[%c117] : memref<243xf32, #tpu.memory_space<smem>>
    %694 = vector.broadcast %693 : f32 to vector<16x16xf32>
    %695 = arith.mulf %64, %694 : vector<16x16xf32>
    %c118 = arith.constant 118 : index
    %696 = memref.load %arg3[%c118] : memref<243xf32, #tpu.memory_space<smem>>
    %697 = vector.broadcast %696 : f32 to vector<16x16xf32>
    %698 = arith.mulf %69, %697 : vector<16x16xf32>
    %699 = arith.addf %695, %698 : vector<16x16xf32>
    %c119 = arith.constant 119 : index
    %700 = memref.load %arg3[%c119] : memref<243xf32, #tpu.memory_space<smem>>
    %701 = vector.broadcast %700 : f32 to vector<16x16xf32>
    %702 = arith.mulf %74, %701 : vector<16x16xf32>
    %703 = arith.addf %699, %702 : vector<16x16xf32>
    %c120 = arith.constant 120 : index
    %704 = memref.load %arg3[%c120] : memref<243xf32, #tpu.memory_space<smem>>
    %705 = vector.broadcast %704 : f32 to vector<16x16xf32>
    %706 = arith.mulf %79, %705 : vector<16x16xf32>
    %707 = arith.addf %703, %706 : vector<16x16xf32>
    %c121 = arith.constant 121 : index
    %708 = memref.load %arg3[%c121] : memref<243xf32, #tpu.memory_space<smem>>
    %709 = vector.broadcast %708 : f32 to vector<16x16xf32>
    %710 = arith.mulf %84, %709 : vector<16x16xf32>
    %711 = arith.addf %707, %710 : vector<16x16xf32>
    %c122 = arith.constant 122 : index
    %712 = memref.load %arg3[%c122] : memref<243xf32, #tpu.memory_space<smem>>
    %713 = vector.broadcast %712 : f32 to vector<16x16xf32>
    %714 = arith.mulf %89, %713 : vector<16x16xf32>
    %715 = arith.addf %711, %714 : vector<16x16xf32>
    %c123 = arith.constant 123 : index
    %716 = memref.load %arg3[%c123] : memref<243xf32, #tpu.memory_space<smem>>
    %717 = vector.broadcast %716 : f32 to vector<16x16xf32>
    %718 = arith.mulf %94, %717 : vector<16x16xf32>
    %719 = arith.addf %715, %718 : vector<16x16xf32>
    %c124 = arith.constant 124 : index
    %720 = memref.load %arg3[%c124] : memref<243xf32, #tpu.memory_space<smem>>
    %721 = vector.broadcast %720 : f32 to vector<16x16xf32>
    %722 = arith.mulf %99, %721 : vector<16x16xf32>
    %723 = arith.addf %719, %722 : vector<16x16xf32>
    %c125 = arith.constant 125 : index
    %724 = memref.load %arg3[%c125] : memref<243xf32, #tpu.memory_space<smem>>
    %725 = vector.broadcast %724 : f32 to vector<16x16xf32>
    %726 = arith.mulf %104, %725 : vector<16x16xf32>
    %727 = arith.addf %723, %726 : vector<16x16xf32>
    %cst_88 = arith.constant dense<0.000000e+00> : vector<16x16xf32>
    %728 = tpu.matmul %541, %727, %cst_88 {dimension_numbers = #tpu.dot_dimension_numbers<[1], [0], [0], [1], [0, 0, 1, 1], [], []>} : vector<16x16xf32>, vector<16x16xf32>, vector<16x16xf32> -> vector<16x16xf32>
    %cst_89 = arith.constant dense<0.000000e+00> : vector<16x16xf32>
    %729 = tpu.matmul %133, %728, %cst_89 {dimension_numbers = #tpu.dot_dimension_numbers<[1], [0], [0], [1], [0, 0, 1, 1], [], []>} : vector<16x16xf32>, vector<16x16xf32>, vector<16x16xf32> -> vector<16x16xf32>
    %730 = arith.addf %692, %729 : vector<16x16xf32>
    %c126 = arith.constant 126 : index
    %731 = memref.load %arg3[%c126] : memref<243xf32, #tpu.memory_space<smem>>
    %732 = vector.broadcast %731 : f32 to vector<16x16xf32>
    %733 = arith.mulf %64, %732 : vector<16x16xf32>
    %c127 = arith.constant 127 : index
    %734 = memref.load %arg3[%c127] : memref<243xf32, #tpu.memory_space<smem>>
    %735 = vector.broadcast %734 : f32 to vector<16x16xf32>
    %736 = arith.mulf %69, %735 : vector<16x16xf32>
    %737 = arith.addf %733, %736 : vector<16x16xf32>
    %c128 = arith.constant 128 : index
    %738 = memref.load %arg3[%c128] : memref<243xf32, #tpu.memory_space<smem>>
    %739 = vector.broadcast %738 : f32 to vector<16x16xf32>
    %740 = arith.mulf %74, %739 : vector<16x16xf32>
    %741 = arith.addf %737, %740 : vector<16x16xf32>
    %c129 = arith.constant 129 : index
    %742 = memref.load %arg3[%c129] : memref<243xf32, #tpu.memory_space<smem>>
    %743 = vector.broadcast %742 : f32 to vector<16x16xf32>
    %744 = arith.mulf %79, %743 : vector<16x16xf32>
    %745 = arith.addf %741, %744 : vector<16x16xf32>
    %c130 = arith.constant 130 : index
    %746 = memref.load %arg3[%c130] : memref<243xf32, #tpu.memory_space<smem>>
    %747 = vector.broadcast %746 : f32 to vector<16x16xf32>
    %748 = arith.mulf %84, %747 : vector<16x16xf32>
    %749 = arith.addf %745, %748 : vector<16x16xf32>
    %c131 = arith.constant 131 : index
    %750 = memref.load %arg3[%c131] : memref<243xf32, #tpu.memory_space<smem>>
    %751 = vector.broadcast %750 : f32 to vector<16x16xf32>
    %752 = arith.mulf %89, %751 : vector<16x16xf32>
    %753 = arith.addf %749, %752 : vector<16x16xf32>
    %c132 = arith.constant 132 : index
    %754 = memref.load %arg3[%c132] : memref<243xf32, #tpu.memory_space<smem>>
    %755 = vector.broadcast %754 : f32 to vector<16x16xf32>
    %756 = arith.mulf %94, %755 : vector<16x16xf32>
    %757 = arith.addf %753, %756 : vector<16x16xf32>
    %c133 = arith.constant 133 : index
    %758 = memref.load %arg3[%c133] : memref<243xf32, #tpu.memory_space<smem>>
    %759 = vector.broadcast %758 : f32 to vector<16x16xf32>
    %760 = arith.mulf %99, %759 : vector<16x16xf32>
    %761 = arith.addf %757, %760 : vector<16x16xf32>
    %c134 = arith.constant 134 : index
    %762 = memref.load %arg3[%c134] : memref<243xf32, #tpu.memory_space<smem>>
    %763 = vector.broadcast %762 : f32 to vector<16x16xf32>
    %764 = arith.mulf %104, %763 : vector<16x16xf32>
    %765 = arith.addf %761, %764 : vector<16x16xf32>
    %cst_90 = arith.constant dense<0.000000e+00> : vector<16x16xf32>
    %766 = tpu.matmul %541, %765, %cst_90 {dimension_numbers = #tpu.dot_dimension_numbers<[1], [0], [0], [1], [0, 0, 1, 1], [], []>} : vector<16x16xf32>, vector<16x16xf32>, vector<16x16xf32> -> vector<16x16xf32>
    %cst_91 = arith.constant dense<0.000000e+00> : vector<16x16xf32>
    %767 = tpu.matmul %138, %766, %cst_91 {dimension_numbers = #tpu.dot_dimension_numbers<[1], [0], [0], [1], [0, 0, 1, 1], [], []>} : vector<16x16xf32>, vector<16x16xf32>, vector<16x16xf32> -> vector<16x16xf32>
    %768 = arith.addf %730, %767 : vector<16x16xf32>
    %c135 = arith.constant 135 : index
    %769 = memref.load %arg3[%c135] : memref<243xf32, #tpu.memory_space<smem>>
    %770 = vector.broadcast %769 : f32 to vector<16x16xf32>
    %771 = arith.mulf %64, %770 : vector<16x16xf32>
    %c136 = arith.constant 136 : index
    %772 = memref.load %arg3[%c136] : memref<243xf32, #tpu.memory_space<smem>>
    %773 = vector.broadcast %772 : f32 to vector<16x16xf32>
    %774 = arith.mulf %69, %773 : vector<16x16xf32>
    %775 = arith.addf %771, %774 : vector<16x16xf32>
    %c137 = arith.constant 137 : index
    %776 = memref.load %arg3[%c137] : memref<243xf32, #tpu.memory_space<smem>>
    %777 = vector.broadcast %776 : f32 to vector<16x16xf32>
    %778 = arith.mulf %74, %777 : vector<16x16xf32>
    %779 = arith.addf %775, %778 : vector<16x16xf32>
    %c138 = arith.constant 138 : index
    %780 = memref.load %arg3[%c138] : memref<243xf32, #tpu.memory_space<smem>>
    %781 = vector.broadcast %780 : f32 to vector<16x16xf32>
    %782 = arith.mulf %79, %781 : vector<16x16xf32>
    %783 = arith.addf %779, %782 : vector<16x16xf32>
    %c139 = arith.constant 139 : index
    %784 = memref.load %arg3[%c139] : memref<243xf32, #tpu.memory_space<smem>>
    %785 = vector.broadcast %784 : f32 to vector<16x16xf32>
    %786 = arith.mulf %84, %785 : vector<16x16xf32>
    %787 = arith.addf %783, %786 : vector<16x16xf32>
    %c140 = arith.constant 140 : index
    %788 = memref.load %arg3[%c140] : memref<243xf32, #tpu.memory_space<smem>>
    %789 = vector.broadcast %788 : f32 to vector<16x16xf32>
    %790 = arith.mulf %89, %789 : vector<16x16xf32>
    %791 = arith.addf %787, %790 : vector<16x16xf32>
    %c141 = arith.constant 141 : index
    %792 = memref.load %arg3[%c141] : memref<243xf32, #tpu.memory_space<smem>>
    %793 = vector.broadcast %792 : f32 to vector<16x16xf32>
    %794 = arith.mulf %94, %793 : vector<16x16xf32>
    %795 = arith.addf %791, %794 : vector<16x16xf32>
    %c142 = arith.constant 142 : index
    %796 = memref.load %arg3[%c142] : memref<243xf32, #tpu.memory_space<smem>>
    %797 = vector.broadcast %796 : f32 to vector<16x16xf32>
    %798 = arith.mulf %99, %797 : vector<16x16xf32>
    %799 = arith.addf %795, %798 : vector<16x16xf32>
    %c143 = arith.constant 143 : index
    %800 = memref.load %arg3[%c143] : memref<243xf32, #tpu.memory_space<smem>>
    %801 = vector.broadcast %800 : f32 to vector<16x16xf32>
    %802 = arith.mulf %104, %801 : vector<16x16xf32>
    %803 = arith.addf %799, %802 : vector<16x16xf32>
    %cst_92 = arith.constant dense<0.000000e+00> : vector<16x16xf32>
    %804 = tpu.matmul %541, %803, %cst_92 {dimension_numbers = #tpu.dot_dimension_numbers<[1], [0], [0], [1], [0, 0, 1, 1], [], []>} : vector<16x16xf32>, vector<16x16xf32>, vector<16x16xf32> -> vector<16x16xf32>
    %cst_93 = arith.constant dense<0.000000e+00> : vector<16x16xf32>
    %805 = tpu.matmul %143, %804, %cst_93 {dimension_numbers = #tpu.dot_dimension_numbers<[1], [0], [0], [1], [0, 0, 1, 1], [], []>} : vector<16x16xf32>, vector<16x16xf32>, vector<16x16xf32> -> vector<16x16xf32>
    %806 = arith.addf %768, %805 : vector<16x16xf32>
    %c144 = arith.constant 144 : index
    %807 = memref.load %arg3[%c144] : memref<243xf32, #tpu.memory_space<smem>>
    %808 = vector.broadcast %807 : f32 to vector<16x16xf32>
    %809 = arith.mulf %64, %808 : vector<16x16xf32>
    %c145 = arith.constant 145 : index
    %810 = memref.load %arg3[%c145] : memref<243xf32, #tpu.memory_space<smem>>
    %811 = vector.broadcast %810 : f32 to vector<16x16xf32>
    %812 = arith.mulf %69, %811 : vector<16x16xf32>
    %813 = arith.addf %809, %812 : vector<16x16xf32>
    %c146 = arith.constant 146 : index
    %814 = memref.load %arg3[%c146] : memref<243xf32, #tpu.memory_space<smem>>
    %815 = vector.broadcast %814 : f32 to vector<16x16xf32>
    %816 = arith.mulf %74, %815 : vector<16x16xf32>
    %817 = arith.addf %813, %816 : vector<16x16xf32>
    %c147 = arith.constant 147 : index
    %818 = memref.load %arg3[%c147] : memref<243xf32, #tpu.memory_space<smem>>
    %819 = vector.broadcast %818 : f32 to vector<16x16xf32>
    %820 = arith.mulf %79, %819 : vector<16x16xf32>
    %821 = arith.addf %817, %820 : vector<16x16xf32>
    %c148 = arith.constant 148 : index
    %822 = memref.load %arg3[%c148] : memref<243xf32, #tpu.memory_space<smem>>
    %823 = vector.broadcast %822 : f32 to vector<16x16xf32>
    %824 = arith.mulf %84, %823 : vector<16x16xf32>
    %825 = arith.addf %821, %824 : vector<16x16xf32>
    %c149 = arith.constant 149 : index
    %826 = memref.load %arg3[%c149] : memref<243xf32, #tpu.memory_space<smem>>
    %827 = vector.broadcast %826 : f32 to vector<16x16xf32>
    %828 = arith.mulf %89, %827 : vector<16x16xf32>
    %829 = arith.addf %825, %828 : vector<16x16xf32>
    %c150 = arith.constant 150 : index
    %830 = memref.load %arg3[%c150] : memref<243xf32, #tpu.memory_space<smem>>
    %831 = vector.broadcast %830 : f32 to vector<16x16xf32>
    %832 = arith.mulf %94, %831 : vector<16x16xf32>
    %833 = arith.addf %829, %832 : vector<16x16xf32>
    %c151 = arith.constant 151 : index
    %834 = memref.load %arg3[%c151] : memref<243xf32, #tpu.memory_space<smem>>
    %835 = vector.broadcast %834 : f32 to vector<16x16xf32>
    %836 = arith.mulf %99, %835 : vector<16x16xf32>
    %837 = arith.addf %833, %836 : vector<16x16xf32>
    %c152 = arith.constant 152 : index
    %838 = memref.load %arg3[%c152] : memref<243xf32, #tpu.memory_space<smem>>
    %839 = vector.broadcast %838 : f32 to vector<16x16xf32>
    %840 = arith.mulf %104, %839 : vector<16x16xf32>
    %841 = arith.addf %837, %840 : vector<16x16xf32>
    %cst_94 = arith.constant dense<0.000000e+00> : vector<16x16xf32>
    %842 = tpu.matmul %541, %841, %cst_94 {dimension_numbers = #tpu.dot_dimension_numbers<[1], [0], [0], [1], [0, 0, 1, 1], [], []>} : vector<16x16xf32>, vector<16x16xf32>, vector<16x16xf32> -> vector<16x16xf32>
    %cst_95 = arith.constant dense<0.000000e+00> : vector<16x16xf32>
    %843 = tpu.matmul %148, %842, %cst_95 {dimension_numbers = #tpu.dot_dimension_numbers<[1], [0], [0], [1], [0, 0, 1, 1], [], []>} : vector<16x16xf32>, vector<16x16xf32>, vector<16x16xf32> -> vector<16x16xf32>
    %844 = arith.addf %806, %843 : vector<16x16xf32>
    %c153 = arith.constant 153 : index
    %845 = memref.load %arg3[%c153] : memref<243xf32, #tpu.memory_space<smem>>
    %846 = vector.broadcast %845 : f32 to vector<16x16xf32>
    %847 = arith.mulf %64, %846 : vector<16x16xf32>
    %c154 = arith.constant 154 : index
    %848 = memref.load %arg3[%c154] : memref<243xf32, #tpu.memory_space<smem>>
    %849 = vector.broadcast %848 : f32 to vector<16x16xf32>
    %850 = arith.mulf %69, %849 : vector<16x16xf32>
    %851 = arith.addf %847, %850 : vector<16x16xf32>
    %c155 = arith.constant 155 : index
    %852 = memref.load %arg3[%c155] : memref<243xf32, #tpu.memory_space<smem>>
    %853 = vector.broadcast %852 : f32 to vector<16x16xf32>
    %854 = arith.mulf %74, %853 : vector<16x16xf32>
    %855 = arith.addf %851, %854 : vector<16x16xf32>
    %c156 = arith.constant 156 : index
    %856 = memref.load %arg3[%c156] : memref<243xf32, #tpu.memory_space<smem>>
    %857 = vector.broadcast %856 : f32 to vector<16x16xf32>
    %858 = arith.mulf %79, %857 : vector<16x16xf32>
    %859 = arith.addf %855, %858 : vector<16x16xf32>
    %c157 = arith.constant 157 : index
    %860 = memref.load %arg3[%c157] : memref<243xf32, #tpu.memory_space<smem>>
    %861 = vector.broadcast %860 : f32 to vector<16x16xf32>
    %862 = arith.mulf %84, %861 : vector<16x16xf32>
    %863 = arith.addf %859, %862 : vector<16x16xf32>
    %c158 = arith.constant 158 : index
    %864 = memref.load %arg3[%c158] : memref<243xf32, #tpu.memory_space<smem>>
    %865 = vector.broadcast %864 : f32 to vector<16x16xf32>
    %866 = arith.mulf %89, %865 : vector<16x16xf32>
    %867 = arith.addf %863, %866 : vector<16x16xf32>
    %c159 = arith.constant 159 : index
    %868 = memref.load %arg3[%c159] : memref<243xf32, #tpu.memory_space<smem>>
    %869 = vector.broadcast %868 : f32 to vector<16x16xf32>
    %870 = arith.mulf %94, %869 : vector<16x16xf32>
    %871 = arith.addf %867, %870 : vector<16x16xf32>
    %c160 = arith.constant 160 : index
    %872 = memref.load %arg3[%c160] : memref<243xf32, #tpu.memory_space<smem>>
    %873 = vector.broadcast %872 : f32 to vector<16x16xf32>
    %874 = arith.mulf %99, %873 : vector<16x16xf32>
    %875 = arith.addf %871, %874 : vector<16x16xf32>
    %c161 = arith.constant 161 : index
    %876 = memref.load %arg3[%c161] : memref<243xf32, #tpu.memory_space<smem>>
    %877 = vector.broadcast %876 : f32 to vector<16x16xf32>
    %878 = arith.mulf %104, %877 : vector<16x16xf32>
    %879 = arith.addf %875, %878 : vector<16x16xf32>
    %cst_96 = arith.constant dense<0.000000e+00> : vector<16x16xf32>
    %880 = tpu.matmul %541, %879, %cst_96 {dimension_numbers = #tpu.dot_dimension_numbers<[1], [0], [0], [1], [0, 0, 1, 1], [], []>} : vector<16x16xf32>, vector<16x16xf32>, vector<16x16xf32> -> vector<16x16xf32>
    %cst_97 = arith.constant dense<0.000000e+00> : vector<16x16xf32>
    %881 = tpu.matmul %153, %880, %cst_97 {dimension_numbers = #tpu.dot_dimension_numbers<[1], [0], [0], [1], [0, 0, 1, 1], [], []>} : vector<16x16xf32>, vector<16x16xf32>, vector<16x16xf32> -> vector<16x16xf32>
    %882 = arith.addf %844, %881 : vector<16x16xf32>
    %883 = arith.negf %882 : vector<16x16xf32>
    %884 = math.exp %883 : vector<16x16xf32>
    %cst_98 = arith.constant 1.000000e+00 : f32
    %885 = vector.broadcast %cst_98 : f32 to vector<16x16xf32>
    %886 = arith.addf %885, %884 : vector<16x16xf32>
    %887 = arith.divf %885, %886 : vector<16x16xf32>
    %888 = arith.mulf %540, %887 : vector<16x16xf32>
    %cst_99 = arith.constant dense<0.000000e+00> : vector<16x256xf32>
    %889 = tpu.matmul %888, %55, %cst_99 {dimension_numbers = #tpu.dot_dimension_numbers<[1], [0], [0], [1], [0, 0, 1, 1], [], []>} : vector<16x16xf32>, vector<16x256xf32>, vector<16x256xf32> -> vector<16x256xf32>
    %890 = arith.mulf %20, %889 : vector<16x256xf32>
    %cst_100 = arith.constant dense<0.000000e+00> : vector<256xf32>
    %891 = vector.multi_reduction <add>, %890, %cst_100 [0] : vector<16x256xf32> to vector<256xf32>
    %892 = vector.shape_cast %891 : vector<256xf32> to vector<1x256xf32>
    %893 = vector.broadcast %892 : vector<1x256xf32> to vector<8x256xf32>
    %894 = arith.mulf %1, %893 : vector<8x256xf32>
    %cst_101 = arith.constant dense<0xFF800000> : vector<8xf32>
    %895 = vector.multi_reduction <maximumf>, %894, %cst_101 [1] : vector<8x256xf32> to vector<8xf32>
    %896 = vector.shape_cast %895 : vector<8xf32> to vector<8x1xf32>
    %c1_102 = arith.constant 1 : index
    %c0_103 = arith.constant 0 : index
    %c0_104 = arith.constant 0 : index
    %897 = vector.load %arg4[%c1_102, %c0_103, %c0_104] : memref<3x8x2xf32, #tpu.memory_space<vmem>>, vector<1x8x2xf32>
    %898 = vector.shape_cast %897 : vector<1x8x2xf32> to vector<8x2xf32>
    %899 = vector.broadcast %896 : vector<8x1xf32> to vector<8x2xf32>
    %900 = arith.mulf %898, %899 : vector<8x2xf32>
    %cst_105 = arith.constant dense<0.000000e+00> : vector<2xf32>
    %901 = vector.multi_reduction <add>, %900, %cst_105 [0] : vector<8x2xf32> to vector<2xf32>
    %902 = vector.shape_cast %901 : vector<2xf32> to vector<1x2xf32>
    %cst_106 = arith.constant 0.000000e+00 : f32
    %903 = vector.broadcast %cst_106 : f32 to vector<1x2xf32>
    %904 = arith.maximumf %902, %903 : vector<1x2xf32>
    %c1_107 = arith.constant 1 : index
    %c0_108 = arith.constant 0 : index
    %c0_109 = arith.constant 0 : index
    %905 = vector.load %arg5[%c1_107, %c0_108, %c0_109] : memref<3x8x2xf32, #tpu.memory_space<vmem>>, vector<1x8x2xf32>
    %906 = vector.shape_cast %905 : vector<1x8x2xf32> to vector<8x2xf32>
    %907 = vector.broadcast %904 : vector<1x2xf32> to vector<8x2xf32>
    %908 = arith.mulf %906, %907 : vector<8x2xf32>
    %cst_110 = arith.constant dense<0.000000e+00> : vector<8xf32>
    %909 = vector.multi_reduction <add>, %908, %cst_110 [1] : vector<8x2xf32> to vector<8xf32>
    %910 = vector.shape_cast %909 : vector<8xf32> to vector<8x1xf32>
    %911 = arith.negf %910 : vector<8x1xf32>
    %912 = math.exp %911 : vector<8x1xf32>
    %cst_111 = arith.constant 1.000000e+00 : f32
    %913 = vector.broadcast %cst_111 : f32 to vector<8x1xf32>
    %914 = arith.addf %913, %912 : vector<8x1xf32>
    %915 = arith.divf %913, %914 : vector<8x1xf32>
    %c0_112 = arith.constant 0 : index
    %c0_113 = arith.constant 0 : index
    %c0_114 = arith.constant 0 : index
    %916 = vector.load %arg6[%c0_112, %c0_113, %c0_114] : memref<1x8x256xf32, #tpu.memory_space<vmem>>, vector<1x8x256xf32>
    %917 = vector.shape_cast %916 : vector<1x8x256xf32> to vector<8x256xf32>
    %918 = vector.broadcast %915 : vector<8x1xf32> to vector<8x256xf32>
    %919 = arith.mulf %918, %894 : vector<8x256xf32>
    %920 = arith.addf %917, %919 : vector<8x256xf32>
    %c0_115 = arith.constant 0 : index
    %c0_116 = arith.constant 0 : index
    %c0_117 = arith.constant 0 : index
    %921 = vector.load %arg6[%c0_115, %c0_116, %c0_117] : memref<1x8x256xf32, #tpu.memory_space<vmem>>, vector<1x8x256xf32>
    %922 = vector.shape_cast %921 : vector<1x8x256xf32> to vector<8x256xf32>
    %923 = vector.shape_cast %920 : vector<8x256xf32> to vector<1x8x256xf32>
    tpu.vector_store %arg6[%c0_115, %c0_116, %c0_117], %923 {strides = array<i32>} : memref<1x8x256xf32, #tpu.memory_space<vmem>>, vector<1x8x256xf32>,
    %c0_118 = arith.constant 0 : index
    %c2_119 = arith.constant 2 : index
    %c0_120 = arith.constant 0 : index
    %c0_121 = arith.constant 0 : index
    %924 = vector.load %arg2[%c0_118, %c2_119, %c0_120, %c0_121] : memref<1x3x16x16xf32, #tpu.memory_space<vmem>>, vector<1x1x16x16xf32>
    %925 = vector.shape_cast %924 : vector<1x1x16x16xf32> to vector<16x16xf32>
    %926 = arith.mulf %925, %39 : vector<16x16xf32>
    %c162 = arith.constant 162 : index
    %927 = memref.load %arg3[%c162] : memref<243xf32, #tpu.memory_space<smem>>
    %928 = vector.broadcast %927 : f32 to vector<16x16xf32>
    %929 = arith.mulf %64, %928 : vector<16x16xf32>
    %c163 = arith.constant 163 : index
    %930 = memref.load %arg3[%c163] : memref<243xf32, #tpu.memory_space<smem>>
    %931 = vector.broadcast %930 : f32 to vector<16x16xf32>
    %932 = arith.mulf %69, %931 : vector<16x16xf32>
    %933 = arith.addf %929, %932 : vector<16x16xf32>
    %c164 = arith.constant 164 : index
    %934 = memref.load %arg3[%c164] : memref<243xf32, #tpu.memory_space<smem>>
    %935 = vector.broadcast %934 : f32 to vector<16x16xf32>
    %936 = arith.mulf %74, %935 : vector<16x16xf32>
    %937 = arith.addf %933, %936 : vector<16x16xf32>
    %c165 = arith.constant 165 : index
    %938 = memref.load %arg3[%c165] : memref<243xf32, #tpu.memory_space<smem>>
    %939 = vector.broadcast %938 : f32 to vector<16x16xf32>
    %940 = arith.mulf %79, %939 : vector<16x16xf32>
    %941 = arith.addf %937, %940 : vector<16x16xf32>
    %c166 = arith.constant 166 : index
    %942 = memref.load %arg3[%c166] : memref<243xf32, #tpu.memory_space<smem>>
    %943 = vector.broadcast %942 : f32 to vector<16x16xf32>
    %944 = arith.mulf %84, %943 : vector<16x16xf32>
    %945 = arith.addf %941, %944 : vector<16x16xf32>
    %c167 = arith.constant 167 : index
    %946 = memref.load %arg3[%c167] : memref<243xf32, #tpu.memory_space<smem>>
    %947 = vector.broadcast %946 : f32 to vector<16x16xf32>
    %948 = arith.mulf %89, %947 : vector<16x16xf32>
    %949 = arith.addf %945, %948 : vector<16x16xf32>
    %c168 = arith.constant 168 : index
    %950 = memref.load %arg3[%c168] : memref<243xf32, #tpu.memory_space<smem>>
    %951 = vector.broadcast %950 : f32 to vector<16x16xf32>
    %952 = arith.mulf %94, %951 : vector<16x16xf32>
    %953 = arith.addf %949, %952 : vector<16x16xf32>
    %c169 = arith.constant 169 : index
    %954 = memref.load %arg3[%c169] : memref<243xf32, #tpu.memory_space<smem>>
    %955 = vector.broadcast %954 : f32 to vector<16x16xf32>
    %956 = arith.mulf %99, %955 : vector<16x16xf32>
    %957 = arith.addf %953, %956 : vector<16x16xf32>
    %c170 = arith.constant 170 : index
    %958 = memref.load %arg3[%c170] : memref<243xf32, #tpu.memory_space<smem>>
    %959 = vector.broadcast %958 : f32 to vector<16x16xf32>
    %960 = arith.mulf %104, %959 : vector<16x16xf32>
    %961 = arith.addf %957, %960 : vector<16x16xf32>
    %cst_122 = arith.constant dense<0.000000e+00> : vector<16x16xf32>
    %962 = tpu.matmul %926, %961, %cst_122 {dimension_numbers = #tpu.dot_dimension_numbers<[1], [0], [0], [1], [0, 0, 1, 1], [], []>} : vector<16x16xf32>, vector<16x16xf32>, vector<16x16xf32> -> vector<16x16xf32>
    %cst_123 = arith.constant dense<0.000000e+00> : vector<16x16xf32>
    %963 = tpu.matmul %113, %962, %cst_123 {dimension_numbers = #tpu.dot_dimension_numbers<[1], [0], [0], [1], [0, 0, 1, 1], [], []>} : vector<16x16xf32>, vector<16x16xf32>, vector<16x16xf32> -> vector<16x16xf32>
    %c171 = arith.constant 171 : index
    %964 = memref.load %arg3[%c171] : memref<243xf32, #tpu.memory_space<smem>>
    %965 = vector.broadcast %964 : f32 to vector<16x16xf32>
    %966 = arith.mulf %64, %965 : vector<16x16xf32>
    %c172 = arith.constant 172 : index
    %967 = memref.load %arg3[%c172] : memref<243xf32, #tpu.memory_space<smem>>
    %968 = vector.broadcast %967 : f32 to vector<16x16xf32>
    %969 = arith.mulf %69, %968 : vector<16x16xf32>
    %970 = arith.addf %966, %969 : vector<16x16xf32>
    %c173 = arith.constant 173 : index
    %971 = memref.load %arg3[%c173] : memref<243xf32, #tpu.memory_space<smem>>
    %972 = vector.broadcast %971 : f32 to vector<16x16xf32>
    %973 = arith.mulf %74, %972 : vector<16x16xf32>
    %974 = arith.addf %970, %973 : vector<16x16xf32>
    %c174 = arith.constant 174 : index
    %975 = memref.load %arg3[%c174] : memref<243xf32, #tpu.memory_space<smem>>
    %976 = vector.broadcast %975 : f32 to vector<16x16xf32>
    %977 = arith.mulf %79, %976 : vector<16x16xf32>
    %978 = arith.addf %974, %977 : vector<16x16xf32>
    %c175 = arith.constant 175 : index
    %979 = memref.load %arg3[%c175] : memref<243xf32, #tpu.memory_space<smem>>
    %980 = vector.broadcast %979 : f32 to vector<16x16xf32>
    %981 = arith.mulf %84, %980 : vector<16x16xf32>
    %982 = arith.addf %978, %981 : vector<16x16xf32>
    %c176 = arith.constant 176 : index
    %983 = memref.load %arg3[%c176] : memref<243xf32, #tpu.memory_space<smem>>
    %984 = vector.broadcast %983 : f32 to vector<16x16xf32>
    %985 = arith.mulf %89, %984 : vector<16x16xf32>
    %986 = arith.addf %982, %985 : vector<16x16xf32>
    %c177 = arith.constant 177 : index
    %987 = memref.load %arg3[%c177] : memref<243xf32, #tpu.memory_space<smem>>
    %988 = vector.broadcast %987 : f32 to vector<16x16xf32>
    %989 = arith.mulf %94, %988 : vector<16x16xf32>
    %990 = arith.addf %986, %989 : vector<16x16xf32>
    %c178 = arith.constant 178 : index
    %991 = memref.load %arg3[%c178] : memref<243xf32, #tpu.memory_space<smem>>
    %992 = vector.broadcast %991 : f32 to vector<16x16xf32>
    %993 = arith.mulf %99, %992 : vector<16x16xf32>
    %994 = arith.addf %990, %993 : vector<16x16xf32>
    %c179 = arith.constant 179 : index
    %995 = memref.load %arg3[%c179] : memref<243xf32, #tpu.memory_space<smem>>
    %996 = vector.broadcast %995 : f32 to vector<16x16xf32>
    %997 = arith.mulf %104, %996 : vector<16x16xf32>
    %998 = arith.addf %994, %997 : vector<16x16xf32>
    %cst_124 = arith.constant dense<0.000000e+00> : vector<16x16xf32>
    %999 = tpu.matmul %926, %998, %cst_124 {dimension_numbers = #tpu.dot_dimension_numbers<[1], [0], [0], [1], [0, 0, 1, 1], [], []>} : vector<16x16xf32>, vector<16x16xf32>, vector<16x16xf32> -> vector<16x16xf32>
    %cst_125 = arith.constant dense<0.000000e+00> : vector<16x16xf32>
    %1000 = tpu.matmul %118, %999, %cst_125 {dimension_numbers = #tpu.dot_dimension_numbers<[1], [0], [0], [1], [0, 0, 1, 1], [], []>} : vector<16x16xf32>, vector<16x16xf32>, vector<16x16xf32> -> vector<16x16xf32>
    %1001 = arith.addf %963, %1000 : vector<16x16xf32>
    %c180 = arith.constant 180 : index
    %1002 = memref.load %arg3[%c180] : memref<243xf32, #tpu.memory_space<smem>>
    %1003 = vector.broadcast %1002 : f32 to vector<16x16xf32>
    %1004 = arith.mulf %64, %1003 : vector<16x16xf32>
    %c181 = arith.constant 181 : index
    %1005 = memref.load %arg3[%c181] : memref<243xf32, #tpu.memory_space<smem>>
    %1006 = vector.broadcast %1005 : f32 to vector<16x16xf32>
    %1007 = arith.mulf %69, %1006 : vector<16x16xf32>
    %1008 = arith.addf %1004, %1007 : vector<16x16xf32>
    %c182 = arith.constant 182 : index
    %1009 = memref.load %arg3[%c182] : memref<243xf32, #tpu.memory_space<smem>>
    %1010 = vector.broadcast %1009 : f32 to vector<16x16xf32>
    %1011 = arith.mulf %74, %1010 : vector<16x16xf32>
    %1012 = arith.addf %1008, %1011 : vector<16x16xf32>
    %c183 = arith.constant 183 : index
    %1013 = memref.load %arg3[%c183] : memref<243xf32, #tpu.memory_space<smem>>
    %1014 = vector.broadcast %1013 : f32 to vector<16x16xf32>
    %1015 = arith.mulf %79, %1014 : vector<16x16xf32>
    %1016 = arith.addf %1012, %1015 : vector<16x16xf32>
    %c184 = arith.constant 184 : index
    %1017 = memref.load %arg3[%c184] : memref<243xf32, #tpu.memory_space<smem>>
    %1018 = vector.broadcast %1017 : f32 to vector<16x16xf32>
    %1019 = arith.mulf %84, %1018 : vector<16x16xf32>
    %1020 = arith.addf %1016, %1019 : vector<16x16xf32>
    %c185 = arith.constant 185 : index
    %1021 = memref.load %arg3[%c185] : memref<243xf32, #tpu.memory_space<smem>>
    %1022 = vector.broadcast %1021 : f32 to vector<16x16xf32>
    %1023 = arith.mulf %89, %1022 : vector<16x16xf32>
    %1024 = arith.addf %1020, %1023 : vector<16x16xf32>
    %c186 = arith.constant 186 : index
    %1025 = memref.load %arg3[%c186] : memref<243xf32, #tpu.memory_space<smem>>
    %1026 = vector.broadcast %1025 : f32 to vector<16x16xf32>
    %1027 = arith.mulf %94, %1026 : vector<16x16xf32>
    %1028 = arith.addf %1024, %1027 : vector<16x16xf32>
    %c187 = arith.constant 187 : index
    %1029 = memref.load %arg3[%c187] : memref<243xf32, #tpu.memory_space<smem>>
    %1030 = vector.broadcast %1029 : f32 to vector<16x16xf32>
    %1031 = arith.mulf %99, %1030 : vector<16x16xf32>
    %1032 = arith.addf %1028, %1031 : vector<16x16xf32>
    %c188 = arith.constant 188 : index
    %1033 = memref.load %arg3[%c188] : memref<243xf32, #tpu.memory_space<smem>>
    %1034 = vector.broadcast %1033 : f32 to vector<16x16xf32>
    %1035 = arith.mulf %104, %1034 : vector<16x16xf32>
    %1036 = arith.addf %1032, %1035 : vector<16x16xf32>
    %cst_126 = arith.constant dense<0.000000e+00> : vector<16x16xf32>
    %1037 = tpu.matmul %926, %1036, %cst_126 {dimension_numbers = #tpu.dot_dimension_numbers<[1], [0], [0], [1], [0, 0, 1, 1], [], []>} : vector<16x16xf32>, vector<16x16xf32>, vector<16x16xf32> -> vector<16x16xf32>
    %cst_127 = arith.constant dense<0.000000e+00> : vector<16x16xf32>
    %1038 = tpu.matmul %123, %1037, %cst_127 {dimension_numbers = #tpu.dot_dimension_numbers<[1], [0], [0], [1], [0, 0, 1, 1], [], []>} : vector<16x16xf32>, vector<16x16xf32>, vector<16x16xf32> -> vector<16x16xf32>
    %1039 = arith.addf %1001, %1038 : vector<16x16xf32>
    %c189 = arith.constant 189 : index
    %1040 = memref.load %arg3[%c189] : memref<243xf32, #tpu.memory_space<smem>>
    %1041 = vector.broadcast %1040 : f32 to vector<16x16xf32>
    %1042 = arith.mulf %64, %1041 : vector<16x16xf32>
    %c190 = arith.constant 190 : index
    %1043 = memref.load %arg3[%c190] : memref<243xf32, #tpu.memory_space<smem>>
    %1044 = vector.broadcast %1043 : f32 to vector<16x16xf32>
    %1045 = arith.mulf %69, %1044 : vector<16x16xf32>
    %1046 = arith.addf %1042, %1045 : vector<16x16xf32>
    %c191 = arith.constant 191 : index
    %1047 = memref.load %arg3[%c191] : memref<243xf32, #tpu.memory_space<smem>>
    %1048 = vector.broadcast %1047 : f32 to vector<16x16xf32>
    %1049 = arith.mulf %74, %1048 : vector<16x16xf32>
    %1050 = arith.addf %1046, %1049 : vector<16x16xf32>
    %c192 = arith.constant 192 : index
    %1051 = memref.load %arg3[%c192] : memref<243xf32, #tpu.memory_space<smem>>
    %1052 = vector.broadcast %1051 : f32 to vector<16x16xf32>
    %1053 = arith.mulf %79, %1052 : vector<16x16xf32>
    %1054 = arith.addf %1050, %1053 : vector<16x16xf32>
    %c193 = arith.constant 193 : index
    %1055 = memref.load %arg3[%c193] : memref<243xf32, #tpu.memory_space<smem>>
    %1056 = vector.broadcast %1055 : f32 to vector<16x16xf32>
    %1057 = arith.mulf %84, %1056 : vector<16x16xf32>
    %1058 = arith.addf %1054, %1057 : vector<16x16xf32>
    %c194 = arith.constant 194 : index
    %1059 = memref.load %arg3[%c194] : memref<243xf32, #tpu.memory_space<smem>>
    %1060 = vector.broadcast %1059 : f32 to vector<16x16xf32>
    %1061 = arith.mulf %89, %1060 : vector<16x16xf32>
    %1062 = arith.addf %1058, %1061 : vector<16x16xf32>
    %c195 = arith.constant 195 : index
    %1063 = memref.load %arg3[%c195] : memref<243xf32, #tpu.memory_space<smem>>
    %1064 = vector.broadcast %1063 : f32 to vector<16x16xf32>
    %1065 = arith.mulf %94, %1064 : vector<16x16xf32>
    %1066 = arith.addf %1062, %1065 : vector<16x16xf32>
    %c196 = arith.constant 196 : index
    %1067 = memref.load %arg3[%c196] : memref<243xf32, #tpu.memory_space<smem>>
    %1068 = vector.broadcast %1067 : f32 to vector<16x16xf32>
    %1069 = arith.mulf %99, %1068 : vector<16x16xf32>
    %1070 = arith.addf %1066, %1069 : vector<16x16xf32>
    %c197 = arith.constant 197 : index
    %1071 = memref.load %arg3[%c197] : memref<243xf32, #tpu.memory_space<smem>>
    %1072 = vector.broadcast %1071 : f32 to vector<16x16xf32>
    %1073 = arith.mulf %104, %1072 : vector<16x16xf32>
    %1074 = arith.addf %1070, %1073 : vector<16x16xf32>
    %cst_128 = arith.constant dense<0.000000e+00> : vector<16x16xf32>
    %1075 = tpu.matmul %926, %1074, %cst_128 {dimension_numbers = #tpu.dot_dimension_numbers<[1], [0], [0], [1], [0, 0, 1, 1], [], []>} : vector<16x16xf32>, vector<16x16xf32>, vector<16x16xf32> -> vector<16x16xf32>
    %cst_129 = arith.constant dense<0.000000e+00> : vector<16x16xf32>
    %1076 = tpu.matmul %128, %1075, %cst_129 {dimension_numbers = #tpu.dot_dimension_numbers<[1], [0], [0], [1], [0, 0, 1, 1], [], []>} : vector<16x16xf32>, vector<16x16xf32>, vector<16x16xf32> -> vector<16x16xf32>
    %1077 = arith.addf %1039, %1076 : vector<16x16xf32>
    %c198 = arith.constant 198 : index
    %1078 = memref.load %arg3[%c198] : memref<243xf32, #tpu.memory_space<smem>>
    %1079 = vector.broadcast %1078 : f32 to vector<16x16xf32>
    %1080 = arith.mulf %64, %1079 : vector<16x16xf32>
    %c199 = arith.constant 199 : index
    %1081 = memref.load %arg3[%c199] : memref<243xf32, #tpu.memory_space<smem>>
    %1082 = vector.broadcast %1081 : f32 to vector<16x16xf32>
    %1083 = arith.mulf %69, %1082 : vector<16x16xf32>
    %1084 = arith.addf %1080, %1083 : vector<16x16xf32>
    %c200 = arith.constant 200 : index
    %1085 = memref.load %arg3[%c200] : memref<243xf32, #tpu.memory_space<smem>>
    %1086 = vector.broadcast %1085 : f32 to vector<16x16xf32>
    %1087 = arith.mulf %74, %1086 : vector<16x16xf32>
    %1088 = arith.addf %1084, %1087 : vector<16x16xf32>
    %c201 = arith.constant 201 : index
    %1089 = memref.load %arg3[%c201] : memref<243xf32, #tpu.memory_space<smem>>
    %1090 = vector.broadcast %1089 : f32 to vector<16x16xf32>
    %1091 = arith.mulf %79, %1090 : vector<16x16xf32>
    %1092 = arith.addf %1088, %1091 : vector<16x16xf32>
    %c202 = arith.constant 202 : index
    %1093 = memref.load %arg3[%c202] : memref<243xf32, #tpu.memory_space<smem>>
    %1094 = vector.broadcast %1093 : f32 to vector<16x16xf32>
    %1095 = arith.mulf %84, %1094 : vector<16x16xf32>
    %1096 = arith.addf %1092, %1095 : vector<16x16xf32>
    %c203 = arith.constant 203 : index
    %1097 = memref.load %arg3[%c203] : memref<243xf32, #tpu.memory_space<smem>>
    %1098 = vector.broadcast %1097 : f32 to vector<16x16xf32>
    %1099 = arith.mulf %89, %1098 : vector<16x16xf32>
    %1100 = arith.addf %1096, %1099 : vector<16x16xf32>
    %c204 = arith.constant 204 : index
    %1101 = memref.load %arg3[%c204] : memref<243xf32, #tpu.memory_space<smem>>
    %1102 = vector.broadcast %1101 : f32 to vector<16x16xf32>
    %1103 = arith.mulf %94, %1102 : vector<16x16xf32>
    %1104 = arith.addf %1100, %1103 : vector<16x16xf32>
    %c205 = arith.constant 205 : index
    %1105 = memref.load %arg3[%c205] : memref<243xf32, #tpu.memory_space<smem>>
    %1106 = vector.broadcast %1105 : f32 to vector<16x16xf32>
    %1107 = arith.mulf %99, %1106 : vector<16x16xf32>
    %1108 = arith.addf %1104, %1107 : vector<16x16xf32>
    %c206 = arith.constant 206 : index
    %1109 = memref.load %arg3[%c206] : memref<243xf32, #tpu.memory_space<smem>>
    %1110 = vector.broadcast %1109 : f32 to vector<16x16xf32>
    %1111 = arith.mulf %104, %1110 : vector<16x16xf32>
    %1112 = arith.addf %1108, %1111 : vector<16x16xf32>
    %cst_130 = arith.constant dense<0.000000e+00> : vector<16x16xf32>
    %1113 = tpu.matmul %926, %1112, %cst_130 {dimension_numbers = #tpu.dot_dimension_numbers<[1], [0], [0], [1], [0, 0, 1, 1], [], []>} : vector<16x16xf32>, vector<16x16xf32>, vector<16x16xf32> -> vector<16x16xf32>
    %cst_131 = arith.constant dense<0.000000e+00> : vector<16x16xf32>
    %1114 = tpu.matmul %133, %1113, %cst_131 {dimension_numbers = #tpu.dot_dimension_numbers<[1], [0], [0], [1], [0, 0, 1, 1], [], []>} : vector<16x16xf32>, vector<16x16xf32>, vector<16x16xf32> -> vector<16x16xf32>
    %1115 = arith.addf %1077, %1114 : vector<16x16xf32>
    %c207 = arith.constant 207 : index
    %1116 = memref.load %arg3[%c207] : memref<243xf32, #tpu.memory_space<smem>>
    %1117 = vector.broadcast %1116 : f32 to vector<16x16xf32>
    %1118 = arith.mulf %64, %1117 : vector<16x16xf32>
    %c208 = arith.constant 208 : index
    %1119 = memref.load %arg3[%c208] : memref<243xf32, #tpu.memory_space<smem>>
    %1120 = vector.broadcast %1119 : f32 to vector<16x16xf32>
    %1121 = arith.mulf %69, %1120 : vector<16x16xf32>
    %1122 = arith.addf %1118, %1121 : vector<16x16xf32>
    %c209 = arith.constant 209 : index
    %1123 = memref.load %arg3[%c209] : memref<243xf32, #tpu.memory_space<smem>>
    %1124 = vector.broadcast %1123 : f32 to vector<16x16xf32>
    %1125 = arith.mulf %74, %1124 : vector<16x16xf32>
    %1126 = arith.addf %1122, %1125 : vector<16x16xf32>
    %c210 = arith.constant 210 : index
    %1127 = memref.load %arg3[%c210] : memref<243xf32, #tpu.memory_space<smem>>
    %1128 = vector.broadcast %1127 : f32 to vector<16x16xf32>
    %1129 = arith.mulf %79, %1128 : vector<16x16xf32>
    %1130 = arith.addf %1126, %1129 : vector<16x16xf32>
    %c211 = arith.constant 211 : index
    %1131 = memref.load %arg3[%c211] : memref<243xf32, #tpu.memory_space<smem>>
    %1132 = vector.broadcast %1131 : f32 to vector<16x16xf32>
    %1133 = arith.mulf %84, %1132 : vector<16x16xf32>
    %1134 = arith.addf %1130, %1133 : vector<16x16xf32>
    %c212 = arith.constant 212 : index
    %1135 = memref.load %arg3[%c212] : memref<243xf32, #tpu.memory_space<smem>>
    %1136 = vector.broadcast %1135 : f32 to vector<16x16xf32>
    %1137 = arith.mulf %89, %1136 : vector<16x16xf32>
    %1138 = arith.addf %1134, %1137 : vector<16x16xf32>
    %c213 = arith.constant 213 : index
    %1139 = memref.load %arg3[%c213] : memref<243xf32, #tpu.memory_space<smem>>
    %1140 = vector.broadcast %1139 : f32 to vector<16x16xf32>
    %1141 = arith.mulf %94, %1140 : vector<16x16xf32>
    %1142 = arith.addf %1138, %1141 : vector<16x16xf32>
    %c214 = arith.constant 214 : index
    %1143 = memref.load %arg3[%c214] : memref<243xf32, #tpu.memory_space<smem>>
    %1144 = vector.broadcast %1143 : f32 to vector<16x16xf32>
    %1145 = arith.mulf %99, %1144 : vector<16x16xf32>
    %1146 = arith.addf %1142, %1145 : vector<16x16xf32>
    %c215 = arith.constant 215 : index
    %1147 = memref.load %arg3[%c215] : memref<243xf32, #tpu.memory_space<smem>>
    %1148 = vector.broadcast %1147 : f32 to vector<16x16xf32>
    %1149 = arith.mulf %104, %1148 : vector<16x16xf32>
    %1150 = arith.addf %1146, %1149 : vector<16x16xf32>
    %cst_132 = arith.constant dense<0.000000e+00> : vector<16x16xf32>
    %1151 = tpu.matmul %926, %1150, %cst_132 {dimension_numbers = #tpu.dot_dimension_numbers<[1], [0], [0], [1], [0, 0, 1, 1], [], []>} : vector<16x16xf32>, vector<16x16xf32>, vector<16x16xf32> -> vector<16x16xf32>
    %cst_133 = arith.constant dense<0.000000e+00> : vector<16x16xf32>
    %1152 = tpu.matmul %138, %1151, %cst_133 {dimension_numbers = #tpu.dot_dimension_numbers<[1], [0], [0], [1], [0, 0, 1, 1], [], []>} : vector<16x16xf32>, vector<16x16xf32>, vector<16x16xf32> -> vector<16x16xf32>
    %1153 = arith.addf %1115, %1152 : vector<16x16xf32>
    %c216 = arith.constant 216 : index
    %1154 = memref.load %arg3[%c216] : memref<243xf32, #tpu.memory_space<smem>>
    %1155 = vector.broadcast %1154 : f32 to vector<16x16xf32>
    %1156 = arith.mulf %64, %1155 : vector<16x16xf32>
    %c217 = arith.constant 217 : index
    %1157 = memref.load %arg3[%c217] : memref<243xf32, #tpu.memory_space<smem>>
    %1158 = vector.broadcast %1157 : f32 to vector<16x16xf32>
    %1159 = arith.mulf %69, %1158 : vector<16x16xf32>
    %1160 = arith.addf %1156, %1159 : vector<16x16xf32>
    %c218 = arith.constant 218 : index
    %1161 = memref.load %arg3[%c218] : memref<243xf32, #tpu.memory_space<smem>>
    %1162 = vector.broadcast %1161 : f32 to vector<16x16xf32>
    %1163 = arith.mulf %74, %1162 : vector<16x16xf32>
    %1164 = arith.addf %1160, %1163 : vector<16x16xf32>
    %c219 = arith.constant 219 : index
    %1165 = memref.load %arg3[%c219] : memref<243xf32, #tpu.memory_space<smem>>
    %1166 = vector.broadcast %1165 : f32 to vector<16x16xf32>
    %1167 = arith.mulf %79, %1166 : vector<16x16xf32>
    %1168 = arith.addf %1164, %1167 : vector<16x16xf32>
    %c220 = arith.constant 220 : index
    %1169 = memref.load %arg3[%c220] : memref<243xf32, #tpu.memory_space<smem>>
    %1170 = vector.broadcast %1169 : f32 to vector<16x16xf32>
    %1171 = arith.mulf %84, %1170 : vector<16x16xf32>
    %1172 = arith.addf %1168, %1171 : vector<16x16xf32>
    %c221 = arith.constant 221 : index
    %1173 = memref.load %arg3[%c221] : memref<243xf32, #tpu.memory_space<smem>>
    %1174 = vector.broadcast %1173 : f32 to vector<16x16xf32>
    %1175 = arith.mulf %89, %1174 : vector<16x16xf32>
    %1176 = arith.addf %1172, %1175 : vector<16x16xf32>
    %c222 = arith.constant 222 : index
    %1177 = memref.load %arg3[%c222] : memref<243xf32, #tpu.memory_space<smem>>
    %1178 = vector.broadcast %1177 : f32 to vector<16x16xf32>
    %1179 = arith.mulf %94, %1178 : vector<16x16xf32>
    %1180 = arith.addf %1176, %1179 : vector<16x16xf32>
    %c223 = arith.constant 223 : index
    %1181 = memref.load %arg3[%c223] : memref<243xf32, #tpu.memory_space<smem>>
    %1182 = vector.broadcast %1181 : f32 to vector<16x16xf32>
    %1183 = arith.mulf %99, %1182 : vector<16x16xf32>
    %1184 = arith.addf %1180, %1183 : vector<16x16xf32>
    %c224 = arith.constant 224 : index
    %1185 = memref.load %arg3[%c224] : memref<243xf32, #tpu.memory_space<smem>>
    %1186 = vector.broadcast %1185 : f32 to vector<16x16xf32>
    %1187 = arith.mulf %104, %1186 : vector<16x16xf32>
    %1188 = arith.addf %1184, %1187 : vector<16x16xf32>
    %cst_134 = arith.constant dense<0.000000e+00> : vector<16x16xf32>
    %1189 = tpu.matmul %926, %1188, %cst_134 {dimension_numbers = #tpu.dot_dimension_numbers<[1], [0], [0], [1], [0, 0, 1, 1], [], []>} : vector<16x16xf32>, vector<16x16xf32>, vector<16x16xf32> -> vector<16x16xf32>
    %cst_135 = arith.constant dense<0.000000e+00> : vector<16x16xf32>
    %1190 = tpu.matmul %143, %1189, %cst_135 {dimension_numbers = #tpu.dot_dimension_numbers<[1], [0], [0], [1], [0, 0, 1, 1], [], []>} : vector<16x16xf32>, vector<16x16xf32>, vector<16x16xf32> -> vector<16x16xf32>
    %1191 = arith.addf %1153, %1190 : vector<16x16xf32>
    %c225 = arith.constant 225 : index
    %1192 = memref.load %arg3[%c225] : memref<243xf32, #tpu.memory_space<smem>>
    %1193 = vector.broadcast %1192 : f32 to vector<16x16xf32>
    %1194 = arith.mulf %64, %1193 : vector<16x16xf32>
    %c226 = arith.constant 226 : index
    %1195 = memref.load %arg3[%c226] : memref<243xf32, #tpu.memory_space<smem>>
    %1196 = vector.broadcast %1195 : f32 to vector<16x16xf32>
    %1197 = arith.mulf %69, %1196 : vector<16x16xf32>
    %1198 = arith.addf %1194, %1197 : vector<16x16xf32>
    %c227 = arith.constant 227 : index
    %1199 = memref.load %arg3[%c227] : memref<243xf32, #tpu.memory_space<smem>>
    %1200 = vector.broadcast %1199 : f32 to vector<16x16xf32>
    %1201 = arith.mulf %74, %1200 : vector<16x16xf32>
    %1202 = arith.addf %1198, %1201 : vector<16x16xf32>
    %c228 = arith.constant 228 : index
    %1203 = memref.load %arg3[%c228] : memref<243xf32, #tpu.memory_space<smem>>
    %1204 = vector.broadcast %1203 : f32 to vector<16x16xf32>
    %1205 = arith.mulf %79, %1204 : vector<16x16xf32>
    %1206 = arith.addf %1202, %1205 : vector<16x16xf32>
    %c229 = arith.constant 229 : index
    %1207 = memref.load %arg3[%c229] : memref<243xf32, #tpu.memory_space<smem>>
    %1208 = vector.broadcast %1207 : f32 to vector<16x16xf32>
    %1209 = arith.mulf %84, %1208 : vector<16x16xf32>
    %1210 = arith.addf %1206, %1209 : vector<16x16xf32>
    %c230 = arith.constant 230 : index
    %1211 = memref.load %arg3[%c230] : memref<243xf32, #tpu.memory_space<smem>>
    %1212 = vector.broadcast %1211 : f32 to vector<16x16xf32>
    %1213 = arith.mulf %89, %1212 : vector<16x16xf32>
    %1214 = arith.addf %1210, %1213 : vector<16x16xf32>
    %c231 = arith.constant 231 : index
    %1215 = memref.load %arg3[%c231] : memref<243xf32, #tpu.memory_space<smem>>
    %1216 = vector.broadcast %1215 : f32 to vector<16x16xf32>
    %1217 = arith.mulf %94, %1216 : vector<16x16xf32>
    %1218 = arith.addf %1214, %1217 : vector<16x16xf32>
    %c232 = arith.constant 232 : index
    %1219 = memref.load %arg3[%c232] : memref<243xf32, #tpu.memory_space<smem>>
    %1220 = vector.broadcast %1219 : f32 to vector<16x16xf32>
    %1221 = arith.mulf %99, %1220 : vector<16x16xf32>
    %1222 = arith.addf %1218, %1221 : vector<16x16xf32>
    %c233 = arith.constant 233 : index
    %1223 = memref.load %arg3[%c233] : memref<243xf32, #tpu.memory_space<smem>>
    %1224 = vector.broadcast %1223 : f32 to vector<16x16xf32>
    %1225 = arith.mulf %104, %1224 : vector<16x16xf32>
    %1226 = arith.addf %1222, %1225 : vector<16x16xf32>
    %cst_136 = arith.constant dense<0.000000e+00> : vector<16x16xf32>
    %1227 = tpu.matmul %926, %1226, %cst_136 {dimension_numbers = #tpu.dot_dimension_numbers<[1], [0], [0], [1], [0, 0, 1, 1], [], []>} : vector<16x16xf32>, vector<16x16xf32>, vector<16x16xf32> -> vector<16x16xf32>
    %cst_137 = arith.constant dense<0.000000e+00> : vector<16x16xf32>
    %1228 = tpu.matmul %148, %1227, %cst_137 {dimension_numbers = #tpu.dot_dimension_numbers<[1], [0], [0], [1], [0, 0, 1, 1], [], []>} : vector<16x16xf32>, vector<16x16xf32>, vector<16x16xf32> -> vector<16x16xf32>
    %1229 = arith.addf %1191, %1228 : vector<16x16xf32>
    %c234 = arith.constant 234 : index
    %1230 = memref.load %arg3[%c234] : memref<243xf32, #tpu.memory_space<smem>>
    %1231 = vector.broadcast %1230 : f32 to vector<16x16xf32>
    %1232 = arith.mulf %64, %1231 : vector<16x16xf32>
    %c235 = arith.constant 235 : index
    %1233 = memref.load %arg3[%c235] : memref<243xf32, #tpu.memory_space<smem>>
    %1234 = vector.broadcast %1233 : f32 to vector<16x16xf32>
    %1235 = arith.mulf %69, %1234 : vector<16x16xf32>
    %1236 = arith.addf %1232, %1235 : vector<16x16xf32>
    %c236 = arith.constant 236 : index
    %1237 = memref.load %arg3[%c236] : memref<243xf32, #tpu.memory_space<smem>>
    %1238 = vector.broadcast %1237 : f32 to vector<16x16xf32>
    %1239 = arith.mulf %74, %1238 : vector<16x16xf32>
    %1240 = arith.addf %1236, %1239 : vector<16x16xf32>
    %c237 = arith.constant 237 : index
    %1241 = memref.load %arg3[%c237] : memref<243xf32, #tpu.memory_space<smem>>
    %1242 = vector.broadcast %1241 : f32 to vector<16x16xf32>
    %1243 = arith.mulf %79, %1242 : vector<16x16xf32>
    %1244 = arith.addf %1240, %1243 : vector<16x16xf32>
    %c238 = arith.constant 238 : index
    %1245 = memref.load %arg3[%c238] : memref<243xf32, #tpu.memory_space<smem>>
    %1246 = vector.broadcast %1245 : f32 to vector<16x16xf32>
    %1247 = arith.mulf %84, %1246 : vector<16x16xf32>
    %1248 = arith.addf %1244, %1247 : vector<16x16xf32>
    %c239 = arith.constant 239 : index
    %1249 = memref.load %arg3[%c239] : memref<243xf32, #tpu.memory_space<smem>>
    %1250 = vector.broadcast %1249 : f32 to vector<16x16xf32>
    %1251 = arith.mulf %89, %1250 : vector<16x16xf32>
    %1252 = arith.addf %1248, %1251 : vector<16x16xf32>
    %c240 = arith.constant 240 : index
    %1253 = memref.load %arg3[%c240] : memref<243xf32, #tpu.memory_space<smem>>
    %1254 = vector.broadcast %1253 : f32 to vector<16x16xf32>
    %1255 = arith.mulf %94, %1254 : vector<16x16xf32>
    %1256 = arith.addf %1252, %1255 : vector<16x16xf32>
    %c241 = arith.constant 241 : index
    %1257 = memref.load %arg3[%c241] : memref<243xf32, #tpu.memory_space<smem>>
    %1258 = vector.broadcast %1257 : f32 to vector<16x16xf32>
    %1259 = arith.mulf %99, %1258 : vector<16x16xf32>
    %1260 = arith.addf %1256, %1259 : vector<16x16xf32>
    %c242 = arith.constant 242 : index
    %1261 = memref.load %arg3[%c242] : memref<243xf32, #tpu.memory_space<smem>>
    %1262 = vector.broadcast %1261 : f32 to vector<16x16xf32>
    %1263 = arith.mulf %104, %1262 : vector<16x16xf32>
    %1264 = arith.addf %1260, %1263 : vector<16x16xf32>
    %cst_138 = arith.constant dense<0.000000e+00> : vector<16x16xf32>
    %1265 = tpu.matmul %926, %1264, %cst_138 {dimension_numbers = #tpu.dot_dimension_numbers<[1], [0], [0], [1], [0, 0, 1, 1], [], []>} : vector<16x16xf32>, vector<16x16xf32>, vector<16x16xf32> -> vector<16x16xf32>
    %cst_139 = arith.constant dense<0.000000e+00> : vector<16x16xf32>
    %1266 = tpu.matmul %153, %1265, %cst_139 {dimension_numbers = #tpu.dot_dimension_numbers<[1], [0], [0], [1], [0, 0, 1, 1], [], []>} : vector<16x16xf32>, vector<16x16xf32>, vector<16x16xf32> -> vector<16x16xf32>
    %1267 = arith.addf %1229, %1266 : vector<16x16xf32>
    %1268 = arith.negf %1267 : vector<16x16xf32>
    %1269 = math.exp %1268 : vector<16x16xf32>
    %cst_140 = arith.constant 1.000000e+00 : f32
    %1270 = vector.broadcast %cst_140 : f32 to vector<16x16xf32>
    %1271 = arith.addf %1270, %1269 : vector<16x16xf32>
    %1272 = arith.divf %1270, %1271 : vector<16x16xf32>
    %1273 = arith.mulf %925, %1272 : vector<16x16xf32>
    %cst_141 = arith.constant dense<0.000000e+00> : vector<16x256xf32>
    %1274 = tpu.matmul %1273, %55, %cst_141 {dimension_numbers = #tpu.dot_dimension_numbers<[1], [0], [0], [1], [0, 0, 1, 1], [], []>} : vector<16x16xf32>, vector<16x256xf32>, vector<16x256xf32> -> vector<16x256xf32>
    %1275 = arith.mulf %20, %1274 : vector<16x256xf32>
    %cst_142 = arith.constant dense<0.000000e+00> : vector<256xf32>
    %1276 = vector.multi_reduction <add>, %1275, %cst_142 [0] : vector<16x256xf32> to vector<256xf32>
    %1277 = vector.shape_cast %1276 : vector<256xf32> to vector<1x256xf32>
    %1278 = vector.broadcast %1277 : vector<1x256xf32> to vector<8x256xf32>
    %1279 = arith.mulf %1, %1278 : vector<8x256xf32>
    %cst_143 = arith.constant dense<0xFF800000> : vector<8xf32>
    %1280 = vector.multi_reduction <maximumf>, %1279, %cst_143 [1] : vector<8x256xf32> to vector<8xf32>
    %1281 = vector.shape_cast %1280 : vector<8xf32> to vector<8x1xf32>
    %c2_144 = arith.constant 2 : index
    %c0_145 = arith.constant 0 : index
    %c0_146 = arith.constant 0 : index
    %1282 = vector.load %arg4[%c2_144, %c0_145, %c0_146] : memref<3x8x2xf32, #tpu.memory_space<vmem>>, vector<1x8x2xf32>
    %1283 = vector.shape_cast %1282 : vector<1x8x2xf32> to vector<8x2xf32>
    %1284 = vector.broadcast %1281 : vector<8x1xf32> to vector<8x2xf32>
    %1285 = arith.mulf %1283, %1284 : vector<8x2xf32>
    %cst_147 = arith.constant dense<0.000000e+00> : vector<2xf32>
    %1286 = vector.multi_reduction <add>, %1285, %cst_147 [0] : vector<8x2xf32> to vector<2xf32>
    %1287 = vector.shape_cast %1286 : vector<2xf32> to vector<1x2xf32>
    %cst_148 = arith.constant 0.000000e+00 : f32
    %1288 = vector.broadcast %cst_148 : f32 to vector<1x2xf32>
    %1289 = arith.maximumf %1287, %1288 : vector<1x2xf32>
    %c2_149 = arith.constant 2 : index
    %c0_150 = arith.constant 0 : index
    %c0_151 = arith.constant 0 : index
    %1290 = vector.load %arg5[%c2_149, %c0_150, %c0_151] : memref<3x8x2xf32, #tpu.memory_space<vmem>>, vector<1x8x2xf32>
    %1291 = vector.shape_cast %1290 : vector<1x8x2xf32> to vector<8x2xf32>
    %1292 = vector.broadcast %1289 : vector<1x2xf32> to vector<8x2xf32>
    %1293 = arith.mulf %1291, %1292 : vector<8x2xf32>
    %cst_152 = arith.constant dense<0.000000e+00> : vector<8xf32>
    %1294 = vector.multi_reduction <add>, %1293, %cst_152 [1] : vector<8x2xf32> to vector<8xf32>
    %1295 = vector.shape_cast %1294 : vector<8xf32> to vector<8x1xf32>
    %1296 = arith.negf %1295 : vector<8x1xf32>
    %1297 = math.exp %1296 : vector<8x1xf32>
    %cst_153 = arith.constant 1.000000e+00 : f32
    %1298 = vector.broadcast %cst_153 : f32 to vector<8x1xf32>
    %1299 = arith.addf %1298, %1297 : vector<8x1xf32>
    %1300 = arith.divf %1298, %1299 : vector<8x1xf32>
    %c0_154 = arith.constant 0 : index
    %c0_155 = arith.constant 0 : index
    %c0_156 = arith.constant 0 : index
    %1301 = vector.load %arg6[%c0_154, %c0_155, %c0_156] : memref<1x8x256xf32, #tpu.memory_space<vmem>>, vector<1x8x256xf32>
    %1302 = vector.shape_cast %1301 : vector<1x8x256xf32> to vector<8x256xf32>
    %1303 = vector.broadcast %1300 : vector<8x1xf32> to vector<8x256xf32>
    %1304 = arith.mulf %1303, %1279 : vector<8x256xf32>
    %1305 = arith.addf %1302, %1304 : vector<8x256xf32>
    %c0_157 = arith.constant 0 : index
    %c0_158 = arith.constant 0 : index
    %c0_159 = arith.constant 0 : index
    %1306 = vector.load %arg6[%c0_157, %c0_158, %c0_159] : memref<1x8x256xf32, #tpu.memory_space<vmem>>, vector<1x8x256xf32>
    %1307 = vector.shape_cast %1306 : vector<1x8x256xf32> to vector<8x256xf32>
    %1308 = vector.shape_cast %1305 : vector<8x256xf32> to vector<1x8x256xf32>
    tpu.vector_store %arg6[%c0_157, %c0_158, %c0_159], %1308 {strides = array<i32>} : memref<1x8x256xf32, #tpu.memory_space<vmem>>, vector<1x8x256xf32>,
    return
  }
  func.func @transform_0(%arg0: i32) -> (i32, i32, i32) {
    %c0_i32 = arith.constant 0 : i32
    %c0_i32_0 = arith.constant 0 : i32
    %c0_i32_1 = arith.constant 0 : i32
    return %arg0, %c0_i32, %c0_i32_0 : i32, i32, i32
  }
  func.func @transform_1(%arg0: i32) -> (i32, i32, i32, i32) {
    %c0_i32 = arith.constant 0 : i32
    %c0_i32_0 = arith.constant 0 : i32
    %c0_i32_1 = arith.constant 0 : i32
    %c0_i32_2 = arith.constant 0 : i32
    return %arg0, %c0_i32, %c0_i32_0, %c0_i32_1 : i32, i32, i32, i32
  }
  func.func @transform_2(%arg0: i32) -> i32 {
    %c0_i32 = arith.constant 0 : i32
    %c0_i32_0 = arith.constant 0 : i32
    return %c0_i32 : i32
  }
  func.func @transform_3(%arg0: i32) -> (i32, i32, i32) {
    %c0_i32 = arith.constant 0 : i32
    %c0_i32_0 = arith.constant 0 : i32
    %c0_i32_1 = arith.constant 0 : i32
    %c0_i32_2 = arith.constant 0 : i32
    return %c0_i32, %c0_i32_0, %c0_i32_1 : i32, i32, i32
  }
  func.func @transform_4(%arg0: i32) -> (i32, i32, i32) {
    %c0_i32 = arith.constant 0 : i32
    %c0_i32_0 = arith.constant 0 : i32
    %c0_i32_1 = arith.constant 0 : i32
    %c0_i32_2 = arith.constant 0 : i32
    return %c0_i32, %c0_i32_0, %c0_i32_1 : i32, i32, i32
  }
  func.func @transform_5(%arg0: i32) -> (i32, i32, i32) {
    %c0_i32 = arith.constant 0 : i32
    %c0_i32_0 = arith.constant 0 : i32
    %c0_i32_1 = arith.constant 0 : i32
    return %arg0, %c0_i32, %c0_i32_0 : i32, i32, i32
  }
}

</mosaic_0001>

<bundles_post_ra>
// kernel: tpu_custom_call.1
= control target key start
LH: loop header
LB: loop body
LE: loop exit
PB: predicated region body
PF: predicated region fallthrough
CT: control target
= control target key end

     0   :  { %s7285_s0 = inlined_call_operand.vmem [shape: f32[2,8,256], index: 0, kind: input, shape index: {}]   ;;  %s7286_s1 = inlined_call_operand.hbm [shape: f32[2,3,16,16], index: 1, kind: input, shape index: {}]   ;;  %s7287_s2 = inlined_call_operand.vmem [shape: f32[243], index: 2, kind: input, shape index: {}]   ;;  %s7288_s3 = inlined_call_operand.vmem [shape: f32[3,8,2], index: 3, kind: input, shape index: {}]   ;;  %s7289_s4 = inlined_call_operand.vmem [shape: f32[3,8,2], index: 4, kind: input, shape index: {}]   ;;  %s7290_s5 = inlined_call_operand.hbm [shape: f32[2,8,256], index: 5, kind: output, shape index: {}]  }
   0x1   :  { %7355 = sst [smem:[#allocation37_spill]] %s7285_s0 }
   0x2   :  { %7356 = sst [smem:[#allocation38_spill]] %s7286_s1 }
   0x3   :  { %7357 = sst [smem:[#allocation39_spill]] %s7287_s2 }
   0x4   :  { %7358 = sst [smem:[#allocation40_spill]] %s7290_s5 }
   0x5   :  { %10 = vsyncpa [#allocation3], 0 }
   0x6   :  { %12 = vsyncpa [#allocation3 + $0x1], 0 }
   0x7   :  { %13 = vsyncpa [#allocation5], 0 }
   0x8   :  { %14 = vsyncpa [#allocation4], 0 }
   0x9   :  { %16 = vsyncpa [#allocation4 + $0x1], 0  ;;  %s5013_s18 = smov 0   ;;  %s5015_s19 = smov 0  }
   0xa   :  { %s5017_s20 = smov 0   ;;  %s5019_s21 = smov 0  }
   0xb LB: > { %7359 = sst [smem:[#allocation11_spill]] %s4964_s18  ;;  %s5034_s22 = sadd.s32 4294967295, %s4976_s21   ;;  %s4976_s21 = sphi %s5019_s21, %s7449_s21   ;;  %s4972_s20 = sphi %s5017_s20, %s7452_s20   ;;  %s4968_s19 = sphi %s5015_s19, %s7451_s19   ;;  %s4964_s18 = sphi %s5013_s18, %s7450_s18  }
   0xc   : > { %7360 = sst [smem:[#allocation12_spill]] %s4968_s19  ;;  %s4231_s23 = sadd.s32 4294967294, %s4976_s21  }
   0xd   : > { %7361 = sst [smem:[#allocation13_spill]] %s4972_s20  ;;  %s5038_s24 = sadd.s32 1, %s4976_s21  }
   0xe   : > { %7362 = sst [smem:[#allocation14_spill]] %s4976_s21  ;;  %s55_s25 = sadd.s32 1, %s4972_s20 }
   0xf   : > { %7363 = sst [smem:[#allocation15_spill]] %s5034_s22  ;;  %s52_s26 = ssub.s32 %s4976_s21, %s5038_s24 }
  0x10   : > { %7364 = sst [smem:[#allocation16_spill]] %s5038_s24  ;;  %p62_p0 = scmp.ne.s32.totalorder %s4972_s20, %s4968_s19 }
  0x11   : > { %p53_p1 = scmp.eq.s32.totalorder %s52_s26, 0  ;;  %p63_p2 = scmp.eq.s32.totalorder %s4976_s21, 0 }
  0x12   : > { %p68_p3 = scmp.ne.s32.totalorder %s4968_s19, %s4964_s18  ;;  %p69_p4 = scmp.eq.s32.totalorder %s5034_s22, 0 }
  0x13   : > { %s5050_s27 = scalar_select %p53_p1, %s4972_s20, %s55_s25  }
  0x14   : > { %p5052_p5 = por %p63_p2, %p62_p0  ;;  %p5058_p6 = por %p69_p4, %p68_p3 }
  0x15   : > { %7365 = sst [smem:[#allocation17_spill]] %s5050_s27  ;;  %p155_p7 = scmp.eq.s32.totalorder %s5034_s22, 1 }
  0x16   : > { %p161_p8 = scmp.eq.s32.totalorder %s4231_s23, 1  ;;  %p4232_p9 = scmp.ge.s32.totalorder %s4976_s21, 1 }
  0x17   : > { %p168_p10 = scmp.lt.s32.totalorder %s4976_s21, 3  ;;  %p5065_p11 = por %p155_p7, %p62_p0 }
  0x18   : > { %p5069_p12 = por %p161_p8, %p68_p3  ;;  %s7373_s2 = sld [smem:[#allocation39_spill]] }
  0x19   : > { %s7368_s30 = scalar_select %p5065_p11, 1, 0 }
  0x1a   : > { %s7370_s6 = scalar_select %p5069_p12, 1, 0 }
  0x1b   : > { %7369 = sst [smem:[#allocation18_spill]] %s7368_s30  ;;  %p5073_p13 = pnand %p4232_p9, %p168_p10 }
  0x1c   : > { %7371 = sst [smem:[#allocation19_spill]] %s7370_s6  ;;  %p4775_p2 = scmp.lt.s32.totalorder %s4976_s21, 2 }
  0x1d   : > { %p4762_p1 = pneg %p5073_p13  ;;  %s205_s11 = sand.u32 1, %s4972_s20  }
  0x1e   : > { %s180_s10 = sshll.u32 %s7373_s2, 4  ;;  %p5089_p3 = pnand %p4775_p2, %p5052_p5  ;;  %s181_s10 = int_to_ptr.vmem [resolvable:$true] %s180_s10 }
  0x1f   : > { %p4763_p7 = pnand %p4762_p1, %p69_p4  ;;  %s4751_s13 = smul.u32 48, %s205_s11 }
  0x20   : > { %s4978_s14 = smov [#allocation6]   ;;  %s4752_s15 = smul.u32 48, %s4976_s21 }
  0x21   : > { %4765 = dma.vmem_to_smem (!%p4763_p7), %s181_s10, 32, %s4978_s14, [#allocation5]  }
  0x22   : > { %s209_s16 = scalar_lea.vmem [#allocation2], %s4751_s13  ;;  %s7375_s1 = sld [smem:[#allocation38_spill]] }
  0x23   : > { %s217_s17 = sshll.u32 %s209_s16, 4  ;;  %s206_s9 = scalar_lea.sflag [#allocation3], %s205_s11  ;;  %s218_s17 = int_to_ptr.vmem [resolvable:$true] %s217_s17 }
  0x24   : > { %p4880_p8 = pneg %p5089_p3 }
  0x28   : > { %s214_s26 = scalar_lea.hbm %s7375_s1, %s4752_s15  ;;  %s4883_s13 = scalar_lea.hbm %s7375_s1, 96 }
  0x29   : > { %s215_s8 = sshll.u32 %s214_s26, 4  ;;  %s216_s8 = int_to_ptr.hbm [resolvable:$true] %s215_s8 }
  0x2a   : > { %s4876_s28 = sshra.s32 %s216_s8, 4  ;;  %s4877_s28 = int_to_ptr.hbm [resolvable:$true] %s4876_s28 }
  0x2b   : > { %s4878_s2 = scalar_lea.hbm %s4877_s28, 48  ;;  %p4884_p1 = scmp.lt.s32.totalorder %s4877_s28, %s7375_s1 }
  0x2c   : > { %p4879_p5 = scmp.ne.s32.totalorder %s4877_s28, %s4878_s2  ;;  %p4885_p2 = scmp.lt.s32.totalorder %s4883_s13, %s4878_s2 }
  0x2e   : > { %p4881_p9 = pnand %p4880_p8, %p4879_p5  ;;  %p4886_p7 = por %p4885_p2, %p4884_p1 }
  0x30   : > { %p4882_p10 = pneg %p4881_p9 }
  0x32   : > { %p4887_p0 = pnand %p4886_p7, %p4882_p10 }
  0x34   : > { %4890 = shalt.err (!%p4887_p0)
}
  0x35   : > { %s4979_s11 = smov 128   ;;  %s4980_s15 = smov 8  }
  0x36   : > { %4769 = dma.hbm_to_vmem [thread:$0]  (!%p5089_p3), %s216_s8, 768, %s218_s17, %s206_s9, %s4979_s11, %s4979_s11, %s4980_s15  }
  0x37   : > { %229 = sbr.rel (%p5073_p13) target bundleno = 1973 (0x7b5), region = 40 }
  0x3c   : > { %s5110_s23 = sand.u32 1, %s4968_s19  }
  0x3d   : > { %7376 = sst [smem:[#allocation20_spill]] %s5110_s23  ;;  %s4753_s27 = smul.u32 48, %s5110_s23 }
  0x3e   : > { %s232_s25 = scalar_lea.sflag [#allocation3], %s5110_s23 }
  0x3f   : > { %s5114_s2 = scalar_lea.vmem [#allocation2], %s4753_s27 }
  0x40   : > { %4951 = dma.done.wait (%p5058_p6), %s232_s25, 768  }
  0x41   : > { %4953 = vsyncadd (%p5058_p6), %s232_s25, 4294966528 }
  0x42   : > { %4955 = dma.done.wait (%p69_p4), [#allocation5], 32  }
  0x43   : > { %4957 = vsyncadd (%p69_p4), [#allocation5], 4294967264 }
  0x44   : > { %246 = sfence }
  0x45   : > { %v295_v0 = vlaneseq  ;;  %p274_p4 = scmp.lt.s32.totalorder %s5034_s22, 1  ;;  %s7377_s0 = sld [smem:[#allocation37_spill]] }
  0x46   : > { %s5278_s8 = sld [smem:[#allocation6]] }
  0x47   : > { %v5124_v1 = vshrl.u32 %v295_v0, 7  ;;  %v5126_v2 = vand.u32 127, %v295_v0  ;;  %s275_s29 = scalar_select %p274_p4, %s5034_s22, 1 }
  0x48   : > { %s5280_s9 = sld [smem:[#allocation6 + $0x1]] }
  0x49   : > { %v5129_v3 = vcvt.s32.f32 %v5126_v2  ;;  %v344_v4 = vadd.s32 120, %v5124_v1  ;;  %v360_v5 = vadd.s32 248, %v5124_v1  ;;  %v343_v6 = vadd.s32 112, %v5124_v1  ;;  %s4745_s7 = sshll.u32 %s275_s29, 4  ;;  %s5282_s28 = sld [smem:[#allocation6 + $0x2]] }
  0x4a   : > { %v359_v7 = vadd.s32 240, %v5124_v1  ;;  %v342_v8 = vadd.s32 104, %v5124_v1  ;;  %v358_v9 = vadd.s32 232, %v5124_v1  ;;  %v341_v10 = vadd.s32 96, %v5124_v1  ;;  %s5286_s10 = sld [smem:[#allocation6 + $0x3]] }
  0x4b   : > { %v374_v11 = vcvt.s32.f32 %v344_v4  ;;  %v390_v12 = vcvt.s32.f32 %v360_v5  ;;  %v373_v13 = vcvt.s32.f32 %v343_v6  ;;  %v357_v14 = vadd.s32 224, %v5124_v1  ;;  %s5239_s26 = scalar_lea.vmem %s7377_s0, %s4745_s7  ;;  %s5288_s14 = sld [smem:[#allocation6 + $0x4]] }
  0x4c   : > { %v389_v15 = vcvt.s32.f32 %v359_v7  ;;  %v372_v16 = vcvt.s32.f32 %v342_v8  ;;  %v388_v17 = vcvt.s32.f32 %v358_v9  ;;  %v371_v18 = vcvt.s32.f32 %v341_v10  ;;  %s5290_s13 = sld [smem:[#allocation6 + $0x9]] }
  0x4d   : > { %v406_v19 = vmul.f32 0.0625, %v374_v11  ;;  %v422_v20 = vmul.f32 0.0625, %v390_v12  ;;  %v405_v21 = vmul.f32 0.0625, %v373_v13  ;;  %v387_v22 = vcvt.s32.f32 %v357_v14  ;;  %s5292_s16 = sld [smem:[#allocation6 + $0x5]] }
  0x4e   : > { %v421_v23 = vmul.f32 0.0625, %v389_v15  ;;  %v404_v24 = vmul.f32 0.0625, %v372_v16  ;;  %v420_v25 = vmul.f32 0.0625, %v388_v17  ;;  %v403_v26 = vmul.f32 0.0625, %v371_v18  ;;  %s5294_s11 = sld [smem:[#allocation6 + $0xa]] }
  0x4f   : > { %v438_v27 = vfloor.f32 %v406_v19  ;;  %v454_v28 = vfloor.f32 %v422_v20  ;;  %v437_v29 = vfloor.f32 %v405_v21  ;;  %v419_v30 = vmul.f32 0.0625, %v387_v22  ;;  %s5300_s15 = sld [smem:[#allocation6 + $0x6]] }
  0x50   : > { %v453_v31 = vfloor.f32 %v421_v23  ;;  %v436_v32 = vfloor.f32 %v404_v24  ;;  %v452_v33 = vfloor.f32 %v420_v25  ;;  %v435_v34 = vfloor.f32 %v403_v26  ;;  %s5302_s27 = sld [smem:[#allocation6 + $0xb]] }
  0x51   : > { %v470_v35 = vmul.f32 16.0, %v438_v27  ;;  %v486_v36 = vmul.f32 16.0, %v454_v28  ;;  %v469_v37 = vmul.f32 16.0, %v437_v29  ;;  %v451_v38 = vfloor.f32 %v419_v30  ;;  %s5313_s25 = sld [smem:[#allocation6 + $0x1b]] }
  0x52   : > { %v485_v39 = vmul.f32 16.0, %v453_v31  ;;  %v468_v40 = vmul.f32 16.0, %v436_v32  ;;  %v484_v41 = vmul.f32 16.0, %v452_v33  ;;  %v467_v42 = vmul.f32 16.0, %v435_v34  ;;  %s5315_s29 = sld [smem:[#allocation6 + $0x1c]] }
  0x53   : > { %v502_v43 = vsub.f32 %v374_v11, %v470_v35  ;;  %v518_v44 = vsub.f32 %v390_v12, %v486_v36  ;;  %v501_v45 = vsub.f32 %v373_v13, %v469_v37  ;;  %v483_v46 = vmul.f32 16.0, %v451_v38  ;;  %s5319_s7 = sld [smem:[#allocation6 + $0x7]] }
  0x54   : > { %v517_v47 = vsub.f32 %v389_v15, %v485_v39  ;;  %v500_v48 = vsub.f32 %v372_v16, %v468_v40  ;;  %v516_v49 = vsub.f32 %v388_v17, %v484_v41  ;;  %v499_v50 = vsub.f32 %v371_v18, %v467_v42  ;;  %s5325_s12 = sld [smem:[#allocation6 + $0xc]] }
  0x55   : > { %v534_v51 = vsub.f32 %v502_v43, %v5129_v3  ;;  %v550_v52 = vsub.f32 %v518_v44, %v5129_v3  ;;  %v533_v53 = vsub.f32 %v501_v45, %v5129_v3  ;;  %v515_v54 = vsub.f32 %v387_v22, %v483_v46  ;;  %s5339_s17 = sld [smem:[#allocation6 + $0xd]] }
  0x56   : > { %v549_v55 = vsub.f32 %v517_v47, %v5129_v3  ;;  %v532_v56 = vsub.f32 %v500_v48, %v5129_v3  ;;  %v548_v57 = vsub.f32 %v516_v49, %v5129_v3  ;;  %v531_v58 = vsub.f32 %v499_v50, %v5129_v3  ;;  %s5353_s0 = sld [smem:[#allocation6 + $0x1d]] }
  0x57   : > { %v566_v59 = vand.u32 2147483647, %v534_v51  ;;  %v582_v60 = vand.u32 2147483647, %v550_v52  ;;  %v565_v61 = vand.u32 2147483647, %v533_v53  ;;  %v547_v62 = vsub.f32 %v515_v54, %v5129_v3 }
  0x58   : > { %v581_v63 = vand.u32 2147483647, %v549_v55  ;;  %v564_v0 = vand.u32 2147483647, %v532_v56  ;;  %v580_v4 = vand.u32 2147483647, %v548_v57 }
  0x59   : > { %vm598_vm0 = vcmp.lt.f32.partialorder %v566_v59, 0.5  ;;  %vm614_vm1 = vcmp.lt.f32.partialorder %v582_v60, 0.5  ;;  %vm597_vm2 = vcmp.lt.f32.partialorder %v565_v61, 0.5  ;;  %v563_v5 = vand.u32 2147483647, %v531_v58  ;;  %s5367_s1 = sld [smem:[#allocation6 + $0xe]] }
  0x5a   : > { %v7304_v6 = vmov 1.0   ;;  %vm613_vm3 = vcmp.lt.f32.partialorder %v581_v63, 0.5  ;;  %vm596_vm4 = vcmp.lt.f32.partialorder %v564_v0, 0.5  ;;  %vm612_vm5 = vcmp.lt.f32.partialorder %v580_v4, 0.5  ;;  %s5373_s20 = sld [smem:[#allocation6 + $0x1e]] }
  0x5b   : > { %4277 = vmatpush.msk.msra.mxu0 %vm598_vm0, %v7304_v6  ;;  %4293 = vmatpush.msk.msra.mxu1 %vm614_vm1, %v7304_v6  ;;  %v579_v7 = vand.u32 2147483647, %v547_v62  ;;  %vm595_vm6 = vcmp.lt.f32.partialorder %v563_v5, 0.5  ;;  %v340_v8 = vadd.s32 88, %v5124_v1  ;;  %v356_v9 = vadd.s32 216, %v5124_v1  ;;  %s5381_s19 = sld [smem:[#allocation6 + $0x8]] }
  0x5c   : > { %v339_v10 = vadd.s32 80, %v5124_v1  ;;  %v355_v11 = vadd.s32 208, %v5124_v1  ;;  %v338_v12 = vadd.s32 72, %v5124_v1  ;;  %v354_v13 = vadd.s32 200, %v5124_v1  ;;  %s5391_s24 = sld [smem:[#allocation6 + $0xf]] }
  0x5d   : > { %4278 = vmatpush.msk.msra.mxu0 %vm597_vm2, %v7304_v6  ;;  %4294 = vmatpush.msk.msra.mxu1 %vm613_vm3, %v7304_v6  ;;  %vm611_vm7 = vcmp.lt.f32.partialorder %v579_v7, 0.5  ;;  %v370_v14 = vcvt.s32.f32 %v340_v8  ;;  %v386_v15 = vcvt.s32.f32 %v356_v9  ;;  %v337_v17 = vadd.s32 64, %v5124_v1  ;;  %s5401_s21 = sld [smem:[#allocation6 + $0x10]] }
  0x5e   : > { %v369_v16 = vcvt.s32.f32 %v339_v10  ;;  %v385_v18 = vcvt.s32.f32 %v355_v11  ;;  %v368_v19 = vcvt.s32.f32 %v338_v12  ;;  %v384_v20 = vcvt.s32.f32 %v354_v13  ;;  %s5411_s6 = sld [smem:[#allocation6 + $0x1f]] }
  0x5f   : > { %4279 = vmatpush.msk.msra.mxu0 %vm596_vm4, %v7304_v6  ;;  %4295 = vmatpush.msk.msra.mxu1 %vm612_vm5, %v7304_v6  ;;  %v353_v21 = vadd.s32 192, %v5124_v1  ;;  %v402_v22 = vmul.f32 0.0625, %v370_v14  ;;  %v418_v23 = vmul.f32 0.0625, %v386_v15  ;;  %v367_v25 = vcvt.s32.f32 %v337_v17  ;;  %s5419_s18 = sld [smem:[#allocation6 + $0x11]] }
  0x60   : > { %v401_v24 = vmul.f32 0.0625, %v369_v16  ;;  %v417_v26 = vmul.f32 0.0625, %v385_v18  ;;  %v400_v27 = vmul.f32 0.0625, %v368_v19  ;;  %v416_v28 = vmul.f32 0.0625, %v384_v20  ;;  %s5424_s30 = sld [smem:[#allocation6 + $0x20]] }
  0x61   : > { %4280 = vmatpush.msk.msra.mxu0 %vm595_vm6, %v7304_v6  ;;  %4296 = vmatpush.msk.msra.mxu1 %vm611_vm7, %v7304_v6  ;;  %v383_v29 = vcvt.s32.f32 %v353_v21  ;;  %v434_v30 = vfloor.f32 %v402_v22  ;;  %v450_v31 = vfloor.f32 %v418_v23  ;;  %v399_v33 = vmul.f32 0.0625, %v367_v25  ;;  %s5432_s5 = sld [smem:[#allocation6 + $0x21]] }
  0x62   : > { %v433_v32 = vfloor.f32 %v401_v24  ;;  %v449_v34 = vfloor.f32 %v417_v26  ;;  %v432_v35 = vfloor.f32 %v400_v27  ;;  %v448_v36 = vfloor.f32 %v416_v28  ;;  %s5443_s22 = sld [smem:[#allocation6 + $0x22]] }
  0x63   : > { %v415_v37 = vmul.f32 0.0625, %v383_v29  ;;  %v466_v38 = vmul.f32 16.0, %v434_v30  ;;  %v482_v39 = vmul.f32 16.0, %v450_v31  ;;  %v431_v41 = vfloor.f32 %v399_v33  ;;  %s5456_s23 = sld [smem:[#allocation6 + $0x23]] }
  0x64   : > { %v465_v40 = vmul.f32 16.0, %v433_v32  ;;  %v481_v42 = vmul.f32 16.0, %v449_v34  ;;  %v464_v43 = vmul.f32 16.0, %v432_v35  ;;  %v480_v44 = vmul.f32 16.0, %v448_v36 }
  0x65   : > { %v447_v45 = vfloor.f32 %v415_v37  ;;  %v498_v46 = vsub.f32 %v370_v14, %v466_v38  ;;  %v514_v47 = vsub.f32 %v386_v15, %v482_v39  ;;  %v463_v49 = vmul.f32 16.0, %v431_v41 }
  0x66   : > { %v497_v48 = vsub.f32 %v369_v16, %v465_v40  ;;  %v513_v50 = vsub.f32 %v385_v18, %v481_v42  ;;  %v496_v51 = vsub.f32 %v368_v19, %v464_v43  ;;  %v512_v52 = vsub.f32 %v384_v20, %v480_v44 }
  0x67   : > { %v479_v53 = vmul.f32 16.0, %v447_v45  ;;  %v530_v54 = vsub.f32 %v498_v46, %v5129_v3  ;;  %v546_v55 = vsub.f32 %v514_v47, %v5129_v3  ;;  %v495_v57 = vsub.f32 %v367_v25, %v463_v49 }
  0x68   : > { %v529_v56 = vsub.f32 %v497_v48, %v5129_v3  ;;  %v545_v58 = vsub.f32 %v513_v50, %v5129_v3  ;;  %v528_v59 = vsub.f32 %v496_v51, %v5129_v3  ;;  %v544_v60 = vsub.f32 %v512_v52, %v5129_v3 }
  0x69   : > { %v511_v61 = vsub.f32 %v383_v29, %v479_v53  ;;  %v562_v62 = vand.u32 2147483647, %v530_v54  ;;  %v578_v63 = vand.u32 2147483647, %v546_v55  ;;  %v527_v4 = vsub.f32 %v495_v57, %v5129_v3 }
  0x6a   : > { %v561_v0 = vand.u32 2147483647, %v529_v56  ;;  %v577_v5 = vand.u32 2147483647, %v545_v58  ;;  %v560_v7 = vand.u32 2147483647, %v528_v59 }
  0x6b   : > { %v576_v8 = vand.u32 2147483647, %v544_v60  ;;  %v543_v9 = vsub.f32 %v511_v61, %v5129_v3  ;;  %vm594_vm8 = vcmp.lt.f32.partialorder %v562_v62, 0.5  ;;  %vm610_vm9 = vcmp.lt.f32.partialorder %v578_v63, 0.5 }
  0x6c   : > { %vm593_vm10 = vcmp.lt.f32.partialorder %v561_v0, 0.5  ;;  %v559_v10 = vand.u32 2147483647, %v527_v4  ;;  %4281 = vmatpush.msk.msra.mxu0 %vm594_vm8, %v7304_v6  ;;  %4297 = vmatpush.msk.msra.mxu1 %vm610_vm9, %v7304_v6  ;;  %vm609_vm11 = vcmp.lt.f32.partialorder %v577_v5, 0.5  ;;  %vm592_vm12 = vcmp.lt.f32.partialorder %v560_v7, 0.5 }
  0x6d   : > { %vm608_vm13 = vcmp.lt.f32.partialorder %v576_v8, 0.5  ;;  %v575_v11 = vand.u32 2147483647, %v543_v9  ;;  %v336_v12 = vadd.s32 56, %v5124_v1  ;;  %v352_v13 = vadd.s32 184, %v5124_v1 }
  0x6e   : > { %vm591_vm14 = vcmp.lt.f32.partialorder %v559_v10, 0.5  ;;  %v335_v14 = vadd.s32 48, %v5124_v1  ;;  %4282 = vmatpush.msk.msra.mxu0 %vm593_vm10, %v7304_v6  ;;  %4298 = vmatpush.msk.msra.mxu1 %vm609_vm11, %v7304_v6  ;;  %v351_v15 = vadd.s32 176, %v5124_v1  ;;  %v334_v16 = vadd.s32 40, %v5124_v1 }
  0x6f   : > { %vm607_vm15 = vcmp.lt.f32.partialorder %v575_v11, 0.5  ;;  %v350_v17 = vadd.s32 168, %v5124_v1  ;;  %v366_v18 = vcvt.s32.f32 %v336_v12  ;;  %v382_v19 = vcvt.s32.f32 %v352_v13 }
  0x70   : > { %v365_v20 = vcvt.s32.f32 %v335_v14  ;;  %v333_v21 = vadd.s32 32, %v5124_v1  ;;  %4283 = vmatpush.msk.msra.mxu0 %vm592_vm12, %v7304_v6  ;;  %4299 = vmatpush.msk.msra.mxu1 %vm608_vm13, %v7304_v6  ;;  %v381_v22 = vcvt.s32.f32 %v351_v15  ;;  %v364_v23 = vcvt.s32.f32 %v334_v16 }
  0x71   : > { %v380_v24 = vcvt.s32.f32 %v350_v17  ;;  %v349_v25 = vadd.s32 160, %v5124_v1  ;;  %v398_v26 = vmul.f32 0.0625, %v366_v18  ;;  %v414_v27 = vmul.f32 0.0625, %v382_v19 }
  0x72   : > { %v397_v28 = vmul.f32 0.0625, %v365_v20  ;;  %v363_v29 = vcvt.s32.f32 %v333_v21  ;;  %4284 = vmatpush.msk.msra.mxu0 %vm591_vm14, %v7304_v6  ;;  %4300 = vmatpush.msk.msra.mxu1 %vm607_vm15, %v7304_v6  ;;  %v413_v30 = vmul.f32 0.0625, %v381_v22  ;;  %v396_v31 = vmul.f32 0.0625, %v364_v23 }
  0x73   : > { %v412_v32 = vmul.f32 0.0625, %v380_v24  ;;  %v379_v33 = vcvt.s32.f32 %v349_v25  ;;  %v430_v34 = vfloor.f32 %v398_v26  ;;  %v446_v35 = vfloor.f32 %v414_v27 }
  0x74   : > { %v429_v36 = vfloor.f32 %v397_v28  ;;  %v395_v37 = vmul.f32 0.0625, %v363_v29  ;;  %v445_v38 = vfloor.f32 %v413_v30  ;;  %v428_v39 = vfloor.f32 %v396_v31 }
  0x75   : > { %v444_v40 = vfloor.f32 %v412_v32  ;;  %v411_v41 = vmul.f32 0.0625, %v379_v33  ;;  %v462_v42 = vmul.f32 16.0, %v430_v34  ;;  %v478_v43 = vmul.f32 16.0, %v446_v35 }
  0x76   : > { %v461_v44 = vmul.f32 16.0, %v429_v36  ;;  %v427_v45 = vfloor.f32 %v395_v37  ;;  %v477_v46 = vmul.f32 16.0, %v445_v38  ;;  %v460_v47 = vmul.f32 16.0, %v428_v39 }
  0x77   : > { %v476_v48 = vmul.f32 16.0, %v444_v40  ;;  %v443_v49 = vfloor.f32 %v411_v41  ;;  %v494_v50 = vsub.f32 %v366_v18, %v462_v42  ;;  %v510_v51 = vsub.f32 %v382_v19, %v478_v43 }
  0x78   : > { %v493_v52 = vsub.f32 %v365_v20, %v461_v44  ;;  %v459_v53 = vmul.f32 16.0, %v427_v45  ;;  %v509_v54 = vsub.f32 %v381_v22, %v477_v46  ;;  %v492_v55 = vsub.f32 %v364_v23, %v460_v47 }
  0x79   : > { %v508_v56 = vsub.f32 %v380_v24, %v476_v48  ;;  %v475_v57 = vmul.f32 16.0, %v443_v49  ;;  %v526_v58 = vsub.f32 %v494_v50, %v5129_v3  ;;  %v542_v59 = vsub.f32 %v510_v51, %v5129_v3 }
  0x7a   : > { %v525_v60 = vsub.f32 %v493_v52, %v5129_v3  ;;  %v491_v61 = vsub.f32 %v363_v29, %v459_v53  ;;  %v541_v62 = vsub.f32 %v509_v54, %v5129_v3  ;;  %v524_v63 = vsub.f32 %v492_v55, %v5129_v3 }
  0x7b   : > { %v540_v0 = vsub.f32 %v508_v56, %v5129_v3  ;;  %v507_v4 = vsub.f32 %v379_v33, %v475_v57  ;;  %v558_v5 = vand.u32 2147483647, %v526_v58  ;;  %v574_v7 = vand.u32 2147483647, %v542_v59 }
  0x7c   : > { %v557_v8 = vand.u32 2147483647, %v525_v60  ;;  %v523_v9 = vsub.f32 %v491_v61, %v5129_v3  ;;  %v573_v10 = vand.u32 2147483647, %v541_v62  ;;  %v556_v11 = vand.u32 2147483647, %v524_v63 }
  0x7d   : > { %v572_v12 = vand.u32 2147483647, %v540_v0  ;;  %v539_v13 = vsub.f32 %v507_v4, %v5129_v3  ;;  %vm590_vm0 = vcmp.lt.f32.partialorder %v558_v5, 0.5  ;;  %vm606_vm1 = vcmp.lt.f32.partialorder %v574_v7, 0.5  ;;  %v279_v7 = vld [vmem:[%s5239_s26] sm:$0xff] }
  0x7e   : > { %vm589_vm2 = vcmp.lt.f32.partialorder %v557_v8, 0.5  ;;  %v555_v14 = vand.u32 2147483647, %v523_v9  ;;  %4285 = vmatpush.msk.msra.mxu0 %vm590_vm0, %v7304_v6  ;;  %4301 = vmatpush.msk.msra.mxu1 %vm606_vm1, %v7304_v6  ;;  %vm605_vm3 = vcmp.lt.f32.partialorder %v573_v10, 0.5  ;;  %vm588_vm4 = vcmp.lt.f32.partialorder %v556_v11, 0.5  ;;  %v280_v8 = vld [vmem:[%s5239_s26 + $0x8] sm:$0xff] }
  0x7f   : > { %v571_v15 = vand.u32 2147483647, %v539_v13  ;;  %vm604_vm5 = vcmp.lt.f32.partialorder %v572_v12, 0.5  ;;  %v332_v16 = vadd.s32 24, %v5124_v1  ;;  %v348_v17 = vadd.s32 152, %v5124_v1 }
  0x80   : > { %v331_v18 = vadd.s32 16, %v5124_v1  ;;  %4286 = vmatpush.msk.msra.mxu0 %vm589_vm2, %v7304_v6  ;;  %4302 = vmatpush.msk.msra.mxu1 %vm605_vm3, %v7304_v6  ;;  %vm587_vm6 = vcmp.lt.f32.partialorder %v555_v14, 0.5  ;;  %v347_v19 = vadd.s32 144, %v5124_v1  ;;  %v297_v20 = vadd.s32 8, %v5124_v1 }
  0x81   : > { %vm603_vm7 = vcmp.lt.f32.partialorder %v571_v15, 0.5  ;;  %v362_v21 = vcvt.s32.f32 %v332_v16  ;;  %v378_v22 = vcvt.s32.f32 %v348_v17  ;;  %v346_v24 = vadd.s32 136, %v5124_v1 }
  0x82   : > { %v361_v23 = vcvt.s32.f32 %v331_v18  ;;  %4287 = vmatpush.msk.msra.mxu0 %vm588_vm4, %v7304_v6  ;;  %4303 = vmatpush.msk.msra.mxu1 %vm604_vm5, %v7304_v6  ;;  %v377_v25 = vcvt.s32.f32 %v347_v19  ;;  %v5216_v26 = vcvt.s32.f32 %v297_v20  ;;  %v5223_v43 = vcvt.s32.f32 %v5124_v1 }
  0x83   : > { %v394_v27 = vmul.f32 0.0625, %v362_v21  ;;  %v410_v28 = vmul.f32 0.0625, %v378_v22  ;;  %v376_v35 = vcvt.s32.f32 %v346_v24  ;;  %v345_v62 = vadd.s32 128, %v5124_v1 }
  0x84   : > { %v393_v29 = vmul.f32 0.0625, %v361_v23  ;;  %4288 = vmatpush.msk.msra.mxu0 %vm587_vm6, %v7304_v6  ;;  %4304 = vmatpush.msk.msra.mxu1 %vm603_vm7, %v7304_v6  ;;  %v409_v30 = vmul.f32 0.0625, %v377_v25  ;;  %v392_v31 = vmul.f32 0.0625, %v5216_v26  ;;  %v391_v55 = vmul.f32 0.0625, %v5223_v43 }
  0x85   : > { %v426_v32 = vfloor.f32 %v394_v27  ;;  %v442_v33 = vfloor.f32 %v410_v28  ;;  %v408_v47 = vmul.f32 0.0625, %v376_v35  ;;  %v375_v1 = vcvt.s32.f32 %v345_v62 }
  0x86   : > { %v425_v34 = vfloor.f32 %v393_v29  ;;  %v441_v36 = vfloor.f32 %v409_v30  ;;  %v424_v37 = vfloor.f32 %v392_v31  ;;  %v423_v0 = vfloor.f32 %v391_v55 }
  0x87   : > { %v458_v38 = vmul.f32 16.0, %v426_v32  ;;  %v474_v39 = vmul.f32 16.0, %v442_v33  ;;  %v440_v59 = vfloor.f32 %v408_v47  ;;  %v283_v11 = vrot.slane %v279_v7, 4 }
  0x88   : > { %v457_v40 = vmul.f32 16.0, %v425_v34  ;;  %v473_v41 = vmul.f32 16.0, %v441_v36  ;;  %v456_v42 = vmul.f32 16.0, %v424_v37  ;;  %v455_v5 = vmul.f32 16.0, %v423_v0 }
  0x89   : > { %v490_v44 = vsub.f32 %v362_v21, %v458_v38  ;;  %v506_v45 = vsub.f32 %v378_v22, %v474_v39  ;;  %v472_v63 = vmul.f32 16.0, %v440_v59  ;;  %v305_v12 = vmul.f32 16.0, %v5223_v43 }
  0x8a   : > { %v489_v46 = vsub.f32 %v361_v23, %v457_v40  ;;  %v505_v48 = vsub.f32 %v377_v25, %v473_v41  ;;  %v488_v49 = vsub.f32 %v5216_v26, %v456_v42  ;;  %v487_v10 = vsub.f32 %v5223_v43, %v455_v5 }
  0x8b   : > { %v522_v50 = vsub.f32 %v490_v44, %v5129_v3  ;;  %v538_v51 = vsub.f32 %v506_v45, %v5129_v3  ;;  %v504_v4 = vsub.f32 %v376_v35, %v472_v63  ;;  %v289_v15 = vrot.slane %v280_v8, 4 }
  0x8c   : > { %v521_v52 = vsub.f32 %v489_v46, %v5129_v3  ;;  %v537_v53 = vsub.f32 %v505_v48, %v5129_v3  ;;  %v520_v54 = vsub.f32 %v488_v49, %v5129_v3  ;;  %v519_v14 = vsub.f32 %v487_v10, %v5129_v3 }
  0x8d   : > { %v554_v56 = vand.u32 2147483647, %v522_v50  ;;  %v570_v57 = vand.u32 2147483647, %v538_v51  ;;  %v536_v9 = vsub.f32 %v504_v4, %v5129_v3  ;;  %v302_v16 = vadd.s32 128, %v5126_v2 }
  0x8e   : > { %v553_v58 = vand.u32 2147483647, %v521_v52  ;;  %v569_v60 = vand.u32 2147483647, %v537_v53  ;;  %v552_v61 = vand.u32 2147483647, %v520_v54  ;;  %v284_v20 = vmax.f32 %v279_v7, %v283_v11 }
  0x8f   : > { %vm586_vm8 = vcmp.lt.f32.partialorder %v554_v56, 0.5  ;;  %vm602_vm9 = vcmp.lt.f32.partialorder %v570_v57, 0.5  ;;  %v568_v13 = vand.u32 2147483647, %v536_v9  ;;  %v407_v17 = vmul.f32 0.0625, %v375_v1 }
  0x90   : > { %vm585_vm10 = vcmp.lt.f32.partialorder %v553_v58, 0.5  ;;  %4289 = vmatpush.msk.msra.mxu0 %vm586_vm8, %v7304_v6  ;;  %4305 = vmatpush.msk.msra.mxu1 %vm602_vm9, %v7304_v6  ;;  %vm601_vm11 = vcmp.lt.f32.partialorder %v569_v60, 0.5  ;;  %vm584_vm12 = vcmp.lt.f32.partialorder %v552_v61, 0.5  ;;  %v551_v18 = vand.u32 2147483647, %v519_v14 }
  0x91   : > { %vm600_vm13 = vcmp.lt.f32.partialorder %v568_v13, 0.5  ;;  %v439_v19 = vfloor.f32 %v407_v17  ;;  %v307_v21 = vsub.f32 %v5129_v3, %v305_v12  ;;  %v290_v22 = vmax.f32 %v280_v8, %v289_v15 }
  0x92   : > { %4290 = vmatpush.msk.msra.mxu0 %vm585_vm10, %v7304_v6  ;;  %4306 = vmatpush.msk.msra.mxu1 %vm601_vm11, %v7304_v6  ;;  %vm583_vm14 = vcmp.lt.f32.partialorder %v551_v18, 0.5  ;;  %v5253_v23 = vcvt.s32.f32 %v302_v16  ;;  %v306_v24 = vmul.f32 16.0, %v5216_v26  ;;  %v285_v27 = vrot.slane %v284_v20, 2 }
  0x93   : > { %v471_v25 = vmul.f32 16.0, %v439_v19  ;;  %vm311_vm15 = vcmp.ge.f32.partialorder %v307_v21, 0.0  ;;  %vm315_vm0 = vcmp.lt.f32.partialorder %v307_v21, 16.0  ;;  %v291_v2 = vrot.slane %v290_v22, 2 }
  0x94   : > { %4291 = vmatpush.msk.msra.mxu0 %vm584_vm12, %v7304_v6  ;;  %4307 = vmatpush.msk.msra.mxu1 %vm600_vm13, %v7304_v6  ;;  %vm319_vm1 = vmand %vm311_vm15, %vm315_vm0  ;;  %v308_v28 = vsub.f32 %v5253_v23, %v305_v12  ;;  %v309_v29 = vsub.f32 %v5129_v3, %v306_v24  ;;  %v310_v30 = vsub.f32 %v5253_v23, %v306_v24  ;;  %v7322_v36 = vmov 0.0  }
  0x95   : > { %v503_v31 = vsub.f32 %v375_v1, %v471_v25  ;;  %v286_v32 = vmax.f32 %v284_v20, %v285_v27  ;;  %v292_v33 = vmax.f32 %v290_v22, %v291_v2  ;;  %v5262_v37 = vsel %vm319_vm1, 1.0, %v7322_v36 }
  0x96   : > { %4292 = vmatpush.msk.msra.mxu0 %vm583_vm14, %v7304_v6  ;;  %vm312_vm2 = vcmp.ge.f32.partialorder %v308_v28, 0.0  ;;  %vm316_vm3 = vcmp.lt.f32.partialorder %v308_v28, 16.0  ;;  %7378 = vst [vmem:[#allocation21_spill] sm:$0xff] %v5262_v37  ;;  %vm313_vm5 = vcmp.ge.f32.partialorder %v309_v29, 0.0  ;;  %vm317_vm6 = vcmp.lt.f32.partialorder %v309_v29, 16.0 }
  0x97   : > { %v535_v34 = vsub.f32 %v503_v31, %v5129_v3  ;;  %v287_v35 = vrot.slane %v286_v32, 1  ;;  %vm320_vm4 = vmand %vm312_vm2, %vm316_vm3  ;;  %v293_v38 = vrot.slane %v292_v33, 1  ;;  %vm314_vm7 = vcmp.ge.f32.partialorder %v310_v30, 0.0 }
  0x98   : > { %v5265_v41 = vsel %vm320_vm4, 1.0, %v7322_v36  ;;  %vm318_vm8 = vcmp.lt.f32.partialorder %v310_v30, 16.0  ;;  %vm321_vm10 = vmand %vm313_vm5, %vm317_vm6  ;;  %v758_v50 = vsub.f32 %v5216_v26, %v5129_v3  ;;  %v5298_v51 = vsub.f32 %v5223_v43, %v5129_v3 }
  0x99   : > { %v567_v39 = vand.u32 2147483647, %v535_v34  ;;  %v288_v40 = vmax.f32 %v286_v32, %v287_v35  ;;  %7379 = vst [vmem:[#allocation22_spill] sm:$0xff] %v5265_v41  ;;  %v294_v42 = vmax.f32 %v292_v33, %v293_v38  ;;  %vm322_vm11 = vmand %vm314_vm7, %vm318_vm8  ;;  %v5271_v46 = vsel %vm321_vm10, 1.0, %v7322_v36 }
  0x9a   : > { %7380 = vst [vmem:[#allocation23_spill] sm:$0xff] %v5271_v46  ;;  %v5274_v47 = vsel %vm322_vm11, 1.0, %v7322_v36  ;;  %vm760_vm12 = vcmp.eq.f32.partialorder %v758_v50, -4.0  ;;  %vm766_vm13 = vcmp.eq.f32.partialorder %v758_v50, -3.0  ;;  %vm772_vm14 = vcmp.eq.f32.partialorder %v758_v50, -2.0 }
  0x9b   : > { %vm599_vm9 = vcmp.lt.f32.partialorder %v567_v39, 0.5  ;;  %v679_v44 = vmul.f32 %v5262_v37, %v288_v40  ;;  %v680_v45 = vmul.f32 %v5265_v41, %v294_v42  ;;  %7381 = vst [vmem:[#allocation24_spill] sm:$0xff] %v5274_v47  ;;  %v681_v48 = vmul.f32 %v5271_v46, %v288_v40 }
  0x9c   : > { %4308 = vmatpush.msk.msra.mxu1 %vm599_vm9, %v7304_v6  ;;  %v682_v49 = vmul.f32 %v5274_v47, %v294_v42  ;;  %v5305_v52 = vsel %vm760_vm12, 1.0, %v7322_v36  ;;  %v5308_v53 = vsel %vm766_vm13, 1.0, %v7322_v36  ;;  %v5311_v54 = vsel %vm772_vm14, 1.0, %v7322_v36 }
  0x9d   : > { %699 = vmatmul.f32.vlgmr.msra.gmra.mxu0 %v679_v44  ;;  %722 = vmatmul.f32.vlgmr.msra.gmra.mxu1 %v680_v45  ;;  %vm778_vm15 = vcmp.eq.f32.partialorder %v758_v50, -1.0  ;;  %vm784_vm0 = vcmp.eq.f32.partialorder %v758_v50, 0.0  ;;  %vm790_vm1 = vcmp.eq.f32.partialorder %v758_v50, 1.0  ;;  %vm796_vm2 = vcmp.eq.f32.partialorder %v758_v50, 2.0 }
  0x9e   : > { %vm802_vm3 = vcmp.eq.f32.partialorder %v758_v50, 3.0  ;;  %vm808_vm4 = vcmp.eq.f32.partialorder %v758_v50, 4.0  ;;  %vm759_vm5 = vcmp.eq.f32.partialorder %v5298_v51, -4.0  ;;  %vm765_vm6 = vcmp.eq.f32.partialorder %v5298_v51, -3.0 }
  0x9f   : > { %vm771_vm7 = vcmp.eq.f32.partialorder %v5298_v51, -2.0  ;;  %vm777_vm8 = vcmp.eq.f32.partialorder %v5298_v51, -1.0  ;;  %vm783_vm9 = vcmp.eq.f32.partialorder %v5298_v51, 0.0  ;;  %vm789_vm10 = vcmp.eq.f32.partialorder %v5298_v51, 1.0 }
  0xa0   : > { %v5328_v55 = vsel %vm778_vm15, 1.0, %v7322_v36  ;;  %v5331_v56 = vsel %vm784_vm0, 1.0, %v7322_v36  ;;  %v5334_v57 = vsel %vm790_vm1, 1.0, %v7322_v36  ;;  %v5337_v58 = vsel %vm796_vm2, 1.0, %v7322_v36 }
  0xa1   : > { %v5342_v59 = vsel %vm802_vm3, 1.0, %v7322_v36  ;;  %v5345_v60 = vsel %vm808_vm4, 1.0, %v7322_v36  ;;  %v5348_v61 = vsel %vm759_vm5, 1.0, %v7322_v36  ;;  %v5351_v62 = vsel %vm765_vm6, 1.0, %v7322_v36 }
  0xa2   : > { %v5356_v63 = vsel %vm771_vm7, 1.0, %v7322_v36  ;;  %v5359_v0 = vsel %vm777_vm8, 1.0, %v7322_v36  ;;  %v5362_v4 = vsel %vm783_vm9, 1.0, %v7322_v36  ;;  %v5365_v5 = vsel %vm789_vm10, 1.0, %v7322_v36 }
  0xa3   : > { %v874_v7 = vstv %s5278_s8  ;;  %v878_v1 = vstv %s5280_s9  ;;  %v956_v8 = vstv %s5290_s13  ;;  %v960_v9 = vstv %s5294_s11  ;;  %s5538_s8 = sld [smem:[#allocation6 + $0x30]] }
  0xa4   : > { %v876_v10 = vmul.f32 %v5305_v52, %v874_v7  ;;  %v880_v11 = vmul.f32 %v5308_v53, %v878_v1  ;;  %v958_v12 = vmul.f32 %v5305_v52, %v956_v8  ;;  %v962_v13 = vmul.f32 %v5308_v53, %v960_v9  ;;  %s5546_s9 = sld [smem:[#allocation6 + $0x31]] }
  0xa5   : > { %702 = vmatmul.f32.gmra.mxu0 %v681_v48  ;;  %725 = vmatmul.f32.gmra.mxu1 %v682_v49  ;;  %v884_v14 = vstv %s5282_s28  ;;  %v966_v15 = vstv %s5302_s27  ;;  %v1195_v16 = vstv %s5313_s25  ;;  %v1199_v17 = vstv %s5315_s29  ;;  %s5553_s28 = sld [smem:[#allocation6 + $0x32]] }
  0xa6   : > { %v882_v18 = vadd.f32 %v880_v11, %v876_v10  ;;  %v886_v19 = vmul.f32 %v5311_v54, %v884_v14  ;;  %v964_v20 = vadd.f32 %v962_v13, %v958_v12  ;;  %v968_v21 = vmul.f32 %v5311_v54, %v966_v15  ;;  %s4374_s13 = sld [smem:[#allocation6 + $0x12]] }
  0xa7   : > { %v890_v22 = vstv %s5286_s10  ;;  %v972_v24 = vstv %s5325_s12  ;;  %v1197_v25 = vmul.f32 %v5305_v52, %v1195_v16  ;;  %v1201_v27 = vmul.f32 %v5308_v53, %v1199_v17  ;;  %s5567_s10 = sld [smem:[#allocation6 + $0x33]] }
  0xa8   : > { %v888_v2 = vadd.f32 %v886_v19, %v882_v18  ;;  %v892_v28 = vmul.f32 %v5328_v55, %v890_v22  ;;  %v970_v29 = vadd.f32 %v968_v21, %v964_v20  ;;  %v974_v30 = vmul.f32 %v5328_v55, %v972_v24  ;;  %s4376_s11 = sld [smem:[#allocation6 + $0x14]] }
  0xa9   : > { %v896_v31 = vstv %s5288_s14  ;;  %v978_v32 = vstv %s5339_s17  ;;  %v1203_v33 = vadd.f32 %v1201_v27, %v1197_v25  ;;  %v1205_v34 = vstv %s5353_s0  ;;  %s5576_s0 = sld [smem:[#allocation6 + $0x34]] }
  0xaa   : > { %v894_v35 = vadd.f32 %v892_v28, %v888_v2  ;;  %v898_v38 = vmul.f32 %v5331_v56, %v896_v31  ;;  %v976_v39 = vadd.f32 %v974_v30, %v970_v29  ;;  %v980_v40 = vmul.f32 %v5331_v56, %v978_v32  ;;  %s5585_s14 = sld [smem:[#allocation6 + $0x35]] }
  0xab   : > { %vm795_vm11 = vcmp.eq.f32.partialorder %v5298_v51, 2.0  ;;  %vm801_vm12 = vcmp.eq.f32.partialorder %v5298_v51, 3.0  ;;  %vm807_vm13 = vcmp.eq.f32.partialorder %v5298_v51, 4.0  ;;  %v902_v42 = vstv %s5292_s16  ;;  %s4375_s16 = sld [smem:[#allocation6 + $0x13]] }
  0xac   : > { %v984_v44 = vstv %s5367_s1  ;;  %v1207_v45 = vmul.f32 %v5311_v54, %v1205_v34  ;;  %v7306_v48 = vstv %s5373_s20  ;;  %v900_v49 = vadd.f32 %v898_v38, %v894_v35  ;;  %s5600_s1 = sld [smem:[#allocation6 + $0x3f]] }
  0xad   : > { %v904_v50 = vmul.f32 %v5334_v57, %v902_v42  ;;  %v982_v10 = vadd.f32 %v980_v40, %v976_v39  ;;  %v986_v11 = vmul.f32 %v5334_v57, %v984_v44  ;;  %v908_v12 = vstv %s5300_s15  ;;  %s5469_s15 = sld [smem:[#allocation6 + $0x2d]] }
  0xae   : > { %v990_v13 = vstv %s5391_s24  ;;  %v1209_v18 = vadd.f32 %v1207_v45, %v1203_v33  ;;  %v1213_v19 = vmul.f32 %v5328_v55, %v7306_v48  ;;  %v910_v21 = vmul.f32 %v5337_v58, %v908_v12  ;;  %s5620_s24 = sld [smem:[#allocation6 + $0x43]] }
  0xaf   : > { %v906_v20 = vadd.f32 %v904_v50, %v900_v49  ;;  %v988_v25 = vadd.f32 %v986_v11, %v982_v10  ;;  %v992_v27 = vmul.f32 %v5337_v58, %v990_v13  ;;  %v914_v2 = vstv %s5319_s7  ;;  %s4377_s27 = sld [smem:[#allocation6 + $0x15]] }
  0xb0   : > { %v996_v28 = vstv %s5401_s21  ;;  %v1215_v29 = vadd.f32 %v1213_v19, %v1209_v18  ;;  %v7307_v30 = vstv %s5411_s6  ;;  %v916_v35 = vmul.f32 %v5342_v59, %v914_v2  ;;  %s5610_s21 = sld [smem:[#allocation6 + $0x41]] }
  0xb1   : > { %v912_v33 = vadd.f32 %v910_v21, %v906_v20  ;;  %v994_v38 = vadd.f32 %v992_v27, %v988_v25  ;;  %v998_v39 = vmul.f32 %v5342_v59, %v996_v28  ;;  %v920_v40 = vstv %s5381_s19  ;;  %s5530_s19 = sld [smem:[#allocation6 + $0x2f]] }
  0xb2   : > { %v1002_v45 = vstv %s5419_s18  ;;  %v1219_v49 = vmul.f32 %v5331_v56, %v7307_v30  ;;  %v1223_v50 = vstv %s5424_s30  ;;  %v922_v11 = vmul.f32 %v5345_v60, %v920_v40  ;;  %s5521_s18 = sld [smem:[#allocation6 + $0x2e]] }
  0xb3   : > { %v918_v10 = vadd.f32 %v916_v35, %v912_v33  ;;  %v1000_v18 = vadd.f32 %v998_v39, %v994_v38  ;;  %v1004_v19 = vmul.f32 %v5345_v60, %v1002_v45  ;;  %v1225_v21 = vmul.f32 %v5334_v57, %v1223_v50  ;;  %s5638_s30 = sld [smem:[#allocation6 + $0x45]] }
  0xb4   : > { %v1221_v20 = vadd.f32 %v1219_v49, %v1215_v29  ;;  %v1229_v25 = vstv %s5432_s5  ;;  %v1235_v27 = vstv %s5443_s22  ;;  %v1241_v29 = vstv %s5456_s23  ;;  %s5617_s5 = sld [smem:[#allocation6 + $0x42]] }
  0xb5   : > { %v924_v6 = vadd.f32 %v922_v11, %v918_v10  ;;  %v1006_v48 = vadd.f32 %v1004_v19, %v1000_v18  ;;  %v1231_v30 = vmul.f32 %v5337_v58, %v1229_v25  ;;  %v1237_v33 = vmul.f32 %v5342_v59, %v1235_v27  ;;  %s5631_s22 = sld [smem:[#allocation6 + $0x44]] }
  0xb6   : > { %v1227_v35 = vadd.f32 %v1225_v21, %v1221_v20  ;;  %v875_v38 = vmul.f32 %v5348_v61, %v874_v7  ;;  %v879_v39 = vmul.f32 %v5351_v62, %v878_v1  ;;  %v5500_v49 = vsel %vm795_vm11, 1.0, %v7322_v36  ;;  %s5654_s23 = sld [smem:[#allocation6 + $0x47]] }
  0xb7   : > { %v5505_v10 = vsel %vm801_vm12, 1.0, %v7322_v36  ;;  %v5510_v11 = vsel %vm807_vm13, 1.0, %v7322_v36  ;;  %946 = vmatpush.msra.mxu2 %v924_v6  ;;  %1021 = vmatpush.msra.mxu3 %v1006_v48  ;;  %v885_v7 = vmul.f32 %v5356_v63, %v884_v14  ;;  %v1243_v18 = vmul.f32 %v5345_v60, %v1241_v29  ;;  %s4378_s25 = sld [smem:[#allocation6 + $0x16]] }
  0xb8   : > { %v1233_v1 = vadd.f32 %v1231_v30, %v1227_v35  ;;  %v881_v19 = vadd.f32 %v879_v39, %v875_v38  ;;  %v891_v20 = vmul.f32 %v5359_v0, %v890_v22  ;;  %v897_v51 = vmul.f32 %v5362_v4, %v896_v31  ;;  %s4379_s29 = sld [smem:[#allocation6 + $0x17]] }
  0xb9   : > { %v957_v6 = vmul.f32 %v5348_v61, %v956_v8  ;;  %v1407_v48 = vstv %s5469_s15  ;;  %v961_v22 = vmul.f32 %v5351_v62, %v960_v9  ;;  %v967_v21 = vmul.f32 %v5356_v63, %v966_v15  ;;  %s4380_s7 = sld [smem:[#allocation6 + $0x18]] }
  0xba   : > { %v1239_v14 = vadd.f32 %v1237_v33, %v1233_v1  ;;  %v887_v30 = vadd.f32 %v885_v7, %v881_v19  ;;  %v903_v8 = vmul.f32 %v5365_v5, %v902_v42  ;;  %v909_v31 = vmul.f32 %v5500_v49, %v908_v12  ;;  %s5719_s12 = sld [smem:[#allocation6 + $0x19]] }
  0xbb   : > { %v915_v35 = vmul.f32 %v5505_v10, %v914_v2  ;;  %v921_v33 = vmul.f32 %v5510_v11, %v920_v40  ;;  %v963_v15 = vadd.f32 %v961_v22, %v957_v6  ;;  %v973_v39 = vmul.f32 %v5359_v0, %v972_v24  ;;  %s5721_s17 = sld [smem:[#allocation6 + $0x24]] }
  0xbc   : > { %v5548_v9 = vadd.f32 %v1243_v18, %v1239_v14  ;;  %v893_v38 = vadd.f32 %v891_v20, %v887_v30  ;;  %v979_v42 = vmul.f32 %v5362_v4, %v978_v32  ;;  %v1196_v12 = vmul.f32 %v5348_v61, %v1195_v16  ;;  %s5724_s15 = sld [smem:[#allocation6 + $0x25]] }
  0xbd   : > { %v1200_v2 = vmul.f32 %v5351_v62, %v1199_v17  ;;  %v1206_v40 = vmul.f32 %v5356_v63, %v1205_v34  ;;  %v969_v7 = vadd.f32 %v967_v21, %v963_v15  ;;  %v985_v16 = vmul.f32 %v5365_v5, %v984_v44 }
  0xbe   : > { %1260 = vmatpush.msrb.mxu0 %v5548_v9  ;;  %v899_v24 = vadd.f32 %v897_v51, %v893_v38  ;;  %v991_v17 = vmul.f32 %v5500_v49, %v990_v13  ;;  %v997_v32 = vmul.f32 %v5505_v10, %v996_v28  ;;  %v1003_v34 = vmul.f32 %v5510_v11, %v1002_v45 }
  0xbf   : > { %v1202_v1 = vadd.f32 %v1200_v2, %v1196_v12  ;;  %v7382_v18 = vstv %s5373_s20  ;;  %v975_v44 = vadd.f32 %v973_v39, %v969_v7  ;;  %v7383_v51 = vstv %s5411_s6  ;;  %s5607_s20 = sld [smem:[#allocation6 + $0x40]] }
  0xc0   : > { %v1212_v19 = vmul.f32 %v5359_v0, %v7382_v18  ;;  %v905_v20 = vadd.f32 %v903_v8, %v899_v24  ;;  %v1218_v13 = vmul.f32 %v5362_v4, %v7383_v51  ;;  %v1224_v6 = vmul.f32 %v5365_v5, %v1223_v50  ;;  %s5645_s6 = sld [smem:[#allocation6 + $0x46]] }
  0xc1   : > { %v1208_v28 = vadd.f32 %v1206_v40, %v1202_v1  ;;  %v1409_v45 = vmul.f32 %v5305_v52, %v1407_v48  ;;  %v1411_v14 = vstv %s5521_s18  ;;  %v1417_v30 = vstv %s5530_s19  ;;  %s5726_s18 = sld [smem:[#allocation6 + $0x1a]] }
  0xc2   : > { %v911_v22 = vadd.f32 %v909_v31, %v905_v20  ;;  %v981_v21 = vadd.f32 %v979_v42, %v975_v44  ;;  %v1413_v38 = vmul.f32 %v5308_v53, %v1411_v14  ;;  %v1419_v8 = vmul.f32 %v5311_v54, %v1417_v30  ;;  %s5729_s19 = sld [smem:[#allocation6 + $0x26]] }
  0xc3   : > { %v1214_v15 = vadd.f32 %v1212_v19, %v1208_v28  ;;  %v1230_v50 = vmul.f32 %v5500_v49, %v1229_v25  ;;  %v1423_v39 = vstv %s5538_s8  ;;  %v1429_v12 = vstv %s5546_s9  ;;  %s5732_s8 = sld [smem:[#allocation6 + $0x27]] }
  0xc4   : > { %v917_v2 = vadd.f32 %v915_v35, %v911_v22  ;;  %v987_v31 = vadd.f32 %v985_v16, %v981_v21  ;;  %v1415_v42 = vadd.f32 %v1413_v38, %v1409_v45  ;;  %v1425_v40 = vmul.f32 %v5328_v55, %v1423_v39  ;;  %s5735_s9 = sld [smem:[#allocation6 + $0x28]] }
  0xc5   : > { %v1220_v24 = vadd.f32 %v1218_v13, %v1214_v15  ;;  %v1236_v25 = vmul.f32 %v5505_v10, %v1235_v27  ;;  %v1431_v7 = vmul.f32 %v5331_v56, %v1429_v12  ;;  %v1435_v1 = vstv %s5553_s28  ;;  %s5745_s28 = sld [smem:[#allocation6 + $0x29]] }
  0xc6   : > { %v923_v35 = vadd.f32 %v921_v33, %v917_v2  ;;  %v993_v18 = vadd.f32 %v991_v17, %v987_v31  ;;  %v1421_v16 = vadd.f32 %v1419_v8, %v1415_v42  ;;  %v1441_v19 = vstv %s5567_s10  ;;  %s5753_s10 = sld [smem:[#allocation6 + $0x2a]] }
  0xc7   : > { %v1226_v20 = vadd.f32 %v1224_v6, %v1220_v24  ;;  %v1447_v44 = vstv %s5576_s0  ;;  %v1453_v51 = vstv %s5585_s14  ;;  %v1408_v13 = vmul.f32 %v5348_v61, %v1407_v48  ;;  %s5765_s0 = sld [smem:[#allocation6 + $0x2b]] }
  0xc8   : > { %947 = vmatpush.msra.mxu2 %v923_v35  ;;  %v999_v28 = vadd.f32 %v997_v32, %v993_v18  ;;  %v1242_v27 = vmul.f32 %v5510_v11, %v1241_v29  ;;  %v1427_v45 = vadd.f32 %v1425_v40, %v1421_v16  ;;  %v1437_v22 = vmul.f32 %v5334_v57, %v1435_v1  ;;  %s5769_s14 = sld [smem:[#allocation6 + $0x36]] }
  0xc9   : > { %v1232_v33 = vadd.f32 %v1230_v50, %v1226_v20  ;;  %v1443_v17 = vmul.f32 %v5337_v58, %v1441_v19  ;;  %v1412_v6 = vmul.f32 %v5351_v62, %v1411_v14  ;;  %v1418_v21 = vmul.f32 %v5356_v63, %v1417_v30 }
  0xca   : > { %v1005_v48 = vadd.f32 %v1003_v34, %v999_v28  ;;  %v1433_v38 = vadd.f32 %v1431_v7, %v1427_v45  ;;  %v1449_v32 = vmul.f32 %v5342_v59, %v1447_v44  ;;  %v1455_v29 = vmul.f32 %v5345_v60, %v1453_v51 }
  0xcb   : > { %v1238_v8 = vadd.f32 %v1236_v25, %v1232_v33  ;;  %v1414_v15 = vadd.f32 %v1412_v6, %v1408_v13  ;;  %v1424_v50 = vmul.f32 %v5359_v0, %v1423_v39  ;;  %v1430_v2 = vmul.f32 %v5362_v4, %v1429_v12 }
  0xcc   : > { %1022 = vmatpush.msra.mxu3 %v1005_v48  ;;  %v1439_v14 = vadd.f32 %v1437_v22, %v1433_v38  ;;  %v1436_v34 = vmul.f32 %v5365_v5, %v1435_v1  ;;  %v1619_v30 = vstv %s5600_s1  ;;  %v1623_v31 = vstv %s5607_s20  ;;  %s5773_s1 = sld [smem:[#allocation6 + $0x37]] }
  0xcd   : > { %v5647_v42 = vadd.f32 %v1242_v27, %v1238_v8  ;;  %v1420_v40 = vadd.f32 %v1418_v21, %v1414_v15  ;;  %v1621_v24 = vmul.f32 %v5305_v52, %v1619_v30  ;;  %v1625_v25 = vmul.f32 %v5308_v53, %v1623_v31  ;;  %s5784_s20 = sld [smem:[#allocation6 + $0x2c]] }
  0xce   : > { %v1445_v7 = vadd.f32 %v1443_v17, %v1439_v14  ;;  %v1629_v39 = vstv %s5610_s21  ;;  %v1635_v12 = vstv %s5617_s5  ;;  %v1641_v35 = vstv %s5620_s24  ;;  %s5793_s21 = sld [smem:[#allocation6 + $0x38]] }
  0xcf   : > { %1261 = vmatpush.msrb.mxu0 %v5647_v42  ;;  %v1426_v1 = vadd.f32 %v1424_v50, %v1420_v40  ;;  %v1627_v18 = vadd.f32 %v1625_v25, %v1621_v24  ;;  %v1631_v16 = vmul.f32 %v5311_v54, %v1629_v39  ;;  %v1637_v20 = vmul.f32 %v5328_v55, %v1635_v12  ;;  %v869_v40 = vld [vmem:[%s5114_s2] sm:$0xff]  ;;  %s5797_s5 = sld [smem:[#allocation6 + $0x39]] }
  0xd0   : > { %v1451_v13 = vadd.f32 %v1449_v32, %v1445_v7  ;;  %v1647_v28 = vstv %s5631_s22  ;;  %v1442_v45 = vmul.f32 %v5500_v49, %v1441_v19  ;;  %v1643_v33 = vmul.f32 %v5331_v56, %v1641_v35  ;;  %s5806_s24 = sld [smem:[#allocation6 + $0x3a]] }
  0xd1   : > { %v1432_v27 = vadd.f32 %v1430_v2, %v1426_v1  ;;  %v1633_v22 = vadd.f32 %v1631_v16, %v1627_v18  ;;  %v1653_v6 = vstv %s5638_s30  ;;  %v1620_v21 = vmul.f32 %v5348_v61, %v1619_v30  ;;  %s5812_s22 = sld [smem:[#allocation6 + $0x3b]] }
  0xd2   : > { %v1457_v17 = vadd.f32 %v1455_v29, %v1451_v13  ;;  %v1448_v38 = vmul.f32 %v5505_v10, %v1447_v44  ;;  %v1649_v15 = vmul.f32 %v5334_v57, %v1647_v28  ;;  %v1659_v50 = vstv %s5645_s6  ;;  %s5828_s30 = sld [smem:[#allocation6 + $0x3c]] }
  0xd3   : > { %v1438_v48 = vadd.f32 %v1436_v34, %v1432_v27  ;;  %v1639_v8 = vadd.f32 %v1637_v20, %v1633_v22  ;;  %v1624_v19 = vmul.f32 %v5351_v62, %v1623_v31  ;;  %v1630_v2 = vmul.f32 %v5356_v63, %v1629_v39  ;;  %s5841_s6 = sld [smem:[#allocation6 + $0x3d]] }
  0xd4   : > { %1472 = vmatpush.msra.mxu0 %v1457_v17  ;;  %v1454_v24 = vmul.f32 %v5510_v11, %v1453_v51  ;;  %v1655_v34 = vmul.f32 %v5337_v58, %v1653_v6  ;;  %v1665_v44 = vstv %s5654_s23  ;;  %v1636_v1 = vmul.f32 %v5359_v0, %v1635_v12  ;;  %s5846_s23 = sld [smem:[#allocation6 + $0x48]] }
  0xd5   : > { %v1444_v29 = vadd.f32 %v1442_v45, %v1438_v48  ;;  %v1645_v30 = vadd.f32 %v1643_v33, %v1639_v8  ;;  %v1626_v7 = vadd.f32 %v1624_v19, %v1620_v21  ;;  %vm925_vm14 = vcmask 130048  }
  0xd6   : > { %v1661_v31 = vmul.f32 %v5342_v59, %v1659_v50  ;;  %v1642_v51 = vmul.f32 %v5362_v4, %v1641_v35  ;;  %v1667_v45 = vmul.f32 %v5345_v60, %v1665_v44  ;;  %v1648_v22 = vmul.f32 %v5365_v5, %v1647_v28 }
  0xd7   : > { %v1450_v18 = vadd.f32 %v1448_v38, %v1444_v29  ;;  %v1651_v16 = vadd.f32 %v1649_v15, %v1645_v30  ;;  %v1632_v20 = vadd.f32 %v1630_v2, %v1626_v7  ;;  %v1654_v21 = vmul.f32 %v5500_v49, %v1653_v6  ;;  %v870_v38 = vld [vmem:[%s5114_s2 + $0x8] sm:$0xff] }
  0xd8   : > { %v1660_v19 = vmul.f32 %v5505_v10, %v1659_v50  ;;  %v1089_v50 = vstv %s4374_s13  ;;  %v1093_v29 = vstv %s4375_s16  ;;  %s5850_s13 = sld [smem:[#allocation6 + $0x49]] }
  0xd9   : > { %v1456_v13 = vadd.f32 %v1454_v24, %v1450_v18  ;;  %v1657_v27 = vadd.f32 %v1655_v34, %v1651_v16  ;;  %v1638_v12 = vadd.f32 %v1636_v1, %v1632_v20  ;;  %v1091_v24 = vmul.f32 %v5305_v52, %v1089_v50  ;;  %s5852_s16 = sld [smem:[#allocation6 + $0x3e]] }
  0xda   : > { %v1095_v30 = vmul.f32 %v5308_v53, %v1093_v29  ;;  %v1099_v34 = vstv %s4376_s11  ;;  %v1094_v7 = vmul.f32 %v5351_v62, %v1093_v29  ;;  %v1105_v16 = vstv %s4377_s27  ;;  %s5856_s11 = sld [smem:[#allocation6 + $0x4a]] }
  0xdb   : > { %v1663_v33 = vadd.f32 %v1661_v31, %v1657_v27  ;;  %1473 = vmatpush.msra.mxu0 %v1456_v13  ;;  %v1644_v35 = vadd.f32 %v1642_v51, %v1638_v12  ;;  %v1101_v18 = vmul.f32 %v5311_v54, %v1099_v34  ;;  %v1100_v20 = vmul.f32 %v5356_v63, %v1099_v34  ;;  %s5860_s27 = sld [smem:[#allocation6 + $0x4b]] }
  0xdc   : > { %v1097_v1 = vadd.f32 %v1095_v30, %v1091_v24  ;;  %v1107_v13 = vmul.f32 %v5328_v55, %v1105_v16  ;;  %v1111_v27 = vstv %s4378_s25  ;;  %v1106_v12 = vmul.f32 %v5359_v0, %v1105_v16  ;;  %s5865_s25 = sld [smem:[#allocation6 + $0x4c]] }
  0xdd   : > { %v1669_v8 = vadd.f32 %v1667_v45, %v1663_v33  ;;  %v1113_v33 = vmul.f32 %v5331_v56, %v1111_v27  ;;  %v1301_v24 = vstv %s5721_s17  ;;  %v1305_v30 = vstv %s5724_s15  ;;  %s5890_s17 = sld [smem:[#allocation6 + $0x50]] }
  0xde   : > { %v1103_v51 = vadd.f32 %v1101_v18, %v1097_v1  ;;  %v1307_v1 = vmul.f32 %v5308_v53, %v1305_v30  ;;  %s5897_s15 = sld [smem:[#allocation6 + $0x51]] }
 0x11a   : > { %v700_v32 = vpop.f32.mrf.mxu0  ;;  %v723_v14 = vpop.f32.mrf.mxu1 }
 0x11b   : > { %v5672_v25 = vadd.f32 %v723_v14, %v700_v32  ;;  %v1650_v32 = vadd.f32 %v1648_v22, %v1644_v35  ;;  %v1666_v14 = vmul.f32 %v5510_v11, %v1665_v44  ;;  %v1090_v44 = vmul.f32 %v5348_v61, %v1089_v50 }
 0x11c   : > { %v1109_v22 = vadd.f32 %v1107_v13, %v1103_v51 }
 0x11d   : > { %v5678_v39 = vmul.f32 %v869_v40, %v5672_v25  ;;  %v1656_v2 = vadd.f32 %v1654_v21, %v1650_v32  ;;  %v1096_v31 = vadd.f32 %v1094_v7, %v1090_v44  ;;  %v1112_v21 = vmul.f32 %v5362_v4, %v1111_v27 }
 0x11e   : > { %v1303_v7 = vmul.f32 %v5305_v52, %v1301_v24  ;;  %v1302_v27 = vmul.f32 %v5348_v61, %v1301_v24  ;;  %v1329_v24 = vstv %s5745_s28  ;;  %s5925_s28 = sld [smem:[#allocation6 + $0x56]] }
 0x11f   : > { %4357 = vmatmul.msk.f32.vlgmr.msra.gmra.mxu2 %vm925_vm14, %v5678_v39  ;;  %4368 = vmatmul.msk.f32.vlgmr.msra.gmra.mxu3 %vm925_vm14, %v5678_v39  ;;  %v1662_v6 = vadd.f32 %v1660_v19, %v1656_v2  ;;  %v1102_v45 = vadd.f32 %v1100_v20, %v1096_v31  ;;  %v1135_v31 = vstv %s5726_s18  ;;  %v1311_v20 = vstv %s5729_s19  ;;  %s5901_s18 = sld [smem:[#allocation6 + $0x52]] }
 0x120   : > { %4396 = vmatmul.msk.f32.vlgmr.msrb.gmra.mxu0 %vm925_vm14, %v5678_v39  ;;  %v1309_v51 = vadd.f32 %v1307_v1, %v1303_v7  ;;  %v1313_v13 = vmul.f32 %v5311_v54, %v1311_v20  ;;  %s5906_s19 = sld [smem:[#allocation6 + $0x53]] }
 0x121   : > { %1684 = vmatpush.msrb.mxu0 %v1669_v8  ;;  %v1668_v40 = vadd.f32 %v1666_v14, %v1662_v6  ;;  %v1108_v35 = vadd.f32 %v1106_v12, %v1102_v45  ;;  %v1123_v8 = vstv %s4380_s7  ;;  %v5739_v6 = vsub.f32 %v5129_v3, %v5223_v43  ;;  %s5878_s7 = sld [smem:[#allocation6 + $0x4e]] }
 0x122   : > { %v703_v17 = vpop.f32.mrf.mxu0  ;;  %v726_v48 = vpop.f32.mrf.mxu1  ;;  %v1125_v14 = vmul.f32 %v5337_v58, %v1123_v8  ;;  %v1124_v29 = vmul.f32 %v5500_v49, %v1123_v8  ;;  %v1306_v45 = vmul.f32 %v5351_v62, %v1305_v30  ;;  %v1137_v8 = vmul.f32 %v5345_v60, %v1135_v31 }
 0x123   : > { %v5691_v15 = vadd.f32 %v726_v48, %v703_v17  ;;  %1685 = vmatpush.msrb.mxu0 %v1668_v40  ;;  %v1117_v17 = vstv %s4379_s29  ;;  %v1115_v48 = vadd.f32 %v1113_v33, %v1109_v22  ;;  %v1114_v32 = vadd.f32 %v1112_v21, %v1108_v35  ;;  %s5871_s29 = sld [smem:[#allocation6 + $0x4d]] }
 0x124   : > { %v1118_v19 = vmul.f32 %v5365_v5, %v1117_v17  ;;  %v1129_v40 = vstv %s5719_s12  ;;  %vm821_vm15 = vcmp.eq.f32.partialorder %v5739_v6, -3.0  ;;  %v1317_v33 = vstv %s5732_s8  ;;  %s5885_s12 = sld [smem:[#allocation6 + $0x4f]] }
 0x125   : > { %v5695_v28 = vmul.f32 %v870_v38, %v5691_v15  ;;  %v1119_v38 = vmul.f32 %v5334_v57, %v1117_v17  ;;  %v1131_v16 = vmul.f32 %v5342_v59, %v1129_v40  ;;  %v1130_v22 = vmul.f32 %v5505_v10, %v1129_v40  ;;  %s5911_s8 = sld [smem:[#allocation6 + $0x54]] }
 0x126   : > { %v1120_v50 = vadd.f32 %v1118_v19, %v1114_v32  ;;  %v1315_v17 = vadd.f32 %v1313_v13, %v1309_v51  ;;  %v1319_v35 = vmul.f32 %v5328_v55, %v1317_v33  ;;  %v1308_v21 = vadd.f32 %v1306_v45, %v1302_v27 }
 0x127   : > { %4358 = vmatmul.msk.f32.gmra.mxu2 %vm925_vm14, %v5695_v28  ;;  %4369 = vmatmul.msk.f32.gmra.mxu3 %vm925_vm14, %v5695_v28  ;;  %v1121_v2 = vadd.f32 %v1119_v38, %v1115_v48  ;;  %v1312_v48 = vmul.f32 %v5356_v63, %v1311_v20  ;;  %vm815_vm0 = vcmp.eq.f32.partialorder %v5739_v6, -4.0  ;;  %v1323_v32 = vstv %s5735_s9  ;;  %s5920_s9 = sld [smem:[#allocation6 + $0x55]] }
 0x128   : > { %4422 = vmatmul.msk.f32.vlgmr.msra.gmra.mxu0 %vm925_vm14, %v5678_v39  ;;  %v1126_v12 = vadd.f32 %v1124_v29, %v1120_v50  ;;  %v1321_v19 = vadd.f32 %v1319_v35, %v1315_v17  ;;  %v1318_v40 = vmul.f32 %v5359_v0, %v1317_v33  ;;  %v1136_v29 = vmul.f32 %v5510_v11, %v1135_v31 }
 0x129   : > { %v1127_v18 = vadd.f32 %v1125_v14, %v1121_v2  ;;  %v1325_v2 = vmul.f32 %v5331_v56, %v1323_v32  ;;  %v1314_v14 = vadd.f32 %v1312_v48, %v1308_v21  ;;  %v5778_v1 = vsel %vm821_vm15, 1.0, %v7322_v36 }
 0x12a   : > { %v1132_v50 = vadd.f32 %v1130_v22, %v1126_v12  ;;  %7384 = vst [vmem:[#allocation25_spill] sm:$0xff] %v5778_v1  ;;  %v1324_v31 = vmul.f32 %v5362_v4, %v1323_v32  ;;  %v5790_v20 = vsel %vm815_vm0, 1.0, %v7322_v36  ;;  %v1331_v27 = vmul.f32 %v5334_v57, %v1329_v24 }
 0x12b   : > { %v1133_v38 = vadd.f32 %v1131_v16, %v1127_v18  ;;  %v5782_v18 = vsub.f32 %v5129_v3, %v5216_v26  ;;  %v1320_v16 = vadd.f32 %v1318_v40, %v1314_v14  ;;  %7385 = vst [vmem:[#allocation26_spill] sm:$0xff] %v5790_v20  ;;  %v1327_v13 = vadd.f32 %v1325_v2, %v1321_v19 }
 0x12c   : > { %v1335_v45 = vstv %s5753_s10  ;;  %v1138_v12 = vadd.f32 %v1136_v29, %v1132_v50  ;;  %v1330_v33 = vmul.f32 %v5365_v5, %v1329_v24  ;;  %v1341_v17 = vstv %s5765_s0  ;;  %s5930_s10 = sld [smem:[#allocation6 + $0x57]] }
 0x12d   : > { %v1139_v51 = vadd.f32 %v1137_v8, %v1133_v38  ;;  %v1326_v22 = vadd.f32 %v1324_v31, %v1320_v16  ;;  %vm822_vm1 = vcmp.eq.f32.partialorder %v5782_v18, -3.0  ;;  %vm816_vm2 = vcmp.eq.f32.partialorder %v5782_v18, -4.0  ;;  %s5936_s0 = sld [smem:[#allocation6 + $0x58]] }
 0x12e   : > { %v1336_v21 = vmul.f32 %v5500_v49, %v1335_v45  ;;  %v1513_v48 = vstv %s5769_s14  ;;  %v1517_v38 = vstv %s5773_s1  ;;  %v5815_v8 = vsel %vm822_vm1, 1.0, %v7322_v36  ;;  %s5941_s14 = sld [smem:[#allocation6 + $0x59]] }
 0x12f   : > { %v1332_v35 = vadd.f32 %v1330_v33, %v1326_v22  ;;  %7386 = vst [vmem:[#allocation27_spill] sm:$0xff] %v5815_v8  ;;  %v5818_v32 = vsel %vm816_vm2, 1.0, %v7322_v36  ;;  %v1515_v19 = vmul.f32 %v5305_v52, %v1513_v48  ;;  %v1519_v2 = vmul.f32 %v5308_v53, %v1517_v38  ;;  %s5947_s1 = sld [smem:[#allocation6 + $0x63]] }
 0x130   : > { %4423 = vmatmul.msk.f32.gmra.mxu0 %vm925_vm14, %v5695_v28  ;;  %7387 = vst [vmem:[#allocation28_spill] sm:$0xff] %v5818_v32  ;;  %v1343_v40 = vmul.f32 %v5342_v59, %v1341_v17  ;;  %v1347_v50 = vstv %s5784_s20  ;;  %v1523_v29 = vstv %s5793_s21  ;;  %v1342_v31 = vmul.f32 %v5505_v10, %v1341_v17  ;;  %s5950_s20 = sld [smem:[#allocation6 + $0x64]] }
 0x131   : > { %v1521_v24 = vadd.f32 %v1519_v2, %v1515_v19  ;;  %v1338_v16 = vadd.f32 %v1336_v21, %v1332_v35  ;;  %v1535_v22 = vstv %s5806_s24  ;;  %v1524_v33 = vmul.f32 %v5356_v63, %v1523_v29  ;;  %s5955_s21 = sld [smem:[#allocation6 + $0x65]] }
 0x132   : > { %v1348_v21 = vmul.f32 %v5510_v11, %v1347_v50  ;;  %v1536_v19 = vmul.f32 %v5362_v4, %v1535_v22  ;;  %s5969_s24 = sld [smem:[#allocation6 + $0x67]]  ;;  %vm827_vm3 = vcmp.eq.f32.partialorder %v5739_v6, -2.0  ;;  %vm828_vm4 = vcmp.eq.f32.partialorder %v5782_v18, -2.0 }
 0x133   : > { %v1344_v35 = vadd.f32 %v1342_v31, %v1338_v16  ;;  %v1553_v31 = vstv %s5841_s6  ;;  %s5985_s6 = sld [smem:[#allocation6 + $0x6a]]  ;;  %vm833_vm5 = vcmp.eq.f32.partialorder %v5739_v6, -1.0  ;;  %vm834_vm6 = vcmp.eq.f32.partialorder %v5782_v18, -1.0 }
 0x134   : > { %vm845_vm7 = vcmp.eq.f32.partialorder %v5739_v6, 1.0  ;;  %vm839_vm8 = vcmp.eq.f32.partialorder %v5739_v6, 0.0  ;;  %vm846_vm9 = vcmp.eq.f32.partialorder %v5782_v18, 1.0  ;;  %vm840_vm10 = vcmp.eq.f32.partialorder %v5782_v18, 0.0 }
 0x135   : > { %vm857_vm11 = vcmp.eq.f32.partialorder %v5739_v6, 3.0  ;;  %vm851_vm12 = vcmp.eq.f32.partialorder %v5739_v6, 2.0  ;;  %vm858_vm13 = vcmp.eq.f32.partialorder %v5782_v18, 3.0  ;;  %vm852_vm1 = vcmp.eq.f32.partialorder %v5782_v18, 2.0 }
 0x136   : > { %vm863_vm2 = vcmp.eq.f32.partialorder %v5739_v6, 4.0 }
 0x138   : > { %4448 = vmatmul.msk.f32.vlgmr.msrb.gmra.mxu0 %vm925_vm14, %v5678_v39 }
 0x140   : > { %4449 = vmatmul.msk.f32.gmra.mxu0 %vm925_vm14, %v5695_v28 }
 0x1a2   : > { %v949_v34 = vpop.f32.mrf.mxu2  ;;  %v1024_v44 = vpop.f32.mrf.mxu3 }
 0x1aa   : > { %v952_v30 = vpop.f32.mrf.mxu2  ;;  %v1027_v7 = vpop.f32.mrf.mxu3 }
 0x1ab   : > { %1050 = vmatpush.msrb.mxu2 %v1027_v7  ;;  %1079 = vmatpush.msrb.mxu3 %v952_v30  ;;  %v1525_v30 = vmul.f32 %v5311_v54, %v1523_v29  ;;  %v1514_v7 = vmul.f32 %v5348_v61, %v1513_v48  ;;  %v1541_v48 = vstv %s5812_s22  ;;  %s5974_s22 = sld [smem:[#allocation6 + $0x68]] }
 0x1ad   : > { %1051 = vmatpush.msrb.mxu2 %v1024_v44  ;;  %1080 = vmatpush.msrb.mxu3 %v949_v34  ;;  %v1333_v34 = vadd.f32 %v1331_v27, %v1327_v13  ;;  %v1337_v44 = vmul.f32 %v5337_v58, %v1335_v45 }
 0x1ae   : > { %4370 = vmatmul.msk.f32.vlgmr.msrb.gmra.mxu2 %vm925_vm14, %v5778_v1  ;;  %4372 = vmatmul.msk.f32.vlgmr.msrb.gmra.mxu3 %vm925_vm14, %v5790_v20 }
 0x1af   : > { %1154 = vmatpush.msra.mxu2 %v1139_v51  ;;  %v1339_v14 = vadd.f32 %v1337_v44, %v1333_v34  ;;  %v1529_v51 = vstv %s5797_s5  ;;  %v1537_v44 = vmul.f32 %v5331_v56, %v1535_v22  ;;  %s5960_s5 = sld [smem:[#allocation6 + $0x66]] }
 0x1b0   : > { %v1531_v13 = vmul.f32 %v5328_v55, %v1529_v51  ;;  %v1530_v17 = vmul.f32 %v5359_v0, %v1529_v51 }
 0x1b1   : > { %1155 = vmatpush.msra.mxu2 %v1138_v12  ;;  %v1345_v45 = vadd.f32 %v1343_v40, %v1339_v14  ;;  %v1349_v12 = vmul.f32 %v5345_v60, %v1347_v50  ;;  %v1543_v40 = vmul.f32 %v5334_v57, %v1541_v48  ;;  %v1350_v50 = vadd.f32 %v1348_v21, %v1344_v35 }
 0x1b3   : > { %4747 = vmatpush.msrb.mxu2 %v5548_v9  ;;  %v1518_v9 = vmul.f32 %v5351_v62, %v1517_v38  ;;  %v1351_v2 = vadd.f32 %v1349_v12, %v1345_v45 }
 0x1b5   : > { %4748 = vmatpush.msrb.mxu2 %v5647_v42  ;;  %v1527_v42 = vadd.f32 %v1525_v30, %v1521_v24  ;;  %v1520_v27 = vadd.f32 %v1518_v9, %v1514_v7  ;;  %v1547_v24 = vstv %s5828_s30  ;;  %v1542_v7 = vmul.f32 %v5365_v5, %v1541_v48  ;;  %s5979_s30 = sld [smem:[#allocation6 + $0x69]] }
 0x1b6   : > { %4371 = vmatmul.msk.f32.gmra.mxu2 %vm925_vm14, %v5815_v8  ;;  %4373 = vmatmul.msk.f32.gmra.mxu3 %vm925_vm14, %v5818_v32  ;;  %v1549_v16 = vmul.f32 %v5337_v58, %v1547_v24 }
 0x1b7   : > { %v1533_v34 = vadd.f32 %v1531_v13, %v1527_v42  ;;  %v1526_v38 = vadd.f32 %v1524_v33, %v1520_v27  ;;  %v1548_v42 = vmul.f32 %v5500_v49, %v1547_v24  ;;  %v1725_v13 = vstv %s5846_s23  ;;  %s5990_s23 = sld [smem:[#allocation6 + $0x6b]] }
 0x1b8   : > { %v1729_v27 = vstv %s5850_s13  ;;  %v1727_v45 = vmul.f32 %v5305_v52, %v1725_v13  ;;  %v1555_v33 = vmul.f32 %v5342_v59, %v1553_v31  ;;  %v1726_v21 = vmul.f32 %v5348_v61, %v1725_v13  ;;  %s5996_s13 = sld [smem:[#allocation6 + $0x75]] }
 0x1b9   : > { %v1539_v14 = vadd.f32 %v1537_v44, %v1533_v34  ;;  %v1532_v29 = vadd.f32 %v1530_v17, %v1526_v38  ;;  %v1731_v12 = vmul.f32 %v5308_v53, %v1729_v27  ;;  %v1559_v34 = vstv %s5852_s16  ;;  %s5999_s16 = sld [smem:[#allocation6 + $0x76]] }
 0x1ba   : > { %v1735_v44 = vstv %s5856_s11  ;;  %v1730_v48 = vmul.f32 %v5351_v62, %v1729_v27  ;;  %v1560_v13 = vmul.f32 %v5510_v11, %v1559_v34  ;;  %v1753_v27 = vstv %s5871_s29  ;;  %s6004_s11 = sld [smem:[#allocation6 + $0x77]] }
 0x1bb   : > { %v1538_v30 = vadd.f32 %v1536_v19, %v1532_v29  ;;  %v1545_v9 = vadd.f32 %v1543_v40, %v1539_v14  ;;  %v1733_v17 = vadd.f32 %v1731_v12, %v1727_v45  ;;  %v1737_v35 = vmul.f32 %v5311_v54, %v1735_v44  ;;  %s6023_s29 = sld [smem:[#allocation6 + $0x7a]] }
 0x1bc   : > { %v1554_v19 = vmul.f32 %v5505_v10, %v1553_v31  ;;  %v1732_v29 = vadd.f32 %v1730_v48, %v1726_v21  ;;  %v1736_v24 = vmul.f32 %v5356_v63, %v1735_v44  ;;  %v1755_v12 = vmul.f32 %v5334_v57, %v1753_v27 }
 0x1bd   : > { %v1544_v51 = vadd.f32 %v1542_v7, %v1538_v30  ;;  %v1551_v22 = vadd.f32 %v1549_v16, %v1545_v9  ;;  %v1739_v14 = vadd.f32 %v1737_v35, %v1733_v17  ;;  %v1561_v30 = vmul.f32 %v5345_v60, %v1559_v34 }
 0x1be   : > { %4383 = vmatmul.msk.f32.vlgmr.msra.gmra.mxu2 %vm925_vm14, %v5678_v39  ;;  %v1747_v7 = vstv %s5865_s25  ;;  %v1738_v31 = vadd.f32 %v1736_v24, %v1732_v29  ;;  %v1759_v17 = vstv %s5878_s7  ;;  %v1754_v34 = vmul.f32 %v5365_v5, %v1753_v27  ;;  %s6018_s25 = sld [smem:[#allocation6 + $0x79]] }
 0x1bf   : > { %1366 = vmatpush.msra.mxu2 %v1351_v2  ;;  %v1550_v38 = vadd.f32 %v1548_v42, %v1544_v51  ;;  %v1741_v2 = vstv %s5860_s27  ;;  %v1749_v16 = vmul.f32 %v5331_v56, %v1747_v7  ;;  %v1761_v21 = vmul.f32 %v5337_v58, %v1759_v17  ;;  %s6009_s27 = sld [smem:[#allocation6 + $0x78]] }
 0x1c0   : > { %v1743_v40 = vmul.f32 %v5328_v55, %v1741_v2  ;;  %v1742_v51 = vmul.f32 %v5359_v0, %v1741_v2  ;;  %s6028_s7 = sld [smem:[#allocation6 + $0x7b]] }
 0x1c1   : > { %1367 = vmatpush.msra.mxu2 %v1350_v50  ;;  %v1557_v50 = vadd.f32 %v1555_v33, %v1551_v22  ;;  %v1556_v42 = vadd.f32 %v1554_v19, %v1550_v38  ;;  %v1748_v33 = vmul.f32 %v5362_v4, %v1747_v7  ;;  %v1765_v19 = vstv %s5885_s12  ;;  %s6034_s12 = sld [smem:[#allocation6 + $0x7c]] }
 0x1c2   : > { %v1745_v9 = vadd.f32 %v1743_v40, %v1739_v14  ;;  %v1744_v22 = vadd.f32 %v1742_v51, %v1738_v31  ;;  %v1767_v14 = vmul.f32 %v5342_v59, %v1765_v19  ;;  %v1771_v40 = vstv %s5890_s17  ;;  %s6039_s17 = sld [smem:[#allocation6 + $0x7d]] }
 0x1c3   : > { %v1563_v44 = vadd.f32 %v1561_v30, %v1557_v50  ;;  %v1562_v38 = vadd.f32 %v1560_v13, %v1556_v42  ;;  %v1773_v24 = vmul.f32 %v5345_v60, %v1771_v40  ;;  %v1760_v50 = vmul.f32 %v5500_v49, %v1759_v17 }
 0x1c4   : > { %v1751_v45 = vadd.f32 %v1749_v16, %v1745_v9  ;;  %v1750_v48 = vadd.f32 %v1748_v33, %v1744_v22  ;;  %v1766_v30 = vmul.f32 %v5505_v10, %v1765_v19  ;;  %v1772_v16 = vmul.f32 %v5510_v11, %v1771_v40 }
 0x1c5   : > { %v1994_v31 = vstv %s5897_s15  ;;  %v1998_v51 = vstv %s5901_s18  ;;  %s6045_s15 = sld [smem:[#allocation6 + $0x87]] }
 0x1c6   : > { %4384 = vmatmul.msk.f32.gmra.mxu2 %vm925_vm14, %v5695_v28  ;;  %v1757_v35 = vadd.f32 %v1755_v12, %v1751_v45  ;;  %v1756_v29 = vadd.f32 %v1754_v34, %v1750_v48  ;;  %v1996_v42 = vmul.f32 %v5305_v52, %v1994_v31  ;;  %v2000_v13 = vmul.f32 %v5308_v53, %v1998_v51  ;;  %s6048_s18 = sld [smem:[#allocation6 + $0x88]] }
 0x1c7   : > { %v2004_v12 = vstv %s5906_s19  ;;  %v1999_v17 = vmul.f32 %v5351_v62, %v1998_v51  ;;  %s6053_s19 = sld [smem:[#allocation6 + $0x89]] }
 0x1c8   : > { %v1763_v2 = vadd.f32 %v1761_v21, %v1757_v35  ;;  %v1762_v9 = vadd.f32 %v1760_v50, %v1756_v29  ;;  %v2002_v22 = vadd.f32 %v2000_v13, %v1996_v42  ;;  %v2006_v33 = vmul.f32 %v5311_v54, %v2004_v12 }
 0x1c9   : > { %v2010_v21 = vstv %s5911_s8  ;;  %v2005_v19 = vmul.f32 %v5356_v63, %v2004_v12  ;;  %v2022_v50 = vstv %s5925_s28  ;;  %s6058_s8 = sld [smem:[#allocation6 + $0x8a]] }
 0x1ca   : > { %v1769_v7 = vadd.f32 %v1767_v14, %v1763_v2  ;;  %v1768_v45 = vadd.f32 %v1766_v30, %v1762_v9  ;;  %v2008_v48 = vadd.f32 %v2006_v33, %v2002_v22  ;;  %v2012_v34 = vmul.f32 %v5328_v55, %v2010_v21  ;;  %s6073_s28 = sld [smem:[#allocation6 + $0x8c]] }
 0x1cb   : > { %v2016_v2 = vstv %s5920_s9  ;;  %v2040_v33 = vstv %s5941_s14  ;;  %s6067_s9 = sld [smem:[#allocation6 + $0x8b]] }
 0x1cc   : > { %v1775_v27 = vadd.f32 %v1773_v24, %v1769_v7  ;;  %v1774_v35 = vadd.f32 %v1772_v16, %v1768_v45  ;;  %v2014_v14 = vadd.f32 %v2012_v34, %v2008_v48  ;;  %v2018_v40 = vmul.f32 %v5331_v56, %v2016_v2  ;;  %s6094_s14 = sld [smem:[#allocation6 + $0x8f]] }
 0x1cd   : > { %v2011_v24 = vmul.f32 %v5359_v0, %v2010_v21  ;;  %v2024_v7 = vmul.f32 %v5334_v57, %v2022_v50  ;;  %v2017_v16 = vmul.f32 %v5362_v4, %v2016_v2  ;;  %v2034_v45 = vstv %s5936_s0  ;;  %s6087_s0 = sld [smem:[#allocation6 + $0x8e]] }
 0x1ce   : > { %4397 = vmatmul.msk.f32.vlgmr.msrb.gmra.mxu2 %vm925_vm14, %v5695_v28  ;;  %v2020_v30 = vadd.f32 %v2018_v40, %v2014_v14  ;;  %v2036_v22 = vmul.f32 %v5342_v59, %v2034_v45  ;;  %v2035_v21 = vmul.f32 %v5505_v10, %v2034_v45  ;;  %v2200_v2 = vstv %s5950_s20  ;;  %s6102_s20 = sld [smem:[#allocation6 + $0x9a]] }
 0x1cf   : > { %1578 = vmatpush.msrb.mxu2 %v1563_v44  ;;  %v1995_v44 = vmul.f32 %v5348_v61, %v1994_v31  ;;  %v2028_v31 = vstv %s5930_s10  ;;  %v2202_v40 = vmul.f32 %v5308_v53, %v2200_v2  ;;  %s6081_s10 = sld [smem:[#allocation6 + $0x8d]] }
 0x1d0   : > { %v2026_v51 = vadd.f32 %v2024_v7, %v2020_v30  ;;  %v2030_v42 = vmul.f32 %v5337_v58, %v2028_v31 }
 0x1d1   : > { %1579 = vmatpush.msrb.mxu2 %v1562_v38  ;;  %v2001_v38 = vadd.f32 %v1999_v17, %v1995_v44  ;;  %v2042_v17 = vmul.f32 %v5345_v60, %v2040_v33 }
 0x1d2   : > { %v2032_v12 = vadd.f32 %v2030_v42, %v2026_v51  ;;  %v2212_v51 = vstv %s5960_s5  ;;  %s6115_s5 = sld [smem:[#allocation6 + $0x9c]] }
 0x1d3   : > { %v2007_v29 = vadd.f32 %v2005_v19, %v2001_v38  ;;  %v2041_v38 = vmul.f32 %v5510_v11, %v2040_v33  ;;  %v2196_v19 = vstv %s5947_s1  ;;  %s6099_s1 = sld [smem:[#allocation6 + $0x99]] }
 0x1d4   : > { %v2038_v48 = vadd.f32 %v2036_v22, %v2032_v12  ;;  %v2198_v14 = vmul.f32 %v5305_v52, %v2196_v19  ;;  %v2218_v12 = vstv %s5969_s24  ;;  %s6122_s24 = sld [smem:[#allocation6 + $0x9d]] }
 0x1d5   : > { %v2013_v9 = vadd.f32 %v2011_v24, %v2007_v29  ;;  %v2220_v33 = vmul.f32 %v5331_v56, %v2218_v12 }
 0x1d6   : > { %4409 = vmatmul.msk.f32.vlgmr.msra.gmra.mxu2 %vm925_vm14, %v5678_v39  ;;  %v2044_v29 = vadd.f32 %v2042_v17, %v2038_v48  ;;  %v2204_v30 = vadd.f32 %v2202_v40, %v2198_v14  ;;  %v2213_v17 = vmul.f32 %v5359_v0, %v2212_v51 }
 0x1d7   : > { %1790 = vmatpush.msra.mxu2 %v1775_v27  ;;  %v2019_v13 = vadd.f32 %v2017_v16, %v2013_v9  ;;  %v2023_v27 = vmul.f32 %v5365_v5, %v2022_v50  ;;  %v2206_v50 = vstv %s5955_s21  ;;  %v2197_v9 = vmul.f32 %v5348_v61, %v2196_v19  ;;  %s6110_s21 = sld [smem:[#allocation6 + $0x9b]] }
 0x1d8   : > { %v2208_v7 = vmul.f32 %v5311_v54, %v2206_v50  ;;  %v2201_v16 = vmul.f32 %v5351_v62, %v2200_v2  ;;  %v2207_v45 = vmul.f32 %v5356_v63, %v2206_v50  ;;  %v2230_v19 = vstv %s5979_s30  ;;  %s6134_s30 = sld [smem:[#allocation6 + $0x9f]] }
 0x1d9   : > { %1791 = vmatpush.msra.mxu2 %v1774_v35  ;;  %v2025_v44 = vadd.f32 %v2023_v27, %v2019_v13  ;;  %v2029_v35 = vmul.f32 %v5500_v49, %v2028_v31  ;;  %v2214_v13 = vmul.f32 %v5328_v55, %v2212_v51  ;;  %v2232_v14 = vmul.f32 %v5337_v58, %v2230_v19 }
 0x1da   : > { %v2210_v42 = vadd.f32 %v2208_v7, %v2204_v30  ;;  %v2203_v27 = vadd.f32 %v2201_v16, %v2197_v9  ;;  %v2242_v7 = vstv %s5990_s23  ;;  %s6147_s23 = sld [smem:[#allocation6 + $0xa1]] }
 0x1db   : > { %v2031_v34 = vadd.f32 %v2029_v35, %v2025_v44  ;;  %v2224_v35 = vstv %s5974_s22  ;;  %v2244_v16 = vmul.f32 %v5345_v60, %v2242_v7  ;;  %s6128_s22 = sld [smem:[#allocation6 + $0x9e]] }
 0x1dc   : > { %v2216_v22 = vadd.f32 %v2214_v13, %v2210_v42  ;;  %v2209_v44 = vadd.f32 %v2207_v45, %v2203_v27  ;;  %v2226_v48 = vmul.f32 %v5334_v57, %v2224_v35  ;;  %v2243_v27 = vmul.f32 %v5510_v11, %v2242_v7 }
 0x1dd   : > { %v2037_v24 = vadd.f32 %v2035_v21, %v2031_v34  ;;  %v2396_v45 = vstv %s5996_s13  ;;  %s6151_s13 = sld [smem:[#allocation6 + $0xa2]] }
 0x1de   : > { %4410 = vmatmul.msk.f32.gmra.mxu2 %vm925_vm14, %v5695_v28  ;;  %v2222_v21 = vadd.f32 %v2220_v33, %v2216_v22  ;;  %v2215_v34 = vadd.f32 %v2213_v17, %v2209_v44  ;;  %v2398_v22 = vmul.f32 %v5305_v52, %v2396_v45 }
 0x1df   : > { %v2043_v31 = vadd.f32 %v2041_v38, %v2037_v24  ;;  %v2219_v38 = vmul.f32 %v5362_v4, %v2218_v12  ;;  %v2236_v24 = vstv %s5985_s6  ;;  %v2400_v12 = vstv %s5999_s16  ;;  %s6140_s6 = sld [smem:[#allocation6 + $0xa0]] }
 0x1e0   : > { %v2228_v2 = vadd.f32 %v2226_v48, %v2222_v21  ;;  %v2238_v30 = vmul.f32 %v5342_v59, %v2236_v24  ;;  %v2237_v51 = vmul.f32 %v5505_v10, %v2236_v24  ;;  %v2402_v33 = vmul.f32 %v5308_v53, %v2400_v12  ;;  %s6154_s16 = sld [smem:[#allocation6 + $0xa3]] }
 0x1e1   : > { %v2221_v40 = vadd.f32 %v2219_v38, %v2215_v34  ;;  %v2397_v34 = vmul.f32 %v5348_v61, %v2396_v45  ;;  %v2401_v38 = vmul.f32 %v5351_v62, %v2400_v12 }
 0x1e2   : > { %v2234_v50 = vadd.f32 %v2232_v14, %v2228_v2  ;;  %v2404_v21 = vadd.f32 %v2402_v33, %v2398_v22  ;;  %v2412_v2 = vstv %s6009_s27  ;;  %s6164_s27 = sld [smem:[#allocation6 + $0xa5]] }
 0x1e4   : > { %v2240_v42 = vadd.f32 %v2238_v30, %v2234_v50  ;;  %v2418_v50 = vstv %s6018_s25  ;;  %s6171_s25 = sld [smem:[#allocation6 + $0xa6]] }
 0x1e5   : > { %v2420_v7 = vmul.f32 %v5331_v56, %v2418_v50 }
 0x1e6   : > { %4435 = vmatmul.msk.f32.vlgmr.msrb.gmra.mxu2 %vm925_vm14, %v5678_v39  ;;  %v2246_v44 = vadd.f32 %v2244_v16, %v2240_v42  ;;  %v2413_v16 = vmul.f32 %v5359_v0, %v2412_v2 }
 0x1e7   : > { %2065 = vmatpush.msrb.mxu2 %v2044_v29  ;;  %v2225_v29 = vmul.f32 %v5365_v5, %v2224_v35  ;;  %v2406_v35 = vstv %s6004_s11  ;;  %s6159_s11 = sld [smem:[#allocation6 + $0xa4]] }
 0x1e8   : > { %v2408_v48 = vmul.f32 %v5311_v54, %v2406_v35  ;;  %v2407_v24 = vmul.f32 %v5356_v63, %v2406_v35 }
 0x1e9   : > { %2066 = vmatpush.msrb.mxu2 %v2043_v31  ;;  %v2227_v9 = vadd.f32 %v2225_v29, %v2221_v40  ;;  %v2231_v31 = vmul.f32 %v5500_v49, %v2230_v19  ;;  %v2414_v40 = vmul.f32 %v5328_v55, %v2412_v2  ;;  %v2403_v29 = vadd.f32 %v2401_v38, %v2397_v34  ;;  %v4476_v2 = vld [vmem:[%s5114_s2 + $0x10] sm:$0xff] }
 0x1ea   : > { %v2410_v14 = vadd.f32 %v2408_v48, %v2404_v21  ;;  %v2442_v21 = vstv %s6039_s17  ;;  %s6196_s17 = sld [smem:[#allocation6 + $0xaa]] }
 0x1eb   : > { %v2233_v13 = vadd.f32 %v2231_v31, %v2227_v9  ;;  %v2409_v9 = vadd.f32 %v2407_v24, %v2403_v29  ;;  %v2444_v34 = vmul.f32 %v5345_v60, %v2442_v21  ;;  %v2443_v29 = vmul.f32 %v5510_v11, %v2442_v21 }
 0x1ec   : > { %v2416_v30 = vadd.f32 %v2414_v40, %v2410_v14  ;;  %v2600_v24 = vstv %s6048_s18  ;;  %s6203_s18 = sld [smem:[#allocation6 + $0xb5]] }
 0x1ed   : > { %v2239_v17 = vadd.f32 %v2237_v51, %v2233_v13  ;;  %v2415_v42 = vadd.f32 %v2413_v16, %v2409_v9  ;;  %v2419_v13 = vmul.f32 %v5362_v4, %v2418_v50 }
 0x1ee   : > { %4436 = vmatmul.msk.f32.gmra.mxu2 %vm925_vm14, %v5695_v28  ;;  %v2422_v31 = vadd.f32 %v2420_v7, %v2416_v30  ;;  %v2602_v30 = vmul.f32 %v5308_v53, %v2600_v24  ;;  %v6078_v7 = vmul.f32 %v4476_v2, %v5672_v25 }
 0x1ef   : > { %v2245_v19 = vadd.f32 %v2243_v27, %v2239_v17  ;;  %v2430_v27 = vstv %s6028_s7  ;;  %v2421_v22 = vadd.f32 %v2419_v13, %v2415_v42  ;;  %v2601_v13 = vmul.f32 %v5351_v62, %v2600_v24  ;;  %s6183_s7 = sld [smem:[#allocation6 + $0xa8]] }
 0x1f0   : > { %v2432_v12 = vmul.f32 %v5337_v58, %v2430_v27  ;;  %v2431_v38 = vmul.f32 %v5500_v49, %v2430_v27  ;;  %v2630_v24 = vstv %s6081_s10  ;;  %s6236_s10 = sld [smem:[#allocation6 + $0xba]] }
 0x1f6   : > { %4461 = vmatmul.msk.f32.vlgmr.msra.gmra.mxu2 %vm925_vm14, %v5678_v39  ;;  %v2424_v39 = vstv %s6023_s29  ;;  %s6178_s29 = sld [smem:[#allocation6 + $0xa7]] }
 0x1f7   : > { %2261 = vmatpush.msra.mxu2 %v2246_v44  ;;  %v2426_v51 = vmul.f32 %v5334_v57, %v2424_v39  ;;  %v2425_v33 = vmul.f32 %v5365_v5, %v2424_v39  ;;  %v2436_v44 = vstv %s6034_s12  ;;  %v2606_v39 = vstv %s6053_s19  ;;  %s6188_s12 = sld [smem:[#allocation6 + $0xa9]] }
 0x1f8   : > { %v2438_v35 = vmul.f32 %v5342_v59, %v2436_v44  ;;  %s6208_s19 = sld [smem:[#allocation6 + $0xb6]] }
 0x1f9   : > { %2262 = vmatpush.msra.mxu2 %v2245_v19  ;;  %v2428_v45 = vadd.f32 %v2426_v51, %v2422_v31  ;;  %v2427_v48 = vadd.f32 %v2425_v33, %v2421_v22  ;;  %v2437_v19 = vmul.f32 %v5505_v10, %v2436_v44  ;;  %v2608_v51 = vmul.f32 %v5311_v54, %v2606_v39 }
 0x1fa   : > { %v2607_v44 = vmul.f32 %v5356_v63, %v2606_v39  ;;  %v2636_v39 = vstv %s6087_s0  ;;  %s6240_s0 = sld [smem:[#allocation6 + $0xbb]] }
 0x1fb   : > { %v2434_v17 = vadd.f32 %v2432_v12, %v2428_v45  ;;  %v2433_v40 = vadd.f32 %v2431_v38, %v2427_v48  ;;  %v2612_v45 = vstv %s6058_s8  ;;  %s6217_s8 = sld [smem:[#allocation6 + $0xb7]] }
 0x1fc   : > { %v2614_v22 = vmul.f32 %v5328_v55, %v2612_v45  ;;  %v2613_v38 = vmul.f32 %v5359_v0, %v2612_v45 }
 0x1fd   : > { %v2440_v14 = vadd.f32 %v2438_v35, %v2434_v17  ;;  %v2439_v16 = vadd.f32 %v2437_v19, %v2433_v40  ;;  %v2618_v17 = vstv %s6067_s9  ;;  %v4477_v35 = vld [vmem:[%s5114_s2 + $0x18] sm:$0xff]  ;;  %v2624_v19 = vstv %s6073_s28  ;;  %s6220_s9 = sld [smem:[#allocation6 + $0xb8]] }
 0x1fe   : > { %4462 = vmatmul.msk.f32.gmra.mxu2 %vm925_vm14, %v5695_v28  ;;  %v2596_v28 = vstv %s6045_s15  ;;  %v2620_v48 = vmul.f32 %v5331_v56, %v2618_v17  ;;  %s6200_s15 = sld [smem:[#allocation6 + $0xb4]] }
 0x1ff   : > { %v2598_v50 = vmul.f32 %v5305_v52, %v2596_v28  ;;  %v2446_v9 = vadd.f32 %v2444_v34, %v2440_v14  ;;  %v2597_v42 = vmul.f32 %v5348_v61, %v2596_v28  ;;  %v2445_v27 = vadd.f32 %v2443_v29, %v2439_v16  ;;  %s6230_s28 = sld [smem:[#allocation6 + $0xb9]] }
 0x200   : > { %v2626_v14 = vmul.f32 %v5334_v57, %v2624_v19  ;;  %v2619_v29 = vmul.f32 %v5362_v4, %v2618_v17  ;;  %v6107_v28 = vmul.f32 %v4477_v35, %v5691_v15  ;;  %v2625_v16 = vmul.f32 %v5365_v5, %v2624_v19 }
 0x201   : > { %v2604_v31 = vadd.f32 %v2602_v30, %v2598_v50  ;;  %v2603_v33 = vadd.f32 %v2601_v13, %v2597_v42  ;;  %v2632_v30 = vmul.f32 %v5337_v58, %v2630_v24  ;;  %v2631_v13 = vmul.f32 %v5500_v49, %v2630_v24 }
 0x202   : > { %v2800_v17 = vstv %s6102_s20  ;;  %v2806_v19 = vstv %s6110_s21  ;;  %s6258_s20 = sld [smem:[#allocation6 + $0xc7]] }
 0x203   : > { %v2610_v12 = vadd.f32 %v2608_v51, %v2604_v31  ;;  %v2609_v34 = vadd.f32 %v2607_v44, %v2603_v33  ;;  %v2638_v51 = vmul.f32 %v5342_v59, %v2636_v39  ;;  %v2637_v33 = vmul.f32 %v5505_v10, %v2636_v39  ;;  %s6265_s21 = sld [smem:[#allocation6 + $0xc8]] }
 0x204   : > { %v2796_v44 = vstv %s6099_s1  ;;  %s6253_s1 = sld [smem:[#allocation6 + $0xc6]] }
 0x205   : > { %v2616_v21 = vadd.f32 %v2614_v22, %v2610_v12  ;;  %v2615_v40 = vadd.f32 %v2613_v38, %v2609_v34  ;;  %v2802_v38 = vmul.f32 %v5308_v53, %v2800_v17 }
 0x206   : > { %4487 = vmatmul.msk.f32.vlgmr.msrb.gmra.mxu2 %vm925_vm14, %v6078_v7 }
 0x207   : > { %2461 = vmatpush.msrb.mxu2 %v2446_v9  ;;  %v2622_v2 = vadd.f32 %v2620_v48, %v2616_v21  ;;  %v2621_v9 = vadd.f32 %v2619_v29, %v2615_v40  ;;  %v2798_v48 = vmul.f32 %v5305_v52, %v2796_v44  ;;  %v2801_v40 = vmul.f32 %v5351_v62, %v2800_v17 }
 0x208   : > { %v2830_v17 = vstv %s6134_s30  ;;  %s6289_s30 = sld [smem:[#allocation6 + $0xcc]] }
 0x209   : > { %2462 = vmatpush.msrb.mxu2 %v2445_v27  ;;  %v2628_v50 = vadd.f32 %v2626_v14, %v2622_v2  ;;  %v2627_v42 = vadd.f32 %v2625_v16, %v2621_v9  ;;  %v2642_v27 = vstv %s6094_s14  ;;  %v2808_v2 = vmul.f32 %v5311_v54, %v2806_v19  ;;  %s6249_s14 = sld [smem:[#allocation6 + $0xbc]] }
 0x20a   : > { %v2644_v12 = vmul.f32 %v5345_v60, %v2642_v27  ;;  %v2643_v21 = vmul.f32 %v5510_v11, %v2642_v27  ;;  %v2797_v14 = vmul.f32 %v5348_v61, %v2796_v44  ;;  %v2804_v24 = vadd.f32 %v2802_v38, %v2798_v48 }
 0x20b   : > { %v2634_v31 = vadd.f32 %v2632_v30, %v2628_v50  ;;  %v2633_v22 = vadd.f32 %v2631_v13, %v2627_v42  ;;  %v2812_v50 = vstv %s6115_s5  ;;  %v2807_v16 = vmul.f32 %v5356_v63, %v2806_v19  ;;  %s6270_s5 = sld [smem:[#allocation6 + $0xc9]] }
 0x20c   : > { %v2814_v30 = vmul.f32 %v5328_v55, %v2812_v50  ;;  %v2803_v9 = vadd.f32 %v2801_v40, %v2797_v14  ;;  %v2810_v39 = vadd.f32 %v2808_v2, %v2804_v24  ;;  %v2813_v13 = vmul.f32 %v5359_v0, %v2812_v50 }
 0x20d   : > { %v2640_v45 = vadd.f32 %v2638_v51, %v2634_v31  ;;  %v2639_v35 = vadd.f32 %v2637_v33, %v2633_v22  ;;  %v2818_v31 = vstv %s6122_s24  ;;  %v2836_v38 = vstv %s6140_s6  ;;  %s6277_s24 = sld [smem:[#allocation6 + $0xca]] }
 0x20e   : > { %4488 = vmatmul.msk.f32.gmra.mxu2 %vm925_vm14, %v6107_v28  ;;  %v2820_v51 = vmul.f32 %v5331_v56, %v2818_v31  ;;  %v2809_v42 = vadd.f32 %v2807_v16, %v2803_v9  ;;  %v2816_v27 = vadd.f32 %v2814_v30, %v2810_v39  ;;  %v2819_v33 = vmul.f32 %v5362_v4, %v2818_v31  ;;  %s6295_s6 = sld [smem:[#allocation6 + $0xcd]] }
 0x20f   : > { %v2646_v34 = vadd.f32 %v2644_v12, %v2640_v45  ;;  %v2645_v29 = vadd.f32 %v2643_v21, %v2639_v35  ;;  %v2824_v45 = vstv %s6128_s22  ;;  %v2832_v35 = vmul.f32 %v5337_v58, %v2830_v17  ;;  %s6283_s22 = sld [smem:[#allocation6 + $0xcb]] }
 0x210   : > { %v2826_v12 = vmul.f32 %v5334_v57, %v2824_v45  ;;  %v2815_v22 = vadd.f32 %v2813_v13, %v2809_v42  ;;  %v2822_v44 = vadd.f32 %v2820_v51, %v2816_v27  ;;  %v2825_v48 = vmul.f32 %v5365_v5, %v2824_v45 }
 0x211   : > { %v2838_v19 = vmul.f32 %v5342_v59, %v2836_v38  ;;  %v2831_v14 = vmul.f32 %v5500_v49, %v2830_v17  ;;  %v2837_v30 = vmul.f32 %v5505_v10, %v2836_v38  ;;  %v3060_v39 = vstv %s6151_s13  ;;  %s6309_s13 = sld [smem:[#allocation6 + $0xd8]] }
 0x212   : > { %v2821_v21 = vadd.f32 %v2819_v33, %v2815_v22  ;;  %v3064_v31 = vstv %s6154_s16  ;;  %v3062_v42 = vmul.f32 %v5305_v52, %v3060_v39  ;;  %v3070_v45 = vstv %s6159_s11  ;;  %s6312_s16 = sld [smem:[#allocation6 + $0xd9]] }
 0x213   : > { %v3066_v13 = vmul.f32 %v5308_v53, %v3064_v31  ;;  %v3072_v22 = vmul.f32 %v5311_v54, %v3070_v45  ;;  %v3061_v33 = vmul.f32 %v5348_v61, %v3060_v39  ;;  %v3076_v17 = vstv %s6164_s27  ;;  %s6320_s11 = sld [smem:[#allocation6 + $0xda]] }
 0x214   : > { %v2827_v2 = vadd.f32 %v2825_v48, %v2821_v21  ;;  %v3078_v48 = vmul.f32 %v5328_v55, %v3076_v17  ;;  %v3082_v38 = vstv %s6171_s25  ;;  %s6333_s27 = sld [smem:[#allocation6 + $0xdb]] }
 0x215   : > { %s6338_s25 = sld [smem:[#allocation6 + $0xdc]] }
 0x216   : > { %4513 = vmatmul.msk.f32.vlgmr.msra.gmra.mxu2 %vm925_vm14, %v6078_v7  ;;  %v2833_v50 = vadd.f32 %v2831_v14, %v2827_v2  ;;  %v3084_v14 = vmul.f32 %v5331_v56, %v3082_v38 }
 0x217   : > { %2661 = vmatpush.msra.mxu2 %v2646_v34  ;;  %v2828_v34 = vadd.f32 %v2826_v12, %v2822_v44  ;;  %v3068_v12 = vadd.f32 %v3066_v13, %v3062_v42  ;;  %v3100_v13 = vstv %s6188_s12  ;;  %s6374_s12 = sld [smem:[#allocation6 + $0xdf]] }
 0x218   : > { %v2839_v51 = vadd.f32 %v2837_v30, %v2833_v50 }
 0x219   : > { %2662 = vmatpush.msra.mxu2 %v2645_v29  ;;  %v2834_v40 = vadd.f32 %v2832_v35, %v2828_v34  ;;  %v2842_v29 = vstv %s6147_s23  ;;  %v3065_v35 = vmul.f32 %v5351_v62, %v3064_v31  ;;  %v3074_v21 = vadd.f32 %v3072_v22, %v3068_v12  ;;  %s6305_s23 = sld [smem:[#allocation6 + $0xce]] }
 0x21a   : > { %v2844_v24 = vmul.f32 %v5345_v60, %v2842_v29  ;;  %v2843_v16 = vmul.f32 %v5510_v11, %v2842_v29  ;;  %v3071_v34 = vmul.f32 %v5356_v63, %v3070_v45  ;;  %v3088_v29 = vstv %s6178_s29  ;;  %s6345_s29 = sld [smem:[#allocation6 + $0xdd]] }
 0x21b   : > { %v2840_v9 = vadd.f32 %v2838_v19, %v2834_v40  ;;  %v3067_v19 = vadd.f32 %v3065_v35, %v3061_v33  ;;  %v3080_v2 = vadd.f32 %v3078_v48, %v3074_v21  ;;  %v3077_v40 = vmul.f32 %v5359_v0, %v3076_v17  ;;  %v6222_v17 = vpop.f32.mrf.mxu0 }
 0x21c   : > { %v2845_v44 = vadd.f32 %v2843_v16, %v2839_v51  ;;  %v3090_v30 = vmul.f32 %v5334_v57, %v3088_v29  ;;  %v3094_v16 = vstv %s6183_s7  ;;  %v3089_v42 = vmul.f32 %v5365_v5, %v3088_v29  ;;  %s6361_s7 = sld [smem:[#allocation6 + $0xde]] }
 0x21d   : > { %v2846_v27 = vadd.f32 %v2844_v24, %v2840_v9  ;;  %v3073_v24 = vadd.f32 %v3071_v34, %v3067_v19  ;;  %v3086_v50 = vadd.f32 %v3084_v14, %v3080_v2  ;;  %v3083_v9 = vmul.f32 %v5362_v4, %v3082_v38 }
 0x21e   : > { %4514 = vmatmul.msk.f32.gmra.mxu2 %vm925_vm14, %v6107_v28  ;;  %v3096_v51 = vmul.f32 %v5337_v58, %v3094_v16  ;;  %v3102_v12 = vmul.f32 %v5342_v59, %v3100_v13  ;;  %v3095_v22 = vmul.f32 %v5500_v49, %v3094_v16  ;;  %v3106_v33 = vstv %s6196_s17  ;;  %s6386_s17 = sld [smem:[#allocation6 + $0xe0]] }
 0x21f   : > { %v3079_v39 = vadd.f32 %v3077_v40, %v3073_v24  ;;  %v3092_v31 = vadd.f32 %v3090_v30, %v3086_v50  ;;  %v3108_v21 = vmul.f32 %v5345_v60, %v3106_v33  ;;  %v3101_v48 = vmul.f32 %v5505_v10, %v3100_v13 }
 0x220   : > { %v3262_v19 = vstv %s6200_s15  ;;  %v3266_v2 = vstv %s6203_s18  ;;  %v3107_v14 = vmul.f32 %v5510_v11, %v3106_v33  ;;  %v3272_v30 = vstv %s6208_s19  ;;  %s6391_s15 = sld [smem:[#allocation6 + $0x5a]] }
 0x221   : > { %v3098_v45 = vadd.f32 %v3096_v51, %v3092_v31  ;;  %v3264_v40 = vmul.f32 %v5305_v52, %v3262_v19  ;;  %v3268_v50 = vmul.f32 %v5308_v53, %v3266_v2  ;;  %v3263_v16 = vmul.f32 %v5348_v61, %v3262_v19  ;;  %s6400_s18 = sld [smem:[#allocation6 + $0x5b]] }
 0x222   : > { %v3278_v51 = vstv %s6217_s8  ;;  %v3273_v13 = vmul.f32 %v5356_v63, %v3272_v30  ;;  %s6409_s19 = sld [smem:[#allocation6 + $0x5c]] }
 0x223   : > { %v3104_v35 = vadd.f32 %v3102_v12, %v3098_v45  ;;  %v3270_v31 = vadd.f32 %v3268_v50, %v3264_v40  ;;  %v3280_v45 = vmul.f32 %v5328_v55, %v3278_v51  ;;  %v3284_v12 = vstv %s6220_s9  ;;  %s6413_s8 = sld [smem:[#allocation6 + $0xea]] }
 0x224   : > { %s6426_s9 = sld [smem:[#allocation6 + $0x5d]] }
 0x225   : > { %v3110_v29 = vadd.f32 %v3108_v21, %v3104_v35 }
 0x226   : > { %4539 = vmatmul.msk.f32.vlgmr.msrb.gmra.mxu2 %vm925_vm14, %v6078_v7 }
 0x227   : > { %2861 = vmatpush.msrb.mxu2 %v2846_v27  ;;  %v3085_v27 = vadd.f32 %v3083_v9, %v3079_v39  ;;  %v3274_v9 = vmul.f32 %v5311_v54, %v3272_v30 }
 0x229   : > { %2862 = vmatpush.msrb.mxu2 %v2845_v44  ;;  %v3091_v44 = vadd.f32 %v3089_v42, %v3085_v27  ;;  %v3267_v42 = vmul.f32 %v5351_v62, %v3266_v2  ;;  %v3276_v27 = vadd.f32 %v3274_v9, %v3270_v31 }
 0x22b   : > { %v3097_v38 = vadd.f32 %v3095_v22, %v3091_v44  ;;  %v3286_v22 = vmul.f32 %v5331_v56, %v3284_v12  ;;  %v3269_v33 = vadd.f32 %v3267_v42, %v3263_v16  ;;  %v3279_v44 = vmul.f32 %v5359_v0, %v3278_v51 }
 0x22c   : > { %v3282_v21 = vadd.f32 %v3280_v45, %v3276_v27  ;;  %v3302_v16 = vstv %s6240_s0  ;;  %s6450_s0 = sld [smem:[#allocation6 + $0xed]] }
 0x22d   : > { %v3103_v24 = vadd.f32 %v3101_v48, %v3097_v38  ;;  %v3290_v48 = vstv %s6230_s28  ;;  %v6260_v38 = vpop.f32.mrf.mxu0  ;;  %v3275_v2 = vadd.f32 %v3273_v13, %v3269_v33  ;;  %v3308_v13 = vstv %s6249_s14  ;;  %s6433_s28 = sld [smem:[#allocation6 + $0xeb]] }
 0x22e   : > { %4540 = vmatmul.msk.f32.gmra.mxu2 %vm925_vm14, %v6107_v28  ;;  %v3292_v19 = vmul.f32 %v5334_v57, %v3290_v48  ;;  %v3288_v40 = vadd.f32 %v3286_v22, %v3282_v21  ;;  %v3291_v30 = vmul.f32 %v5365_v5, %v3290_v48  ;;  %v3310_v27 = vmul.f32 %v5345_v60, %v3308_v13  ;;  %s6459_s14 = sld [smem:[#allocation6 + $0x5e]] }
 0x22f   : > { %v3109_v39 = vadd.f32 %v3107_v14, %v3103_v24  ;;  %v3285_v14 = vmul.f32 %v5362_v4, %v3284_v12  ;;  %v3281_v50 = vadd.f32 %v3279_v44, %v3275_v2  ;;  %v3303_v12 = vmul.f32 %v5505_v10, %v3302_v16 }
 0x230   : > { %v3294_v9 = vadd.f32 %v3292_v19, %v3288_v40  ;;  %v3462_v44 = vstv %s6253_s1  ;;  %v3466_v21 = vstv %s6258_s20  ;;  %v3309_v19 = vmul.f32 %v5510_v11, %v3308_v13  ;;  %s6464_s1 = sld [smem:[#allocation6 + $0xee]] }
 0x231   : > { %v6226_v34 = vpop.f32.mrf.mxu2  ;;  %v3287_v31 = vadd.f32 %v3285_v14, %v3281_v50  ;;  %v3464_v2 = vmul.f32 %v5305_v52, %v3462_v44  ;;  %v3468_v14 = vmul.f32 %v5308_v53, %v3466_v21  ;;  %s6466_s20 = sld [smem:[#allocation6 + $0x5f]] }
 0x232   : > { %v7406_v20 = vstv %s6450_s0 }
 0x233   : > { %v3293_v45 = vadd.f32 %v3291_v30, %v3287_v31  ;;  %v3470_v30 = vadd.f32 %v3468_v14, %v3464_v2  ;;  %v3467_v31 = vmul.f32 %v5351_v62, %v3466_v21  ;;  %v6315_v14 = vsel %vm827_vm3, 1.0, %v7322_v36 }
 0x234   : > { %v3879_v1 = vmul.f32 %v5359_v0, %v7406_v20  ;;  %vm864_vm3 = vcmp.eq.f32.partialorder %v5782_v18, 4.0 }
 0x236   : > { %4565 = vmatmul.msk.f32.vlgmr.msra.gmra.mxu2 %vm925_vm14, %v6078_v7 }
 0x237   : > { %3131 = vmatpush.msra.mxu2 %v3110_v29  ;;  %v3296_v29 = vstv %s6236_s10  ;;  %s6436_s10 = sld [smem:[#allocation6 + $0xec]] }
 0x238   : > { %v3298_v24 = vmul.f32 %v5337_v58, %v3296_v29  ;;  %v3297_v51 = vmul.f32 %v5500_v49, %v3296_v29  ;;  %v3472_v29 = vstv %s6265_s21  ;;  %s6474_s21 = sld [smem:[#allocation6 + $0xef]] }
 0x239   : > { %v6255_v35 = vpop.f32.mrf.mxu2  ;;  %3132 = vmatpush.msra.mxu2 %v3109_v39  ;;  %v3304_v39 = vmul.f32 %v5342_v59, %v3302_v16  ;;  %v3478_v16 = vstv %s6270_s5  ;;  %s6481_s5 = sld [smem:[#allocation6 + $0x60]] }
 0x23a   : > { %v3300_v42 = vadd.f32 %v3298_v24, %v3294_v9  ;;  %v3299_v48 = vadd.f32 %v3297_v51, %v3293_v45  ;;  %v6291_v24 = vpop.f32.mrf.mxu0  ;;  %v3474_v9 = vmul.f32 %v5311_v54, %v3472_v29  ;;  %v3480_v13 = vmul.f32 %v5328_v55, %v3478_v16 }
 0x23b   : > { %v3484_v45 = vstv %s6277_s24  ;;  %v3479_v21 = vmul.f32 %v5359_v0, %v3478_v16  ;;  %s6489_s24 = sld [smem:[#allocation6 + $0xf0]] }
 0x23c   : > { %v3306_v33 = vadd.f32 %v3304_v39, %v3300_v42  ;;  %v3305_v50 = vadd.f32 %v3303_v12, %v3299_v48  ;;  %v3463_v39 = vmul.f32 %v5348_v61, %v3462_v44  ;;  %v3476_v42 = vadd.f32 %v3474_v9, %v3470_v30 }
 0x23d   : > { %v3486_v44 = vmul.f32 %v5331_v56, %v3484_v45  ;;  %v3496_v30 = vstv %s6289_s30  ;;  %s6507_s30 = sld [smem:[#allocation6 + $0xf2]]  ;;  %v7405_v32 = vstv %s6436_s10 }
 0x23e   : > { %4566 = vmatmul.msk.f32.gmra.mxu2 %vm925_vm14, %v6107_v28  ;;  %v3312_v40 = vadd.f32 %v3310_v27, %v3306_v33  ;;  %v3311_v51 = vadd.f32 %v3309_v19, %v3305_v50  ;;  %v3473_v27 = vmul.f32 %v5356_v63, %v3472_v29  ;;  %v3469_v12 = vadd.f32 %v3467_v31, %v3463_v39 }
 0x23f   : > { %v3482_v33 = vadd.f32 %v3480_v13, %v3476_v42  ;;  %v3490_v19 = vstv %s6283_s22  ;;  %v3485_v50 = vmul.f32 %v5362_v4, %v3484_v45  ;;  %v3498_v39 = vmul.f32 %v5337_v58, %v3496_v30  ;;  %s6497_s22 = sld [smem:[#allocation6 + $0xf1]] }
 0x240   : > { %v3475_v2 = vadd.f32 %v3473_v27, %v3469_v12  ;;  %v3492_v29 = vmul.f32 %v5334_v57, %v3490_v19  ;;  %v3491_v31 = vmul.f32 %v5365_v5, %v3490_v19  ;;  %v3497_v45 = vmul.f32 %v5500_v49, %v3496_v30  ;;  %v4608_v19 = vld [vmem:[%s5114_s2 + $0x20] sm:$0xff] }
 0x241   : > { %v1157_v22 = vpop.f32.mrf.mxu2  ;;  %v3508_v12 = vstv %s6305_s23  ;;  %v6350_v30 = vsel %vm828_vm4, 1.0, %v7322_v36  ;;  %s6572_s23 = sld [smem:[#allocation6 + $0x62]]  ;;  %v3873_v8 = vmul.f32 %v5356_v63, %v7405_v32 }
 0x242   : > { %v3481_v9 = vadd.f32 %v3479_v21, %v3475_v2  ;;  %v6327_v13 = vpop.f32.mrf.mxu0  ;;  %v3510_v21 = vmul.f32 %v5345_v60, %v3508_v12 }
 0x243   : > { %v7401_v37 = vstv %s6507_s30 }
 0x244   : > { %v3487_v42 = vadd.f32 %v3485_v50, %v3481_v9  ;;  %v3666_v50 = vstv %s6312_s16  ;;  %v6355_v9 = vsel %vm833_vm5, 1.0, %v7322_v36  ;;  %s4622_s16 = sld [smem:[#allocation6 + $0xac]] }
 0x245   : > { %7388 = vst [vmem:[#allocation29_spill] sm:$0xff] %v6355_v9 }
 0x246   : > { %4591 = vmatmul.msk.f32.vlgmr.msrb.gmra.mxu2 %vm925_vm14, %v6078_v7 }
 0x247   : > { %3327 = vmatpush.msrb.mxu2 %v3312_v40  ;;  %v3488_v40 = vadd.f32 %v3486_v44, %v3482_v33  ;;  %v3493_v33 = vadd.f32 %v3491_v31, %v3487_v42  ;;  %v3668_v42 = vmul.f32 %v5308_v53, %v3666_v50 }
 0x249   : > { %v1160_v48 = vpop.f32.mrf.mxu2  ;;  %3328 = vmatpush.msrb.mxu2 %v3311_v51  ;;  %v3494_v16 = vadd.f32 %v3492_v29, %v3488_v40  ;;  %v3502_v51 = vstv %s6295_s6  ;;  %v3499_v40 = vadd.f32 %v3497_v45, %v3493_v33  ;;  %v3662_v29 = vstv %s6309_s13  ;;  %s6548_s6 = sld [smem:[#allocation6 + $0x61]] }
 0x24a   : > { %1183 = vmatpush.msra.mxu3 %v1160_v48  ;;  %v3503_v48 = vmul.f32 %v5505_v10, %v3502_v51  ;;  %s4621_s13 = sld [smem:[#allocation6 + $0xab]] }
 0x24b   : > { %v3500_v27 = vadd.f32 %v3498_v39, %v3494_v16  ;;  %v3509_v16 = vmul.f32 %v5510_v11, %v3508_v12  ;;  %v3664_v39 = vmul.f32 %v5305_v52, %v3662_v29  ;;  %v3663_v12 = vmul.f32 %v5348_v61, %v3662_v29 }
 0x24c   : > { %1184 = vmatpush.msra.mxu3 %v1157_v22  ;;  %v3504_v22 = vmul.f32 %v5342_v59, %v3502_v51  ;;  %v3505_v51 = vadd.f32 %v3503_v48, %v3499_v40 }
 0x24d   : > { %4385 = vmatmul.msk.f32.vlgmr.msra.gmra.mxu3 %vm925_vm14, %v6315_v14 }
 0x24e   : > { %4592 = vmatmul.msk.f32.gmra.mxu2 %vm925_vm14, %v6107_v28  ;;  %v3506_v44 = vadd.f32 %v3504_v22, %v3500_v27  ;;  %v3672_v27 = vstv %s6320_s11  ;;  %v6364_v22 = vmul.f32 %v4608_v19, %v5672_v25  ;;  %v3511_v33 = vadd.f32 %v3509_v16, %v3505_v51  ;;  %v4609_v16 = vld [vmem:[%s5114_s2 + $0x28] sm:$0xff]  ;;  %s4623_s11 = sld [smem:[#allocation6 + $0xad]] }
 0x24f   : > { %v3674_v45 = vmul.f32 %v5311_v54, %v3672_v27  ;;  %v3678_v25 = vstv %s6333_s27  ;;  %s4624_s27 = sld [smem:[#allocation6 + $0xae]] }
 0x250   : > { %v3512_v31 = vadd.f32 %v3510_v21, %v3506_v44  ;;  %v3670_v44 = vadd.f32 %v3668_v42, %v3664_v39  ;;  %v3673_v21 = vmul.f32 %v5356_v63, %v3672_v27  ;;  %v3680_v19 = vmul.f32 %v5328_v55, %v3678_v25 }
 0x251   : > { %v1266_v2 = vpop.f32.mrf.mxu2  ;;  %v3690_v42 = vstv %s6345_s29  ;;  %s4626_s29 = sld [smem:[#allocation6 + $0xb0]] }
 0x252   : > { %1289 = vmatpush.msrb.mxu1 %v1266_v2  ;;  %4749 = vmatpush.msrb.mxu3 %v1266_v2  ;;  %v3676_v48 = vadd.f32 %v3674_v45, %v3670_v44  ;;  %v3684_v2 = vstv %s6338_s25  ;;  %v3692_v27 = vmul.f32 %v5334_v57, %v3690_v42  ;;  %v3696_v44 = vstv %s6361_s7  ;;  %s4625_s25 = sld [smem:[#allocation6 + $0xaf]] }
 0x253   : > { %v3686_v40 = vmul.f32 %v5331_v56, %v3684_v2  ;;  %s4627_s7 = sld [smem:[#allocation6 + $0xb1]] }
 0x254   : > { %1290 = vmatpush.msrb.mxu1 %v6222_v17  ;;  %4750 = vmatpush.msrb.mxu3 %v6222_v17  ;;  %v3667_v17 = vmul.f32 %v5351_v62, %v3666_v50  ;;  %v3679_v50 = vmul.f32 %v5359_v0, %v3678_v25  ;;  %v3682_v51 = vadd.f32 %v3680_v19, %v3676_v48 }
 0x255   : > { %4386 = vmatmul.msk.f32.gmra.mxu3 %vm925_vm14, %v6350_v30  ;;  %4398 = vmatmul.msk.f32.vlgmr.msrb.gmra.mxu1 %vm925_vm14, %v6355_v9  ;;  %v6416_v25 = vmul.f32 %v4609_v16, %v5691_v15  ;;  %v3691_v19 = vmul.f32 %v5365_v5, %v3690_v42  ;;  %v7313_v42 = vstv %s6391_s15 }
 0x256   : > { %1501 = vmatpush.msra.mxu1 %v6291_v24  ;;  %4619 = vmatmul.msk.f32.vlgmr.msra.gmra.mxu2 %vm925_vm14, %v6364_v22  ;;  %v1690_v24 = vpop.f32.mrf.mxu0  ;;  %v3669_v29 = vadd.f32 %v3667_v17, %v3663_v12  ;;  %v3685_v12 = vmul.f32 %v5362_v4, %v3684_v2  ;;  %v3698_v17 = vmul.f32 %v5337_v58, %v3696_v44 }
 0x257   : > { %3527 = vmatpush.msra.mxu2 %v3512_v31  ;;  %v6397_v31 = vsel %vm834_vm6, 1.0, %v7322_v36 }
 0x258   : > { %1502 = vmatpush.msra.mxu1 %v6260_v38  ;;  %7389 = vst [vmem:[#allocation30_spill] sm:$0xff] %v6397_v31  ;;  %v6405_v38 = vsel %vm845_vm7, 1.0, %v7322_v36  ;;  %v3675_v45 = vadd.f32 %v3673_v21, %v3669_v29  ;;  %v3702_v21 = vstv %s6374_s12  ;;  %v3708_v29 = vstv %s6386_s17  ;;  %s4628_s12 = sld [smem:[#allocation6 + $0xb2]] }
 0x259   : > { %v1369_v39 = vpop.f32.mrf.mxu2  ;;  %3528 = vmatpush.msra.mxu2 %v3511_v33  ;;  %7390 = vst [vmem:[#allocation31_spill] sm:$0xff] %v6405_v38  ;;  %v3688_v33 = vadd.f32 %v3686_v40, %v3682_v51  ;;  %v3704_v15 = vmul.f32 %v5342_v59, %v3702_v21  ;;  %v3703_v51 = vmul.f32 %v5505_v10, %v3702_v21  ;;  %s4629_s17 = sld [smem:[#allocation6 + $0xb3]] }
 0x25a   : > { %1713 = vmatpush.msrb.mxu1 %v1690_v24  ;;  %v3681_v48 = vadd.f32 %v3679_v50, %v3675_v45  ;;  %v3697_v24 = vmul.f32 %v5500_v49, %v3696_v44  ;;  %v3710_v50 = vmul.f32 %v5345_v60, %v3708_v29  ;;  %v6444_v45 = vsel %vm839_vm8, 1.0, %v7322_v36 }
 0x25b   : > { %v7312_v44 = vstv %s6400_s18 }
 0x25c   : > { %1714 = vmatpush.msrb.mxu1 %v6327_v13  ;;  %v3694_v13 = vadd.f32 %v3692_v27, %v3688_v33  ;;  %v3687_v2 = vadd.f32 %v3685_v12, %v3681_v48  ;;  %v6447_v12 = vsel %vm846_vm9, 1.0, %v7322_v36  ;;  %v3709_v48 = vmul.f32 %v5510_v11, %v3708_v29 }
 0x25d   : > { %4399 = vmatmul.msk.f32.vlgmr.msrb.gmra.mxu3 %vm925_vm14, %v6397_v31  ;;  %4424 = vmatmul.msk.f32.vlgmr.msra.gmra.mxu1 %vm925_vm14, %v6405_v38  ;;  %7391 = vst [vmem:[#allocation32_spill] sm:$0xff] %v6447_v12 }
 0x25e   : > { %4620 = vmatmul.msk.f32.gmra.mxu2 %vm925_vm14, %v6416_v25  ;;  %v3700_v40 = vadd.f32 %v3698_v17, %v3694_v13  ;;  %v3693_v16 = vadd.f32 %v3691_v19, %v3687_v2  ;;  %v2077_v19 = vmul.f32 %v5305_v52, %v7313_v42  ;;  %v2081_v13 = vmul.f32 %v5308_v53, %v7312_v44 }
 0x25f   : > { %v730_v2 = vmul.f32 0.0625, %v5253_v23  ;;  %v6524_v42 = vsel %vm851_vm12, 1.0, %v7322_v36 }
 0x260   : > { %v3706_v33 = vadd.f32 %v3704_v15, %v3700_v40  ;;  %v3699_v17 = vadd.f32 %v3697_v24, %v3693_v16  ;;  %v7311_v15 = vstv %s6409_s19  ;;  %v7310_v40 = vstv %s6413_s8 }
 0x261   : > { %v1372_v27 = vpop.f32.mrf.mxu2  ;;  %v732_v29 = vfloor.f32 %v730_v2  ;;  %v2087_v16 = vmul.f32 %v5311_v54, %v7311_v15  ;;  %v7308_v2 = vstv %s6436_s10  ;;  %s6743_s10 = sld [smem:[#allocation6 + $0x72]] }
 0x262   : > { %1395 = vmatpush.msra.mxu3 %v1372_v27  ;;  %v3712_v21 = vadd.f32 %v3710_v50, %v3706_v33  ;;  %v3705_v24 = vadd.f32 %v3703_v51, %v3699_v17  ;;  %v2083_v50 = vadd.f32 %v2081_v13, %v2077_v19  ;;  %v3864_v51 = vmul.f32 %v5305_v52, %v7310_v40 }
 0x263   : > { %v734_v27 = vmul.f32 16.0, %v732_v29  ;;  %v7320_v33 = vstv %s6426_s9  ;;  %v7309_v17 = vstv %s6433_s28  ;;  %v3874_v19 = vmul.f32 %v5311_v54, %v7308_v2 }
 0x264   : > { %1396 = vmatpush.msra.mxu3 %v1369_v39  ;;  %v3711_v39 = vadd.f32 %v3709_v48, %v3705_v24  ;;  %v3868_v48 = vmul.f32 %v5308_v53, %v7309_v17  ;;  %v7319_v29 = vstv %s6450_s0  ;;  %v6512_v2 = vsel %vm857_vm11, 1.0, %v7322_v36  ;;  %s6749_s0 = sld [smem:[#allocation6 + $0x73]] }
 0x265   : > { %4411 = vmatmul.msk.f32.vlgmr.msra.gmra.mxu3 %vm925_vm14, %v6444_v45  ;;  %4425 = vmatmul.msk.f32.gmra.mxu1 %vm925_vm14, %v6447_v12  ;;  %v736_v24 = vsub.f32 %v5253_v23, %v734_v27  ;;  %7392 = vst [vmem:[#allocation33_spill] sm:$0xff] %v6512_v2  ;;  %v2089_v17 = vadd.f32 %v2087_v16, %v2083_v50  ;;  %v7318_v27 = vstv %s6464_s1 }
 0x266   : > { %4645 = vmatmul.msk.f32.vlgmr.msrb.gmra.mxu2 %vm925_vm14, %v6364_v22  ;;  %v2093_v40 = vmul.f32 %v5328_v55, %v7320_v33  ;;  %v3870_v15 = vadd.f32 %v3868_v48, %v3864_v51  ;;  %v3880_v23 = vmul.f32 %v5328_v55, %v7319_v29  ;;  %v3886_v38 = vmul.f32 %v5331_v56, %v7318_v27 }
 0x267   : > { %3727 = vmatpush.msrb.mxu2 %v3712_v21  ;;  %v6502_v21 = vsel %vm840_vm10, 1.0, %v7322_v36  ;;  %v740_v44 = vsub.f32 %v736_v24, %v5216_v26  ;;  %v738_v16 = vsub.f32 %v736_v24, %v5223_v43  ;;  %v2103_v51 = vstv %s6466_s20  ;;  %s6765_s20 = sld [smem:[#allocation6 + $0x7f]] }
 0x268   : > { %v3876_v12 = vadd.f32 %v3874_v19, %v3870_v15  ;;  %v7321_v48 = vstv %s6474_s21  ;;  %v2095_v15 = vadd.f32 %v2093_v40, %v2089_v17  ;;  %v3896_v24 = vstv %s6489_s24  ;;  %s6790_s24 = sld [smem:[#allocation6 + $0x82]] }
 0x269   : > { %v1581_v13 = vpop.f32.mrf.mxu2  ;;  %3728 = vmatpush.msrb.mxu2 %v3711_v39  ;;  %v2097_v39 = vstv %s6459_s14  ;;  %v6533_v50 = vand.u32 2147483647, %v740_v44  ;;  %v3892_v29 = vmul.f32 %v5334_v57, %v7321_v48  ;;  %v6546_v44 = vand.u32 2147483647, %v738_v16  ;;  %s6752_s14 = sld [smem:[#allocation6 + $0x74]] }
 0x26a   : > { %v2099_v19 = vmul.f32 %v5331_v56, %v2097_v39  ;;  %v3882_v27 = vadd.f32 %v3880_v23, %v3876_v12  ;;  %v7395_v33 = vmov 1.0   ;;  %v2105_v40 = vmul.f32 %v5334_v57, %v2103_v51 }
 0x26b   : > { %7393 = vst [vmem:[#allocation34_spill] sm:$0xff] %v6533_v50  ;;  %vm748_vm15 = vcmp.lt.f32.partialorder %v6533_v50, 0.5  ;;  %v3898_v17 = vmul.f32 %v5337_v58, %v3896_v24  ;;  %v3902_v23 = vstv %s6497_s22  ;;  %vm746_vm0 = vcmp.lt.f32.partialorder %v6546_v44, 0.5  ;;  %s6801_s22 = sld [smem:[#allocation6 + $0x83]] }
 0x26c   : > { %7394 = vst [vmem:[#allocation35_spill] sm:$0xff] %v6546_v44  ;;  %4471 = vmatpush.msk.msra.mxu1 %vm748_vm15, %v7395_v33  ;;  %v3888_v12 = vadd.f32 %v3886_v38, %v3882_v27  ;;  %v2109_v16 = vstv %s6481_s5  ;;  %v7397_v50 = vmov 0.0   ;;  %v2101_v38 = vadd.f32 %v2099_v19, %v2095_v15  ;;  %s6783_s5 = sld [smem:[#allocation6 + $0x81]] }
 0x26d   : > { %4412 = vmatmul.msk.f32.gmra.mxu3 %vm925_vm14, %v6502_v21  ;;  %4450 = vmatmul.msk.f32.vlgmr.msrb.gmra.mxu1 %vm925_vm14, %v6512_v2  ;;  %v7396_v2 = vstv %s6391_s15  ;;  %v6566_v9 = vsel %vm858_vm13, 1.0, %v7397_v50  ;;  %v3904_v47 = vmul.f32 %v5342_v59, %v3902_v23  ;;  %v7399_v36 = vstv %s6400_s18  ;;  %s4517_s15 = sld [smem:[#allocation6 + $0x6c]] }
 0x26e   : > { %4646 = vmatmul.msk.f32.gmra.mxu2 %vm925_vm14, %v6416_v25  ;;  %v2076_v31 = vmul.f32 %v5348_v61, %v7396_v2  ;;  %7398 = vst [vmem:[#allocation36_spill] sm:$0xff] %v6566_v9  ;;  %4472 = vmatpush.msk.msra.mxu1 %vm746_vm0, %v7395_v33  ;;  %v3894_v27 = vadd.f32 %v3892_v29, %v3888_v12  ;;  %v7402_v15 = vstv %s6426_s9  ;;  %s4518_s18 = sld [smem:[#allocation6 + $0x6d]] }
 0x26f   : > { %v2080_v2 = vmul.f32 %v5351_v62, %v7399_v36  ;;  %v2111_v44 = vmul.f32 %v5337_v58, %v2109_v16  ;;  %v3910_v29 = vmul.f32 %v5345_v60, %v7401_v37  ;;  %v2092_v19 = vmul.f32 %v5359_v0, %v7402_v15  ;;  %s6731_s9 = sld [smem:[#allocation6 + $0x70]] }
 0x270   : > { %v3900_v41 = vadd.f32 %v3898_v17, %v3894_v27  ;;  %v2107_v37 = vadd.f32 %v2105_v40, %v2101_v38  ;;  %v7404_v27 = vstv %s6433_s28  ;;  %v2098_v15 = vmul.f32 %v5362_v4, %v2097_v39  ;;  %s6735_s28 = sld [smem:[#allocation6 + $0x71]] }
 0x271   : > { %v1584_v48 = vpop.f32.mrf.mxu2  ;;  %v2082_v36 = vadd.f32 %v2080_v2, %v2076_v31  ;;  %v2115_v31 = vstv %s6548_s6  ;;  %v2104_v32 = vmul.f32 %v5365_v5, %v2103_v51  ;;  %v2110_v20 = vmul.f32 %v5500_v49, %v2109_v16  ;;  %s6819_s6 = sld [smem:[#allocation6 + $0x85]] }
 0x272   : > { %1607 = vmatpush.msrb.mxu3 %v1584_v48  ;;  %v7400_v48 = vstv %s6409_s19  ;;  %v3906_v17 = vadd.f32 %v3904_v47, %v3900_v41  ;;  %v6611_v41 = vsel %vm852_vm1, 1.0, %v7397_v50  ;;  %v2113_v38 = vadd.f32 %v2111_v44, %v2107_v37  ;;  %s6727_s19 = sld [smem:[#allocation6 + $0x6e]] }
 0x273   : > { %v2086_v46 = vmul.f32 %v5356_v63, %v7400_v48  ;;  %v3867_v48 = vmul.f32 %v5351_v62, %v7404_v27  ;;  %v2116_v44 = vmul.f32 %v5505_v10, %v2115_v31  ;;  %v3897_v16 = vmul.f32 %v5500_v49, %v3896_v24 }
 0x274   : > { %1608 = vmatpush.msrb.mxu3 %v1581_v13  ;;  %v7403_v13 = vstv %s6413_s8  ;;  %s6729_s8 = sld [smem:[#allocation6 + $0x6f]] }
 0x275   : > { %4437 = vmatmul.msk.f32.vlgmr.msrb.gmra.mxu3 %vm925_vm14, %v6524_v42  ;;  %4451 = vmatmul.msk.f32.gmra.mxu1 %vm925_vm14, %v6566_v9  ;;  %v3863_v12 = vmul.f32 %v5348_v61, %v7403_v13  ;;  %v2088_v2 = vadd.f32 %v2086_v46, %v2082_v36  ;;  %v3912_v9 = vadd.f32 %v3910_v29, %v3906_v17  ;;  %v7407_v29 = vstv %s6464_s1  ;;  %s6759_s1 = sld [smem:[#allocation6 + $0x7e]] }
 0x276   : > { %4671 = vmatmul.msk.f32.vlgmr.msra.gmra.mxu2 %vm925_vm14, %v6364_v22  ;;  %v2117_v46 = vmul.f32 %v5342_v59, %v2115_v31  ;;  %v3885_v36 = vmul.f32 %v5362_v4, %v7407_v29  ;;  %v6645_v29 = vsel %vm864_vm3, 1.0, %v7397_v50 }
 0x277   : > { %v3869_v13 = vadd.f32 %v3867_v48, %v3863_v12  ;;  %v2094_v47 = vadd.f32 %v2092_v19, %v2088_v2  ;;  %3927 = vmatpush.msra.mxu2 %v3912_v9  ;;  %v2121_v12 = vstv %s6572_s23  ;;  %v7408_v48 = vstv %s6474_s21  ;;  %s6775_s21 = sld [smem:[#allocation6 + $0x80]] }
 0x278   : > { %v3891_v33 = vmul.f32 %v5365_v5, %v7408_v48  ;;  %v2123_v9 = vmul.f32 %v5345_v60, %v2121_v12  ;;  %v2122_v37 = vmul.f32 %v5510_v11, %v2121_v12  ;;  %v3141_v12 = vstv %s4621_s13  ;;  %s6824_s23 = sld [smem:[#allocation6 + $0x86]] }
 0x279   : > { %v1793_v40 = vpop.f32.mrf.mxu2  ;;  %v3875_v39 = vadd.f32 %v3873_v8, %v3869_v13  ;;  %v2100_v17 = vadd.f32 %v2098_v15, %v2094_v47  ;;  %v2119_v8 = vadd.f32 %v2117_v46, %v2113_v38  ;;  %v3903_v15 = vmul.f32 %v5505_v10, %v3902_v23  ;;  %s6831_s13 = sld [smem:[#allocation6 + $0x90]] }
 0x27a   : > { %v6634_v47 = vsel %vm863_vm2, 1.0, %v7397_v50  ;;  %v7409_v46 = vstv %s6507_s30  ;;  %s6811_s30 = sld [smem:[#allocation6 + $0x84]] }
 0x27b   : > { %v3881_v27 = vadd.f32 %v3879_v1, %v3875_v39  ;;  %v2106_v51 = vadd.f32 %v2104_v32, %v2100_v17  ;;  %v2125_v32 = vadd.f32 %v2123_v9, %v2119_v8  ;;  %v3909_v39 = vmul.f32 %v5510_v11, %v7409_v46  ;;  %v1082_v46 = vpop.f32.mrf.mxu3 }
 0x27c   : > { %v3145_v17 = vstv %s4622_s16  ;;  %s6837_s16 = sld [smem:[#allocation6 + $0x91]] }
 0x27d   : > { %4438 = vmatmul.msk.f32.gmra.mxu3 %vm925_vm14, %v6611_v41  ;;  %v3887_v19 = vadd.f32 %v3885_v36, %v3881_v27  ;;  %v2112_v1 = vadd.f32 %v2110_v20, %v2106_v51  ;;  %v3143_v27 = vmul.f32 %v5305_v52, %v3141_v12  ;;  %v3147_v48 = vmul.f32 %v5308_v53, %v3145_v17 }
 0x27e   : > { %4672 = vmatmul.msk.f32.gmra.mxu2 %vm925_vm14, %v6416_v25  ;;  %v3151_v51 = vstv %s4623_s11  ;;  %v3146_v8 = vmul.f32 %v5351_v62, %v3145_v17  ;;  %s6846_s11 = sld [smem:[#allocation6 + $0x92]] }
 0x27f   : > { %v3893_v2 = vadd.f32 %v3891_v33, %v3887_v19  ;;  %v2118_v31 = vadd.f32 %v2116_v44, %v2112_v1  ;;  %v3142_v44 = vmul.f32 %v5348_v61, %v3141_v12  ;;  %v3149_v9 = vadd.f32 %v3147_v48, %v3143_v27 }
 0x280   : > { %v3153_v19 = vmul.f32 %v5311_v54, %v3151_v51  ;;  %v3181_v48 = vstv %s4628_s12  ;;  %s6881_s12 = sld [smem:[#allocation6 + $0x97]] }
 0x281   : > { %v1796_v13 = vpop.f32.mrf.mxu2  ;;  %v3899_v38 = vadd.f32 %v3897_v16, %v3893_v2  ;;  %v2124_v24 = vadd.f32 %v2122_v37, %v2118_v31  ;;  %v3157_v16 = vstv %s4624_s27  ;;  %v3148_v1 = vadd.f32 %v3146_v8, %v3142_v44  ;;  %s6854_s27 = sld [smem:[#allocation6 + $0x93]] }
 0x282   : > { %1819 = vmatpush.msra.mxu3 %v1796_v13  ;;  %v3152_v37 = vmul.f32 %v5356_v63, %v3151_v51  ;;  %v3159_v13 = vmul.f32 %v5328_v55, %v3157_v16  ;;  %v3163_v31 = vstv %s4625_s25  ;;  %s6862_s25 = sld [smem:[#allocation6 + $0x94]] }
 0x283   : > { %v3905_v6 = vadd.f32 %v3903_v15, %v3899_v38  ;;  %v3155_v15 = vadd.f32 %v3153_v19, %v3149_v9  ;;  %v3158_v38 = vmul.f32 %v5359_v0, %v3157_v16  ;;  %v1085_v51 = vpop.f32.mrf.mxu3  ;;  %v3183_v16 = vmul.f32 %v5342_v59, %v3181_v48 }
 0x284   : > { %1820 = vmatpush.msra.mxu3 %v1793_v40 }
 0x285   : > { %4463 = vmatmul.msk.f32.vlgmr.msra.gmra.mxu3 %vm925_vm14, %v6634_v47  ;;  %v3911_v33 = vadd.f32 %v3909_v39, %v3905_v6  ;;  %v3161_v39 = vadd.f32 %v3159_v13, %v3155_v15  ;;  %v3169_v6 = vstv %s4626_s29  ;;  %s6867_s29 = sld [smem:[#allocation6 + $0x95]] }
 0x286   : > { %4697 = vmatmul.msk.f32.vlgmr.msrb.gmra.mxu2 %vm925_vm14, %v6364_v22  ;;  %2140 = vmatpush.msrb.mxu3 %v2125_v32  ;;  %v3154_v32 = vadd.f32 %v3152_v37, %v3148_v1  ;;  %v3170_v17 = vmul.f32 %v5365_v5, %v3169_v6  ;;  %v3187_v1 = vstv %s4629_s17  ;;  %s6888_s17 = sld [smem:[#allocation6 + $0x98]] }
 0x287   : > { %3928 = vmatpush.msra.mxu2 %v3911_v33  ;;  %v3189_v13 = vmul.f32 %v5345_v60, %v3187_v1 }
 0x288   : > { %2141 = vmatpush.msrb.mxu3 %v2124_v24  ;;  %v3165_v24 = vmul.f32 %v5331_v56, %v3163_v31  ;;  %v3160_v33 = vadd.f32 %v3158_v38, %v3154_v32  ;;  %v3188_v38 = vmul.f32 %v5510_v11, %v3187_v1 }
 0x289   : > { %v2068_v23 = vpop.f32.mrf.mxu2 }
 0x28d   : > { %4464 = vmatmul.msk.f32.gmra.mxu3 %vm925_vm14, %v6645_v29 }
 0x28e   : > { %4698 = vmatmul.msk.f32.gmra.mxu2 %vm925_vm14, %v6416_v25 }
 0x291   : > { %v2071_v40 = vpop.f32.mrf.mxu2 }
 0x292   : > { %2186 = vmatpush.msrb.mxu1 %v2071_v40 }
 0x294   : > { %2187 = vmatpush.msrb.mxu1 %v2068_v23  ;;  %v3164_v23 = vmul.f32 %v5362_v4, %v3163_v31 }
 0x295   : > { %4498 = vmatmul.msk.f32.vlgmr.msrb.gmra.mxu3 %vm925_vm14, %v6078_v7 }
 0x296   : > { %4723 = vmatmul.msk.f32.vlgmr.msra.gmra.mxu2 %vm925_vm14, %v6364_v22  ;;  %v3166_v12 = vadd.f32 %v3164_v23, %v3160_v33 }
 0x298   : > { %v3172_v44 = vadd.f32 %v3170_v17, %v3166_v12 }
 0x299   : > { %v2264_v18 = vpop.f32.mrf.mxu2 }
 0x29d   : > { %4499 = vmatmul.msk.f32.gmra.mxu3 %vm925_vm14, %v6107_v28 }
 0x29e   : > { %4724 = vmatmul.msk.f32.gmra.mxu2 %vm925_vm14, %v6416_v25 }
 0x2a1   : > { %v2267_v50 = vpop.f32.mrf.mxu2 }
 0x2a2   : > { %2284 = vmatpush.msra.mxu3 %v2267_v50  ;;  %v3171_v50 = vmul.f32 %v5334_v57, %v3169_v6 }
 0x2a4   : > { %2285 = vmatpush.msra.mxu3 %v2264_v18  ;;  %v3167_v18 = vadd.f32 %v3165_v24, %v3161_v39 }
 0x2a5   : > { %4515 = vmatmul.msk.f32.vlgmr.msra.gmra.mxu3 %vm925_vm14, %v6315_v14 }
 0x2a9   : > { %v2464_v36 = vpop.f32.mrf.mxu2 }
 0x2ad   : > { %4516 = vmatmul.msk.f32.gmra.mxu3 %vm925_vm14, %v6350_v30 }
 0x2b1   : > { %v2467_v20 = vpop.f32.mrf.mxu2 }
 0x2b2   : > { %2484 = vmatpush.msrb.mxu3 %v2467_v20  ;;  %v3173_v20 = vadd.f32 %v3171_v50, %v3167_v18 }
 0x2b4   : > { %2485 = vmatpush.msrb.mxu3 %v2464_v36  ;;  %v3175_v36 = vstv %s4627_s7  ;;  %s6873_s7 = sld [smem:[#allocation6 + $0x96]] }
 0x2b5   : > { %4541 = vmatmul.msk.f32.vlgmr.msrb.gmra.mxu3 %vm925_vm14, %v6444_v45  ;;  %v3177_v27 = vmul.f32 %v5337_v58, %v3175_v36  ;;  %v3176_v8 = vmul.f32 %v5500_v49, %v3175_v36 }
 0x2b7   : > { %v3179_v19 = vadd.f32 %v3177_v27, %v3173_v20  ;;  %v3178_v37 = vadd.f32 %v3176_v8, %v3172_v44  ;;  %v1083_v8 = vadd.f32 %v1082_v46, %v6226_v34  ;;  %v7410_v46 = vmov 1.0  }
 0x2b9   : > { %v2664_v2 = vpop.f32.mrf.mxu2  ;;  %v3185_v15 = vadd.f32 %v3183_v16, %v3179_v19 }
 0x2bb   : > { %v3191_v24 = vadd.f32 %v3189_v13, %v3185_v15 }
 0x2bd   : > { %4542 = vmatmul.msk.f32.gmra.mxu3 %vm925_vm14, %v6502_v21 }
 0x2c1   : > { %v2667_v40 = vpop.f32.mrf.mxu2 }
 0x2c2   : > { %2684 = vmatpush.msra.mxu3 %v2667_v40 }
 0x2c4   : > { %2685 = vmatpush.msra.mxu3 %v2664_v2  ;;  %v3182_v2 = vmul.f32 %v5505_v10, %v3181_v48  ;;  %v729_v48 = vmul.f32 0.0625, %v5129_v3 }
 0x2c5   : > { %4567 = vmatmul.msk.f32.vlgmr.msra.gmra.mxu3 %vm925_vm14, %v6524_v42 }
 0x2c6   : > { %v3184_v32 = vadd.f32 %v3182_v2, %v3178_v37  ;;  %v731_v44 = vfloor.f32 %v729_v48 }
 0x2c8   : > { %v3190_v6 = vadd.f32 %v3188_v38, %v3184_v32 }
 0x2c9   : > { %v2864_v9 = vpop.f32.mrf.mxu2 }
 0x2cd   : > { %4568 = vmatmul.msk.f32.gmra.mxu3 %vm925_vm14, %v6611_v41 }
 0x2d0   : > { %v1186_v31 = vpop.f32.mrf.mxu3 }
 0x2d1   : > { %v2867_v39 = vpop.f32.mrf.mxu2  ;;  %v1192_v19 = vadd.f32 %v1186_v31, %v1083_v8 }
 0x2d2   : > { %2884 = vmatpush.msrb.mxu3 %v2867_v39  ;;  %v1292_v50 = vpop.f32.mrf.mxu1 }
 0x2d3   : > { %v1298_v13 = vadd.f32 %v1292_v50, %v1192_v19 }
 0x2d4   : > { %2885 = vmatpush.msrb.mxu3 %v2864_v9  ;;  %v733_v9 = vmul.f32 16.0, %v731_v44 }
 0x2d5   : > { %4593 = vmatmul.msk.f32.vlgmr.msrb.gmra.mxu3 %vm925_vm14, %v6634_v47 }
 0x2d6   : > { %3206 = vmatpush.msra.mxu3 %v3191_v24  ;;  %v735_v37 = vsub.f32 %v5129_v3, %v733_v9 }
 0x2d8   : > { %v1189_v33 = vpop.f32.mrf.mxu3  ;;  %3207 = vmatpush.msra.mxu3 %v3190_v6  ;;  %v739_v15 = vsub.f32 %v735_v37, %v5216_v26  ;;  %v737_v38 = vsub.f32 %v735_v37, %v5223_v43 }
 0x2d9   : > { %v6691_v23 = vpop.f32.mrf.mxu2 }
 0x2da   : > { %v1504_v17 = vpop.f32.mrf.mxu1  ;;  %v6707_v32 = vand.u32 2147483647, %v739_v15  ;;  %v6713_v34 = vand.u32 2147483647, %v737_v38  ;;  %v2306_v15 = vstv %s6727_s19  ;;  %s4651_s19 = sld [smem:[#allocation6 + $0xbf]] }
 0x2dc   : > { %vm747_vm4 = vcmp.lt.f32.partialorder %v6707_v32, 0.5  ;;  %vm745_vm5 = vcmp.lt.f32.partialorder %v6713_v34, 0.5 }
 0x2dd   : > { %4594 = vmatmul.msk.f32.gmra.mxu3 %vm925_vm14, %v6645_v29  ;;  %4467 = vmatpush.msk.msra.mxu0 %vm747_vm4, %v7410_v46 }
 0x2df   : > { %4468 = vmatpush.msk.msra.mxu0 %vm745_vm5, %v7410_v46 }
 0x2e0   : > { %v1295_v40 = vpop.f32.mrf.mxu3 }
 0x2e1   : > { %v6695_v18 = vpop.f32.mrf.mxu2 }
 0x2e2   : > { %v1507_v16 = vpop.f32.mrf.mxu1 }
 0x2e5   : > { %4630 = vmatmul.msk.f32.vlgmr.msra.gmra.mxu3 %vm925_vm14, %v6364_v22 }
 0x2e8   : > { %v1398_v36 = vpop.f32.mrf.mxu3 }
 0x2e9   : > { %v3330_v12 = vpop.f32.mrf.mxu2  ;;  %v1404_v39 = vadd.f32 %v1398_v36, %v1298_v13 }
 0x2eb   : > { %v1510_v31 = vadd.f32 %v1504_v17, %v1404_v39 }
 0x2ed   : > { %4631 = vmatmul.msk.f32.gmra.mxu3 %vm925_vm14, %v6416_v25 }
 0x2f0   : > { %v1401_v20 = vpop.f32.mrf.mxu3 }
 0x2f1   : > { %v3333_v27 = vpop.f32.mrf.mxu2 }
 0x2f2   : > { %3350 = vmatpush.msrb.mxu3 %v3333_v27 }
 0x2f4   : > { %3351 = vmatpush.msrb.mxu3 %v3330_v12 }
 0x2f5   : > { %4647 = vmatmul.msk.f32.vlgmr.msrb.gmra.mxu3 %vm925_vm14, %v6315_v14  ;;  %v1086_v14 = vadd.f32 %v1085_v51, %v6255_v35 }
 0x2f7   : > { %v1193_v26 = vadd.f32 %v1189_v33, %v1086_v14  ;;  %v2308_v14 = vmul.f32 %v5311_v54, %v2306_v15 }
 0x2f8   : > { %v1610_v1 = vpop.f32.mrf.mxu3 }
 0x2f9   : > { %v3530_v2 = vpop.f32.mrf.mxu2  ;;  %v1299_v24 = vadd.f32 %v1295_v40, %v1193_v26  ;;  %v1616_v6 = vadd.f32 %v1610_v1, %v1510_v31 }
 0x2fb   : > { %v1405_v35 = vadd.f32 %v1401_v20, %v1299_v24 }
 0x2fd   : > { %4648 = vmatmul.msk.f32.gmra.mxu3 %vm925_vm14, %v6350_v30  ;;  %v1716_v30 = vpop.f32.mrf.mxu1  ;;  %v1511_v36 = vadd.f32 %v1507_v16, %v1405_v35  ;;  %v2296_v16 = vstv %s4517_s15  ;;  %s4649_s15 = sld [smem:[#allocation6 + $0xbd]] }
 0x2fe   : > { %v1722_v51 = vadd.f32 %v1716_v30, %v1616_v6  ;;  %v2298_v1 = vmul.f32 %v5305_v52, %v2296_v16  ;;  %v2297_v13 = vmul.f32 %v5348_v61, %v2296_v16  ;;  %v2318_v6 = vstv %s6731_s9  ;;  %s6987_s9 = sld [smem:[#allocation6 + $0xc1]] }
 0x2ff   : > { %v2330_v16 = vstv %s6743_s10  ;;  %s6996_s10 = sld [smem:[#allocation6 + $0xc3]] }
 0x300   : > { %v1613_v3 = vpop.f32.mrf.mxu3 }
 0x301   : > { %v3533_v43 = vpop.f32.mrf.mxu2  ;;  %v1617_v17 = vadd.f32 %v1613_v3, %v1511_v36  ;;  %v2312_v3 = vstv %s6729_s8  ;;  %s6984_s8 = sld [smem:[#allocation6 + $0xc0]] }
 0x302   : > { %3550 = vmatpush.msra.mxu3 %v3533_v43  ;;  %v2307_v43 = vmul.f32 %v5356_v63, %v2306_v15  ;;  %v2313_v36 = vmul.f32 %v5359_v0, %v2312_v3 }
 0x304   : > { %3551 = vmatpush.msra.mxu3 %v3530_v2 }
 0x305   : > { %4673 = vmatmul.msk.f32.vlgmr.msra.gmra.mxu3 %vm925_vm14, %v6444_v45  ;;  %v1719_v48 = vpop.f32.mrf.mxu1 }
 0x306   : > { %v1723_v40 = vadd.f32 %v1719_v48, %v1617_v17  ;;  %v2324_v48 = vstv %s6735_s28  ;;  %s6991_s28 = sld [smem:[#allocation6 + $0xc2]] }
 0x308   : > { %v1822_v50 = vpop.f32.mrf.mxu3 }
 0x309   : > { %v1828_v12 = vadd.f32 %v1822_v50, %v1722_v51  ;;  %v3730_v33 = vpop.f32.mrf.mxu2  ;;  %v2320_v51 = vmul.f32 %v5331_v56, %v2318_v6 }
 0x30b   : > { %v4465_v27 = vmul.f32 -1.442695, %v1828_v12 }
 0x30d   : > { %4815 = vpow2.f32 %v4465_v27  ;;  %4674 = vmatmul.msk.f32.gmra.mxu3 %vm925_vm14, %v6502_v21  ;;  %v2300_v21 = vstv %s4518_s18  ;;  %s4650_s18 = sld [smem:[#allocation6 + $0xbe]] }
 0x30e   : > { %v2302_v37 = vmul.f32 %v5308_v53, %v2300_v21  ;;  %v2301_v38 = vmul.f32 %v5351_v62, %v2300_v21  ;;  %v2319_v21 = vmul.f32 %v5362_v4, %v2318_v6 }
 0x310   : > { %v1825_v20 = vpop.f32.mrf.mxu3  ;;  %v2304_v2 = vadd.f32 %v2302_v37, %v2298_v1  ;;  %v2303_v31 = vadd.f32 %v2301_v38, %v2297_v13 }
 0x311   : > { %v1829_v45 = vadd.f32 %v1825_v20, %v1723_v40  ;;  %v3733_v44 = vpop.f32.mrf.mxu2  ;;  %v2326_v20 = vmul.f32 %v5334_v57, %v2324_v48 }
 0x312   : > { %3750 = vmatpush.msrb.mxu3 %v3733_v44  ;;  %v2310_v24 = vadd.f32 %v2308_v14, %v2304_v2  ;;  %v2309_v50 = vadd.f32 %v2307_v43, %v2303_v31  ;;  %v2336_v2 = vstv %s6749_s0  ;;  %v2325_v43 = vmul.f32 %v5365_v5, %v2324_v48  ;;  %s7002_s0 = sld [smem:[#allocation6 + $0xc4]] }
 0x313   : > { %v4816_v8 = vpop.eup %4815  ;;  %v4466_v9 = vmul.f32 -1.442695, %v1829_v45  ;;  %v2338_v14 = vmul.f32 %v5342_v59, %v2336_v2 }
 0x314   : > { %v6733_v19 = vadd.f32 1.0, %v4816_v8  ;;  %3751 = vmatpush.msrb.mxu3 %v3730_v33  ;;  %v2315_v44 = vadd.f32 %v2313_v36, %v2309_v50 }
 0x315   : > { %4817 = vpow2.f32 %v4466_v9  ;;  %4699 = vmatmul.msk.f32.vlgmr.msrb.gmra.mxu3 %vm925_vm14, %v6524_v42  ;;  %v2314_v42 = vmul.f32 %v5328_v55, %v2312_v3  ;;  %v2342_v3 = vstv %s6752_s14  ;;  %s7005_s14 = sld [smem:[#allocation6 + $0xc5]] }
 0x316   : > { %4819 = vrcp.f32 %v6733_v19  ;;  %v1849_v30 = vand.u32 2147483648, %v6733_v19  ;;  %v1847_v17 = vand.u32 2147483647, %v6733_v19  ;;  %vm1843_vm6 = vweird.f32 %v6733_v19 }
 0x317   : > { %v2316_v27 = vadd.f32 %v2314_v42, %v2310_v24  ;;  %v2321_v31 = vadd.f32 %v2319_v21, %v2315_v44  ;;  %v2343_v44 = vmul.f32 %v5510_v11, %v2342_v3 }
 0x318   : > { %v2143_v39 = vpop.f32.mrf.mxu3  ;;  %v1850_v45 = vor.u32 1.1754944e-38, %v1849_v30  ;;  %vm6777_vm8 = vcmp.eq.f32.partialorder %v1847_v17, 8.507059e+37  ;;  %v2331_v30 = vmul.f32 %v5500_v49, %v2330_v16  ;;  %v2337_v17 = vmul.f32 %v5505_v10, %v2336_v2 }
 0x319   : > { %v3930_v26 = vpop.f32.mrf.mxu2  ;;  %v2322_v9 = vadd.f32 %v2320_v51, %v2316_v27  ;;  %v2344_v51 = vmul.f32 %v5345_v60, %v2342_v3  ;;  %v2327_v36 = vadd.f32 %v2325_v43, %v2321_v31  ;;  %v2496_v27 = vstv %s6759_s1  ;;  %s7012_s1 = sld [smem:[#allocation6 + $0xcf]] }
 0x31a   : > { %v2518_v43 = vstv %s6790_s24  ;;  %s7041_s24 = sld [smem:[#allocation6 + $0xd3]] }
 0x31b   : > { %v4818_v35 = vpop.eup %4817  ;;  %v2328_v38 = vadd.f32 %v2326_v20, %v2322_v9 }
 0x31c   : > { %v4820_v12 = vpop.eup %4819  ;;  %v6761_v33 = vadd.f32 1.0, %v4818_v35 }
 0x31d   : > { %v1839_v40 = vmul.f32 %v4820_v12, %v6733_v19  ;;  %4700 = vmatmul.msk.f32.gmra.mxu3 %vm925_vm14, %v6611_v41  ;;  %vm1844_vm7 = vweird.f32 %v4820_v12  ;;  %v2332_v41 = vmul.f32 %v5337_v58, %v2330_v16  ;;  %v4851_v16 = vld [vmem:[%s5114_s2] sm:$0xff] }
 0x31e   : > { %4821 = vrcp.f32 %v6761_v33  ;;  %v1862_v42 = vand.u32 2147483647, %v6761_v33  ;;  %vm1858_vm9 = vweird.f32 %v6761_v33  ;;  %v1864_v6 = vand.u32 2147483648, %v6761_v33  ;;  %vm1845_vm10 = vmor %vm1843_vm6, %vm1844_vm7 }
 0x31f   : > { %v1840_v8 = vsub.f32 1.0, %v1839_v40  ;;  %v2334_v35 = vadd.f32 %v2332_v41, %v2328_v38  ;;  %v2506_v41 = vstv %s6775_s21  ;;  %s7030_s21 = sld [smem:[#allocation6 + $0xd1]] }
 0x320   : > { %v2146_v1 = vpop.f32.mrf.mxu3  ;;  %v2508_v37 = vmul.f32 %v5311_v54, %v2506_v41  ;;  %vm1863_vm13 = vcmp.eq.f32.partialorder %v1862_v42, 8.507059e+37 }
 0x321   : > { %v1841_v15 = vmul.f32 %v4820_v12, %v1840_v8  ;;  %2163 = vmatpush.msrb.mxu0 %v2146_v1  ;;  %v3933_v13 = vpop.f32.mrf.mxu2  ;;  %v2340_v20 = vadd.f32 %v2338_v14, %v2334_v35  ;;  %v2498_v8 = vmul.f32 %v5305_v52, %v2496_v27  ;;  %v2497_v14 = vmul.f32 %v5348_v61, %v2496_v27 }
 0x322   : > { %3950 = vmatpush.msra.mxu3 %v3933_v13  ;;  %v1865_v35 = vor.u32 1.1754944e-38, %v1864_v6  ;;  %v2524_v27 = vstv %s6801_s22  ;;  %s7052_s22 = sld [smem:[#allocation6 + $0xd4]] }
 0x323   : > { %2164 = vmatpush.msrb.mxu0 %v2143_v39  ;;  %v1842_v24 = vadd.f32 %v4820_v12, %v1841_v15  ;;  %v2500_v39 = vstv %s6765_s20  ;;  %v2346_v1 = vadd.f32 %v2344_v51, %v2340_v20  ;;  %v2520_v51 = vmul.f32 %v5331_v56, %v2518_v43  ;;  %s7018_s20 = sld [smem:[#allocation6 + $0xd0]] }
 0x324   : > { %v4822_v50 = vpop.eup %4821  ;;  %3951 = vmatpush.msra.mxu3 %v3930_v26  ;;  %v2333_v26 = vadd.f32 %v2331_v30, %v2327_v36  ;;  %v2502_v9 = vmul.f32 %v5308_v53, %v2500_v39  ;;  %v2501_v30 = vmul.f32 %v5351_v62, %v2500_v39  ;;  %v2507_v36 = vmul.f32 %v5356_v63, %v2506_v41 }
 0x325   : > { %v1854_v48 = vmul.f32 %v4822_v50, %v6761_v33  ;;  %v1846_v40 = vsel %vm1845_vm10, %v4820_v12, %v1842_v24  ;;  %4725 = vmatmul.msk.f32.vlgmr.msra.gmra.mxu3 %vm925_vm14, %v6634_v47  ;;  %vm1859_vm11 = vweird.f32 %v4822_v50  ;;  %v2526_v39 = vmul.f32 %v5334_v57, %v2524_v27 }
 0x326   : > { %v1851_v19 = vsel %vm6777_vm8, %v1850_v45, %v1846_v40  ;;  %v2339_v15 = vadd.f32 %v2337_v17, %v2333_v26  ;;  %v2504_v47 = vadd.f32 %v2502_v9, %v2498_v8  ;;  %v2512_v45 = vstv %s6783_s5  ;;  %vm1860_vm12 = vmor %vm1858_vm9, %vm1859_vm11  ;;  %v4852_v9 = vld [vmem:[%s5114_s2 + $0x8] sm:$0xff]  ;;  %s7034_s5 = sld [smem:[#allocation6 + $0xd2]] }
 0x327   : > { %v1868_v21 = vmul.f32 %v4851_v16, %v1851_v19  ;;  %v1855_v12 = vsub.f32 1.0, %v1854_v48  ;;  %v2514_v38 = vmul.f32 %v5328_v55, %v2512_v45  ;;  %v2503_v48 = vadd.f32 %v2501_v30, %v2497_v14 }
 0x328   : > { %v6815_v2 = vpop.f32.mrf.mxu3  ;;  %v2345_v3 = vadd.f32 %v2343_v44, %v2339_v15  ;;  %v2510_v31 = vadd.f32 %v2508_v37, %v2504_v47  ;;  %v2513_v40 = vmul.f32 %v5359_v0, %v2512_v45  ;;  %v2519_v20 = vmul.f32 %v5362_v4, %v2518_v43 }
 0x329   : > { %4469 = vmatmul.msk.f32.vlgmr.msra.gmra.mxu0 %vm925_vm14, %v1868_v21  ;;  %4473 = vmatmul.msk.f32.vlgmr.msra.gmra.mxu1 %vm925_vm14, %v1868_v21  ;;  %v1856_v13 = vmul.f32 %v4822_v50, %v1855_v12  ;;  %v2530_v26 = vstv %s6811_s30  ;;  %v2509_v8 = vadd.f32 %v2507_v36, %v2503_v48  ;;  %v2536_v21 = vstv %s6819_s6  ;;  %s7060_s30 = sld [smem:[#allocation6 + $0xd5]] }
 0x32a   : > { %2361 = vmatpush.msra.mxu0 %v2346_v1  ;;  %v2516_v17 = vadd.f32 %v2514_v38, %v2510_v31  ;;  %v2538_v1 = vmul.f32 %v5342_v59, %v2536_v21  ;;  %v2542_v41 = vstv %s6824_s23  ;;  %v2531_v45 = vmul.f32 %v5500_v49, %v2530_v26  ;;  %s7066_s6 = sld [smem:[#allocation6 + $0xd6]] }
 0x32b   : > { %v1857_v24 = vadd.f32 %v4822_v50, %v1856_v13  ;;  %v2515_v12 = vadd.f32 %v2513_v40, %v2509_v8  ;;  %v2544_v47 = vmul.f32 %v5345_v60, %v2542_v41  ;;  %v2537_v13 = vmul.f32 %v5505_v10, %v2536_v21  ;;  %s7071_s23 = sld [smem:[#allocation6 + $0xd7]] }
 0x32c   : > { %2362 = vmatpush.msra.mxu0 %v2345_v3  ;;  %v2522_v19 = vadd.f32 %v2520_v51, %v2516_v17  ;;  %v2696_v3 = vstv %s6831_s13  ;;  %v2700_v31 = vstv %s6837_s16  ;;  %v2543_v51 = vmul.f32 %v5510_v11, %v2542_v41  ;;  %s7078_s13 = sld [smem:[#allocation6 + $0xe1]] }
 0x32d   : > { %v1861_v6 = vsel %vm1860_vm12, %v4822_v50, %v1857_v24  ;;  %4726 = vmatmul.msk.f32.gmra.mxu3 %vm925_vm14, %v6645_v29  ;;  %v2532_v50 = vmul.f32 %v5337_v58, %v2530_v26  ;;  %v2525_v29 = vmul.f32 %v5365_v5, %v2524_v27  ;;  %v2521_v37 = vadd.f32 %v2519_v20, %v2515_v12  ;;  %s7084_s16 = sld [smem:[#allocation6 + $0xe2]] }
 0x32e   : > { %v1866_v44 = vsel %vm1863_vm13, %v1865_v35, %v1861_v6  ;;  %v2528_v42 = vadd.f32 %v2526_v39, %v2522_v19  ;;  %v2698_v43 = vmul.f32 %v5305_v52, %v2696_v3  ;;  %v2702_v30 = vmul.f32 %v5308_v53, %v2700_v31  ;;  %v7414_v19 = vld [vmem:[#allocation26_spill] sm:$0xff] }
 0x32f   : > { %v1869_v16 = vmul.f32 %v4852_v9, %v1866_v44  ;;  %v2527_v14 = vadd.f32 %v2525_v29, %v2521_v37  ;;  %v2706_v36 = vstv %s6846_s11  ;;  %v2697_v48 = vmul.f32 %v5348_v61, %v2696_v3  ;;  %v7413_v44 = vld [vmem:[#allocation25_spill] sm:$0xff]  ;;  %s7089_s11 = sld [smem:[#allocation6 + $0xe3]] }
 0x330   : > { %v6850_v33 = vpop.f32.mrf.mxu3  ;;  %v2534_v15 = vadd.f32 %v2532_v50, %v2528_v42  ;;  %v2704_v17 = vadd.f32 %v2702_v30, %v2698_v43  ;;  %v2708_v27 = vmul.f32 %v5311_v54, %v2706_v36  ;;  %v2701_v40 = vmul.f32 %v5351_v62, %v2700_v31 }
 0x331   : > { %4470 = vmatmul.msk.f32.gmra.mxu0 %vm925_vm14, %v1869_v16  ;;  %4474 = vmatmul.msk.f32.gmra.mxu1 %vm925_vm14, %v1869_v16  ;;  %v2533_v35 = vadd.f32 %v2531_v45, %v2527_v14  ;;  %v2712_v20 = vstv %s6854_s27  ;;  %v2718_v50 = vstv %s6862_s25  ;;  %v2707_v42 = vmul.f32 %v5356_v63, %v2706_v36  ;;  %s7095_s27 = sld [smem:[#allocation6 + $0xe4]] }
 0x332   : > { %v2540_v38 = vadd.f32 %v2538_v1, %v2534_v15  ;;  %v2710_v26 = vadd.f32 %v2708_v27, %v2704_v17  ;;  %v2714_v8 = vmul.f32 %v5328_v55, %v2712_v20  ;;  %v2703_v9 = vadd.f32 %v2701_v40, %v2697_v48  ;;  %s7103_s25 = sld [smem:[#allocation6 + $0xe5]] }
 0x333   : > { %v2539_v39 = vadd.f32 %v2537_v13, %v2533_v35  ;;  %v2720_v12 = vmul.f32 %v5331_v56, %v2718_v50  ;;  %v2713_v29 = vmul.f32 %v5359_v0, %v2712_v20  ;;  %v2724_v1 = vstv %s6867_s29  ;;  %v7416_v35 = vld [vmem:[#allocation28_spill] sm:$0xff]  ;;  %s7108_s29 = sld [smem:[#allocation6 + $0xe6]] }
 0x334   : > { %v2546_v24 = vadd.f32 %v2544_v47, %v2540_v38  ;;  %v2716_v21 = vadd.f32 %v2714_v8, %v2710_v26  ;;  %v2709_v41 = vadd.f32 %v2707_v42, %v2703_v9  ;;  %v2726_v47 = vmul.f32 %v5334_v57, %v2724_v1 }
 0x335   : > { %v2545_v16 = vadd.f32 %v2543_v51, %v2539_v39  ;;  %v2719_v37 = vmul.f32 %v5362_v4, %v2718_v50  ;;  %v2730_v45 = vstv %s6873_s7  ;;  %v2725_v3 = vmul.f32 %v5365_v5, %v2724_v1  ;;  %s7114_s7 = sld [smem:[#allocation6 + $0xe7]] }
 0x336   : > { %v2722_v15 = vadd.f32 %v2720_v12, %v2716_v21  ;;  %v2715_v13 = vadd.f32 %v2713_v29, %v2709_v41  ;;  %v2732_v14 = vmul.f32 %v5337_v58, %v2730_v45  ;;  %v2736_v43 = vstv %s6881_s12  ;;  %s7120_s12 = sld [smem:[#allocation6 + $0xe8]] }
 0x337   : > { %v2738_v36 = vmul.f32 %v5342_v59, %v2736_v43  ;;  %v2742_v17 = vstv %s6888_s17  ;;  %v2731_v27 = vmul.f32 %v5500_v49, %v2730_v45  ;;  %v2737_v39 = vmul.f32 %v5505_v10, %v2736_v43  ;;  %v7419_v43 = vld [vmem:[#allocation23_spill] sm:$0xff]  ;;  %s7127_s17 = sld [smem:[#allocation6 + $0xe9]] }
 0x338   : > { %v6878_v6 = vpop.f32.mrf.mxu3  ;;  %v2728_v38 = vadd.f32 %v2726_v47, %v2722_v15  ;;  %v2721_v30 = vadd.f32 %v2719_v37, %v2715_v13  ;;  %v2744_v48 = vmul.f32 %v5345_v60, %v2742_v17  ;;  %v2743_v8 = vmul.f32 %v5510_v11, %v2742_v17  ;;  %v7417_v13 = vld [vmem:[#allocation21_spill] sm:$0xff] }
 0x339   : > { %4500 = vmatmul.msk.f32.vlgmr.msrb.gmra.mxu0 %vm925_vm14, %v7413_v44  ;;  %4502 = vmatmul.msk.f32.vlgmr.msrb.gmra.mxu1 %vm925_vm14, %v7414_v19 }
 0x33a   : > { %2561 = vmatpush.msrb.mxu0 %v2546_v24  ;;  %v7415_v24 = vld [vmem:[#allocation27_spill] sm:$0xff]  ;;  %v2734_v51 = vadd.f32 %v2732_v14, %v2728_v38  ;;  %v2727_v40 = vadd.f32 %v2725_v3, %v2721_v30  ;;  %v7418_v14 = vld [vmem:[#allocation22_spill] sm:$0xff] }
 0x33c   : > { %2562 = vmatpush.msrb.mxu0 %v2545_v16  ;;  %v2740_v20 = vadd.f32 %v2738_v36, %v2734_v51  ;;  %v2733_v26 = vadd.f32 %v2731_v27, %v2727_v40  ;;  %v7420_v51 = vld [vmem:[#allocation24_spill] sm:$0xff] }
 0x33e   : > { %v2746_v9 = vadd.f32 %v2744_v48, %v2740_v20  ;;  %v2739_v16 = vadd.f32 %v2737_v39, %v2733_v26 }
 0x340   : > { %v6900_v31 = vpop.f32.mrf.mxu3  ;;  %v2745_v42 = vadd.f32 %v2743_v8, %v2739_v16 }
 0x341   : > { %4501 = vmatmul.msk.f32.gmra.mxu0 %vm925_vm14, %v7415_v24  ;;  %4503 = vmatmul.msk.f32.gmra.mxu1 %vm925_vm14, %v7416_v35 }
 0x348   : > { %v6913_v50 = vpop.f32.mrf.mxu3 }
 0x349   : > { %4526 = vmatmul.msk.f32.vlgmr.msra.gmra.mxu0 %vm925_vm14, %v6078_v7 }
 0x34a   : > { %2761 = vmatpush.msra.mxu0 %v2746_v9 }
 0x34c   : > { %2762 = vmatpush.msra.mxu0 %v2745_v42 }
 0x350   : > { %v6917_v21 = vpop.f32.mrf.mxu3 }
 0x351   : > { %4527 = vmatmul.msk.f32.gmra.mxu0 %vm925_vm14, %v6107_v28 }
 0x358   : > { %v6921_v12 = vpop.f32.mrf.mxu3 }
 0x359   : > { %4552 = vmatmul.msk.f32.vlgmr.msrb.gmra.mxu0 %vm925_vm14, %v6078_v7 }
 0x35a   : > { %4597 = vmatpush.msk.msrb.mxu0 %vm747_vm4, %v7410_v46 }
 0x35c   : > { %4598 = vmatpush.msk.msrb.mxu0 %vm745_vm5, %v7410_v46 }
 0x360   : > { %v6931_v29 = vpop.f32.mrf.mxu3 }
 0x361   : > { %4553 = vmatmul.msk.f32.gmra.mxu0 %vm925_vm14, %v6107_v28 }
 0x368   : > { %v3209_v1 = vpop.f32.mrf.mxu3 }
 0x369   : > { %4578 = vmatmul.msk.f32.vlgmr.msra.gmra.mxu0 %vm925_vm14, %v6078_v7 }
 0x370   : > { %v3212_v41 = vpop.f32.mrf.mxu3 }
 0x371   : > { %4579 = vmatmul.msk.f32.gmra.mxu0 %vm925_vm14, %v6107_v28 }
 0x372   : > { %3229 = vmatpush.msra.mxu0 %v3212_v41 }
 0x374   : > { %3230 = vmatpush.msra.mxu0 %v3209_v1 }
 0x3a6   : > { %v1893_v15 = vpop.f32.mrf.mxu0  ;;  %v1916_v47 = vpop.f32.mrf.mxu1 }
 0x3a7   : > { %v1922_v38 = vmul.f32 %v7417_v13, %v1893_v15  ;;  %v1923_v3 = vmul.f32 %v7418_v14, %v1916_v47  ;;  %v6944_v47 = vld [vmem:[%s5239_s26] sm:$0xff] }
 0x3ae   : > { %v1896_v37 = vpop.f32.mrf.mxu0  ;;  %v1919_v45 = vpop.f32.mrf.mxu1 }
 0x3af   : > { %v1924_v30 = vmul.f32 %v7419_v43, %v1896_v37  ;;  %v1925_v36 = vmul.f32 %v7420_v51, %v1919_v45  ;;  %v6950_v45 = vld [vmem:[%s5239_s26 + $0x8] sm:$0xff] }
 0x3b1   : > { %v1926_v17 = vadd.f32 %v1924_v30, %v1922_v38  ;;  %v1933_v7 = vadd.f32 %v1925_v36, %v1923_v3 }
 0x3b3   : > { %v1927_v27 = vrot.slane %v1926_v17, 4  ;;  %v1934_v28 = vrot.slane %v1933_v7, 4 }
 0x3b5   : > { %v1928_v48 = vadd.f32 %v1927_v27, %v1926_v17  ;;  %v1935_v40 = vadd.f32 %v1934_v28, %v1933_v7  ;;  %v7423_v17 = vld [vmem:[#allocation29_spill] sm:$0xff]  ;;  %v7424_v27 = vld [vmem:[#allocation30_spill] sm:$0xff] }
 0x3b6   : > { %v2166_v39 = vpop.f32.mrf.mxu0 }
 0x3b7   : > { %v1929_v20 = vrot.slane %v1928_v48, 2  ;;  %v1936_v26 = vrot.slane %v1935_v40, 2 }
 0x3b9   : > { %v1930_v8 = vadd.f32 %v1929_v20, %v1928_v48  ;;  %v1937_v9 = vadd.f32 %v1936_v26, %v1935_v40  ;;  %v7425_v48 = vld [vmem:[#allocation31_spill] sm:$0xff]  ;;  %v7426_v20 = vld [vmem:[#allocation32_spill] sm:$0xff] }
 0x3bb   : > { %v1931_v16 = vrot.slane %v1930_v8, 1  ;;  %v1938_v42 = vrot.slane %v1937_v9, 1 }
 0x3bd   : > { %v1932_v1 = vadd.f32 %v1931_v16, %v1930_v8  ;;  %v1939_v41 = vadd.f32 %v1938_v42, %v1937_v9  ;;  %v7427_v8 = vld [vmem:[#allocation33_spill] sm:$0xff]  ;;  %v7430_v42 = vld [vmem:[#allocation36_spill] sm:$0xff] }
 0x3be   : > { %v2169_v15 = vpop.f32.mrf.mxu0 }
 0x3bf   : > { %v6947_v37 = vmul.f32 %v6944_v47, %v1932_v1  ;;  %v6953_v38 = vmul.f32 %v6950_v45, %v1939_v41  ;;  %v2189_v1 = vpop.f32.mrf.mxu1 }
 0x3c1   : > { %7421 = vst [vmem:[#allocation25_spill] sm:$0xff] %v6947_v37  ;;  %v1942_v3 = vmax.f32 %v6947_v37, %v6953_v38 }
 0x3c2   : > { %7422 = vst [vmem:[#allocation26_spill] sm:$0xff] %v6953_v38 }
 0x3c3   : > { %1943 = vmax.xlane.f32.xlu0 %v1942_v3 }
 0x3c6   : > { %v2364_v30 = vpop.f32.mrf.mxu0 }
 0x3c7   : > { %v2192_v41 = vpop.f32.mrf.mxu1 }
 0x3ce   : > { %v2367_v36 = vpop.f32.mrf.mxu0 }
 0x3cf   : > { %2384 = vmatpush.msra.mxu1 %v2367_v36  ;;  %v2190_v36 = vadd.f32 %v2189_v1, %v2166_v39 }
 0x3d1   : > { %2385 = vmatpush.msra.mxu1 %v2364_v30 }
 0x3d2   : > { %4528 = vmatmul.msk.f32.vlgmr.msra.gmra.mxu1 %vm925_vm14, %v7423_v17 }
 0x3d6   : > { %v2564_v7 = vpop.f32.mrf.mxu0 }
 0x3da   : > { %4529 = vmatmul.msk.f32.gmra.mxu1 %vm925_vm14, %v7424_v27 }
 0x3de   : > { %v2567_v28 = vpop.f32.mrf.mxu0 }
 0x3df   : > { %2584 = vmatpush.msrb.mxu1 %v2567_v28  ;;  %v2293_v28 = vadd.f32 %v6815_v2, %v2190_v36 }
 0x3e1   : > { %2585 = vmatpush.msrb.mxu1 %v2564_v7 }
 0x3e2   : > { %4554 = vmatmul.msk.f32.vlgmr.msrb.gmra.mxu1 %vm925_vm14, %v7425_v48 }
 0x3e6   : > { %v2764_v40 = vpop.f32.mrf.mxu0 }
 0x3ea   : > { %4555 = vmatmul.msk.f32.gmra.mxu1 %vm925_vm14, %v7426_v20 }
 0x3ee   : > { %v2767_v26 = vpop.f32.mrf.mxu0 }
 0x3ef   : > { %2784 = vmatpush.msra.mxu1 %v2767_v26  ;;  %v2193_v26 = vadd.f32 %v2192_v41, %v2169_v15 }
 0x3f1   : > { %2785 = vmatpush.msra.mxu1 %v2764_v40 }
 0x3f2   : > { %4580 = vmatmul.msk.f32.vlgmr.msra.gmra.mxu1 %vm925_vm14, %v7427_v8 }
 0x3f3   : > { %4601 = vmatpush.msk.msrb.mxu1 %vm748_vm15, %v7410_v46 }
 0x3f5   : > { %4602 = vmatpush.msk.msrb.mxu1 %vm746_vm0, %v7410_v46 }
 0x3f7   : > { %3252 = vmatpush.msra.mxu1 %v6695_v18  ;;  %v2294_v18 = vadd.f32 %v6850_v33, %v2193_v26 }
 0x3f9   : > { %3253 = vmatpush.msra.mxu1 %v6691_v23 }
 0x3fa   : > { %4581 = vmatmul.msk.f32.gmra.mxu1 %vm925_vm14, %v7430_v42 }
 0x44f   : > { %v2387_v3 = vpop.f32.mrf.mxu1 }
 0x450   : > { %v2393_v40 = vadd.f32 %v2387_v3, %v2293_v28  ;;  %v3384_v28 = vstv %s6987_s9 }
 0x451   : > { %v3386_v26 = vmul.f32 %v5331_v56, %v3384_v28 }
 0x452   : > { %v2493_v37 = vadd.f32 %v6878_v6, %v2393_v40 }
 0x457   : > { %v2390_v30 = vpop.f32.mrf.mxu1 }
 0x458   : > { %v2394_v23 = vadd.f32 %v2390_v30, %v2294_v18 }
 0x45a   : > { %v2494_v8 = vadd.f32 %v6900_v31, %v2394_v23 }
 0x45f   : > { %v2587_v7 = vpop.f32.mrf.mxu1 }
 0x460   : > { %v2593_v16 = vadd.f32 %v2587_v7, %v2493_v37 }
 0x462   : > { %v2693_v9 = vadd.f32 %v6913_v50, %v2593_v16 }
 0x467   : > { %v2590_v38 = vpop.f32.mrf.mxu1 }
 0x468   : > { %v2594_v48 = vadd.f32 %v2590_v38, %v2494_v8  ;;  %v3366_v38 = vstv %s4650_s18 }
 0x46a   : > { %v2694_v2 = vadd.f32 %v6917_v21, %v2594_v48  ;;  %v3368_v48 = vmul.f32 %v5308_v53, %v3366_v38 }
 0x46f   : > { %v2787_v42 = vpop.f32.mrf.mxu1 }
 0x470   : > { %v2793_v20 = vadd.f32 %v2787_v42, %v2693_v9  ;;  %v3367_v9 = vmul.f32 %v5351_v62, %v3366_v38  ;;  %v3378_v42 = vstv %s6984_s8 }
 0x471   : > { %v3380_v41 = vmul.f32 %v5328_v55, %v3378_v42  ;;  %v3379_v23 = vmul.f32 %v5359_v0, %v3378_v42 }
 0x472   : > { %v2893_v39 = vadd.f32 %v6921_v12, %v2793_v20  ;;  %v3362_v12 = vstv %s4649_s15  ;;  %v3372_v20 = vstv %s4651_s19 }
 0x473   : > { %v3364_v21 = vmul.f32 %v5305_v52, %v3362_v12  ;;  %v3363_v8 = vmul.f32 %v5348_v61, %v3362_v12  ;;  %v3374_v16 = vmul.f32 %v5311_v54, %v3372_v20  ;;  %v3373_v30 = vmul.f32 %v5356_v63, %v3372_v20 }
 0x474   : > { %v4595_v1 = vmul.f32 -1.442695, %v2893_v39 }
 0x475   : > { %v3369_v3 = vadd.f32 %v3367_v9, %v3363_v8  ;;  %v3402_v9 = vstv %s7002_s0 }
 0x476   : > { %4823 = vpow2.f32 %v4595_v1 }
 0x477   : > { %v2790_v6 = vpop.f32.mrf.mxu1  ;;  %v3375_v18 = vadd.f32 %v3373_v30, %v3369_v3  ;;  %v3408_v3 = vstv %s7005_s14 }
 0x478   : > { %v2794_v15 = vadd.f32 %v2790_v6, %v2694_v2 }
 0x479   : > { %v3381_v12 = vadd.f32 %v3379_v23, %v3375_v18  ;;  %v3410_v23 = vmul.f32 %v5345_v60, %v3408_v3 }
 0x47a   : > { %v2894_v33 = vadd.f32 %v6931_v29, %v2794_v15  ;;  %v3370_v29 = vadd.f32 %v3368_v48, %v3364_v21  ;;  %v3390_v15 = vstv %s6991_s28  ;;  %v3396_v48 = vstv %s6996_s10 }
 0x47b   : > { %v3398_v8 = vmul.f32 %v5337_v58, %v3396_v48 }
 0x47c   : > { %v4824_v31 = vpop.eup %4823  ;;  %v4596_v50 = vmul.f32 -1.442695, %v2894_v33  ;;  %v3376_v7 = vadd.f32 %v3374_v16, %v3370_v29  ;;  %v3385_v29 = vmul.f32 %v5362_v4, %v3384_v28  ;;  %v3397_v28 = vmul.f32 %v5500_v49, %v3396_v48 }
 0x47d   : > { %v6989_v37 = vadd.f32 1.0, %v4824_v31  ;;  %v3392_v31 = vmul.f32 %v5334_v57, %v3390_v15  ;;  %v3409_v48 = vmul.f32 %v5510_v11, %v3408_v3 }
 0x47e   : > { %4825 = vpow2.f32 %v4596_v50  ;;  %v3382_v6 = vadd.f32 %v3380_v41, %v3376_v7  ;;  %v3404_v41 = vmul.f32 %v5342_v59, %v3402_v9  ;;  %v3391_v7 = vmul.f32 %v5365_v5, %v3390_v15 }
 0x47f   : > { %4827 = vrcp.f32 %v6989_v37  ;;  %v2912_v36 = vand.u32 2147483647, %v6989_v37  ;;  %v2914_v1 = vand.u32 2147483648, %v6989_v37  ;;  %vm2908_vm1 = vweird.f32 %v6989_v37 }
 0x480   : > { %v3388_v21 = vadd.f32 %v3386_v26, %v3382_v6  ;;  %v3403_v15 = vmul.f32 %v5505_v10, %v3402_v9 }
 0x481   : > { %vm7024_vm2 = vcmp.eq.f32.partialorder %v2912_v36, 8.507059e+37  ;;  %v2915_v20 = vor.u32 1.1754944e-38, %v2914_v1  ;;  %v3387_v36 = vadd.f32 %v3385_v29, %v3381_v12 }
 0x482   : > { %v3394_v42 = vadd.f32 %v3392_v31, %v3388_v21  ;;  %v3566_v31 = vstv %s7018_s20 }
 0x483   : > { %v3393_v6 = vadd.f32 %v3391_v7, %v3387_v36  ;;  %v3568_v9 = vmul.f32 %v5308_v53, %v3566_v31  ;;  %v3572_v7 = vstv %s7030_s21  ;;  %s7439_s21 = sld [smem:[#allocation20_spill]] }
 0x484   : > { %v4826_v40 = vpop.eup %4825  ;;  %v3400_v18 = vadd.f32 %v3398_v8, %v3394_v42  ;;  %v3574_v3 = vmul.f32 %v5311_v54, %v3572_v7 }
 0x485   : > { %v4828_v39 = vpop.eup %4827  ;;  %v7015_v2 = vadd.f32 1.0, %v4826_v40  ;;  %v3399_v29 = vadd.f32 %v3397_v28, %v3393_v6 }
 0x486   : > { %v2904_v33 = vmul.f32 %v4828_v39, %v6989_v37  ;;  %vm2909_vm3 = vweird.f32 %v4828_v39  ;;  %v3406_v21 = vadd.f32 %v3404_v41, %v3400_v18  ;;  %v3578_v18 = vstv %s7034_s5  ;;  %s7440_s5 = sld [smem:[#allocation15_spill]] }
 0x487   : > { %4829 = vrcp.f32 %v7015_v2  ;;  %v2927_v30 = vand.u32 2147483647, %v7015_v2  ;;  %vm2923_vm6 = vweird.f32 %v7015_v2  ;;  %v2929_v26 = vand.u32 2147483648, %v7015_v2  ;;  %vm2910_vm7 = vmor %vm2908_vm1, %vm2909_vm3 }
 0x488   : > { %v2905_v38 = vsub.f32 1.0, %v2904_v33  ;;  %v3562_v33 = vstv %s7012_s1 }
 0x489   : > { %v3564_v8 = vmul.f32 %v5305_v52, %v3562_v33  ;;  %v3563_v28 = vmul.f32 %v5348_v61, %v3562_v33  ;;  %vm2928_vm10 = vcmp.eq.f32.partialorder %v2927_v30, 8.507059e+37 }
 0x48a   : > { %v2906_v16 = vmul.f32 %v4828_v39, %v2905_v38 }
 0x48b   : > { %v3570_v41 = vadd.f32 %v3568_v9, %v3564_v8 }
 0x48c   : > { %v2907_v40 = vadd.f32 %v4828_v39, %v2906_v16  ;;  %v4855_v16 = vld [vmem:[%s5114_s2 + $0x10] sm:$0xff] }
 0x48d   : > { %v4830_v1 = vpop.eup %4829  ;;  %v3576_v6 = vadd.f32 %v3574_v3, %v3570_v41 }
 0x48e   : > { %v2911_v12 = vsel %vm2910_vm7, %v4828_v39, %v2907_v40  ;;  %v2919_v38 = vmul.f32 %v4830_v1, %v7015_v2  ;;  %v3412_v39 = vadd.f32 %v3410_v23, %v3406_v21  ;;  %v3405_v40 = vadd.f32 %v3403_v15, %v3399_v29 }
 0x48f   : > { %v2916_v37 = vsel %vm7024_vm2, %v2915_v20, %v2911_v12  ;;  %vm2924_vm8 = vweird.f32 %v4830_v1  ;;  %v3580_v20 = vmul.f32 %v5328_v55, %v3578_v18  ;;  %v3584_v15 = vstv %s7041_s24  ;;  %s4238_s24 = sshll.u32 %s7439_s21, 4 }
 0x490   : > { %v2933_v42 = vmul.f32 %v4855_v16, %v2916_v37  ;;  %v2920_v36 = vsub.f32 1.0, %v2919_v38  ;;  %v3411_v23 = vadd.f32 %v3409_v48, %v3405_v40  ;;  %v3567_v12 = vmul.f32 %v5351_v62, %v3566_v31  ;;  %vm2925_vm9 = vmor %vm2923_vm6, %vm2924_vm8 }
 0x491   : > { %v2930_v21 = vor.u32 1.1754944e-38, %v2929_v26  ;;  %v3586_v37 = vmul.f32 %v5331_v56, %v3584_v15  ;;  %v3573_v29 = vmul.f32 %v5356_v63, %v3572_v7  ;;  %v3582_v33 = vadd.f32 %v3580_v20, %v3576_v6  ;;  %v4856_v7 = vld [vmem:[%s5114_s2 + $0x18] sm:$0xff] }
 0x492   : > { %4599 = vmatmul.msk.f32.vlgmr.msrb.gmra.mxu0 %vm925_vm14, %v2933_v42  ;;  %4603 = vmatmul.msk.f32.vlgmr.msrb.gmra.mxu1 %vm925_vm14, %v2933_v42  ;;  %v2921_v50 = vmul.f32 %v4830_v1, %v2920_v36  ;;  %v3590_v48 = vstv %s7052_s22  ;;  %v3569_v8 = vadd.f32 %v3567_v12, %v3563_v28  ;;  %v3579_v31 = vmul.f32 %v5359_v0, %v3578_v18  ;;  %s4746_s22 = sshll.u32 %s7440_s5, 4 }
 0x493   : > { %3427 = vmatpush.msrb.mxu0 %v3412_v39  ;;  %v3592_v9 = vmul.f32 %v5334_v57, %v3590_v48  ;;  %v3585_v16 = vmul.f32 %v5362_v4, %v3584_v15  ;;  %v3588_v2 = vadd.f32 %v3586_v37, %v3582_v33  ;;  %v3596_v36 = vstv %s7060_s30 }
 0x494   : > { %v2922_v38 = vadd.f32 %v4830_v1, %v2921_v50  ;;  %v3575_v39 = vadd.f32 %v3573_v29, %v3569_v8  ;;  %v3598_v41 = vmul.f32 %v5337_v58, %v3596_v36  ;;  %v3602_v18 = vstv %s7066_s6 }
 0x495   : > { %3428 = vmatpush.msrb.mxu0 %v3411_v23  ;;  %v3594_v3 = vadd.f32 %v3592_v9, %v3588_v2  ;;  %v3591_v30 = vmul.f32 %v5365_v5, %v3590_v48  ;;  %v3604_v50 = vmul.f32 %v5342_v59, %v3602_v18  ;;  %v3608_v20 = vstv %s7071_s23  ;;  %s7443_s23 = sld [smem:[#allocation40_spill]] }
 0x496   : > { %v2926_v26 = vsel %vm2925_vm9, %v4830_v1, %v2922_v38  ;;  %v3581_v1 = vadd.f32 %v3579_v31, %v3575_v39  ;;  %v3610_v23 = vmul.f32 %v5345_v60, %v3608_v20  ;;  %v3597_v15 = vmul.f32 %v5500_v49, %v3596_v36 }
 0x497   : > { %v2931_v42 = vsel %vm2928_vm10, %v2930_v21, %v2926_v26  ;;  %v3600_v28 = vadd.f32 %v3598_v41, %v3594_v3  ;;  %v3603_v12 = vmul.f32 %v5505_v10, %v3602_v18  ;;  %v3762_v37 = vstv %s7078_s13 }
 0x498   : > { %v2934_v40 = vmul.f32 %v4856_v7, %v2931_v42  ;;  %v3587_v6 = vadd.f32 %v3585_v16, %v3581_v1  ;;  %v3766_v29 = vstv %s7084_s16  ;;  %v3764_v33 = vmul.f32 %v5305_v52, %v3762_v37  ;;  %s273_s16 = scalar_lea.vmem [#allocation7], %s4238_s24 }
 0x499   : > { %v3606_v38 = vadd.f32 %v3604_v50, %v3600_v28  ;;  %v3768_v48 = vmul.f32 %v5308_v53, %v3766_v29  ;;  %v3609_v26 = vmul.f32 %v5510_v11, %v3608_v20  ;;  %v3772_v9 = vstv %s7089_s11  ;;  %s4134_s11 = sshll.u32 %s273_s16, 4  ;;  %s4135_s11 = int_to_ptr.vmem [resolvable:$true] %s4134_s11 }
 0x49a   : > { %4600 = vmatmul.msk.f32.gmra.mxu0 %vm925_vm14, %v2934_v40  ;;  %4604 = vmatmul.msk.f32.gmra.mxu1 %vm925_vm14, %v2934_v40  ;;  %v3593_v21 = vadd.f32 %v3591_v30, %v3587_v6  ;;  %v3774_v42 = vmul.f32 %v5311_v54, %v3772_v9  ;;  %v3763_v2 = vmul.f32 %v5348_v61, %v3762_v37  ;;  %v3778_v7 = vstv %s7095_s27 }
 0x49b   : > { %v3612_v8 = vadd.f32 %v3610_v23, %v3606_v38  ;;  %v3770_v16 = vadd.f32 %v3768_v48, %v3764_v33  ;;  %v3767_v36 = vmul.f32 %v5351_v62, %v3766_v29  ;;  %v3780_v53 = vmul.f32 %v5328_v55, %v3778_v7  ;;  %s4132_s13 = scalar_lea.hbm %s7443_s23, %s4746_s22  ;;  %s4926_s15 = scalar_lea.hbm %s7443_s23, 32 }
 0x49c   : > { %v3599_v31 = vadd.f32 %v3597_v15, %v3593_v21  ;;  %v3784_v62 = vstv %s7103_s25  ;;  %v3773_v40 = vmul.f32 %v5356_v63, %v3772_v9  ;;  %v3796_v50 = vstv %s7114_s7  ;;  %s4136_s27 = sshll.u32 %s4132_s13, 4  ;;  %s4121_s25 = scalar_lea.sflag [#allocation4], %s7439_s21  ;;  %s4137_s27 = int_to_ptr.hbm [resolvable:$true] %s4136_s27 }
 0x49d   : > { %v3776_v52 = vadd.f32 %v3774_v42, %v3770_v16  ;;  %v3769_v54 = vadd.f32 %v3767_v36, %v3763_v2  ;;  %v3786_v3 = vmul.f32 %v5331_v56, %v3784_v62  ;;  %v3785_v30 = vmul.f32 %v5362_v4, %v3784_v62 }
 0x49e   : > { %v3605_v39 = vadd.f32 %v3603_v12, %v3599_v31  ;;  %v3798_v23 = vmul.f32 %v5337_v58, %v3796_v50  ;;  %v3802_v6 = vstv %s7120_s12  ;;  %v3808_v15 = vstv %s7127_s17 }
 0x49f   : > { %v3782_v41 = vadd.f32 %v3780_v53, %v3776_v52  ;;  %v3775_v18 = vadd.f32 %v3773_v40, %v3769_v54  ;;  %v3797_v4 = vmul.f32 %v5500_v49, %v3796_v50  ;;  %v3810_v12 = vmul.f32 %v5345_v60, %v3808_v15  ;;  %v7435_v50 = vld [vmem:[#allocation33_spill] sm:$0xff] }
 0x4a0   : > { %v3611_v61 = vadd.f32 %v3609_v26, %v3605_v39  ;;  %v3803_v58 = vmul.f32 %v5505_v10, %v3802_v6  ;;  %v3809_v37 = vmul.f32 %v5510_v11, %v3808_v15 }
 0x4a1   : > { %v3788_v55 = vadd.f32 %v3786_v3, %v3782_v41 }
 0x4a2   : > { %4632 = vmatmul.msk.f32.vlgmr.msra.gmra.mxu0 %vm925_vm14, %v7413_v44  ;;  %4634 = vmatmul.msk.f32.vlgmr.msra.gmra.mxu1 %vm925_vm14, %v7414_v19  ;;  %v3779_v44 = vmul.f32 %v5359_v0, %v3778_v7  ;;  %v3790_v19 = vstv %s7108_s29  ;;  %s4920_s29 = sshra.s32 %s4137_s27, 4  ;;  %s4921_s29 = int_to_ptr.hbm [resolvable:$true] %s4920_s29 }
 0x4a3   : > { %3627 = vmatpush.msra.mxu0 %v3612_v8  ;;  %v3792_v1 = vmul.f32 %v5334_v57, %v3790_v19  ;;  %v3791_v63 = vmul.f32 %v5365_v5, %v3790_v19  ;;  %v3804_v57 = vmul.f32 %v5342_v59, %v3802_v6  ;;  %s4922_s7 = scalar_lea.hbm %s4921_s29, 16  ;;  %p4927_p3 = scmp.lt.s32.totalorder %s4921_s29, %s7443_s23 }
 0x4a4   : > { %v3781_v20 = vadd.f32 %v3779_v44, %v3775_v18  ;;  %v7433_v18 = vld [vmem:[#allocation31_spill] sm:$0xff]  ;;  %p4923_p6 = scmp.ne.s32.totalorder %s4921_s29, %s4922_s7  ;;  %p4928_p5 = scmp.lt.s32.totalorder %s4926_s15, %s4922_s7 }
 0x4a5   : > { %3628 = vmatpush.msra.mxu0 %v3611_v61  ;;  %v3794_v28 = vadd.f32 %v3792_v1, %v3788_v55  ;;  %v7434_v1 = vld [vmem:[#allocation32_spill] sm:$0xff] }
 0x4a6   : > { %v3787_v56 = vadd.f32 %v3785_v30, %v3781_v20  ;;  %v7438_v20 = vld [vmem:[#allocation36_spill] sm:$0xff]  ;;  %p4924_p13 = pnand %p4923_p6, %p5065_p11  ;;  %p4929_p8 = por %p4928_p5, %p4927_p3 }
 0x4a7   : > { %v3800_v0 = vadd.f32 %v3798_v23, %v3794_v28  ;;  %v7198_v28 = vpop.xlane.xlu0 %1943  ;;  %v3353_v23 = vpop.f32.mrf.mxu3 }
 0x4a8   : > { %v3793_v38 = vadd.f32 %v3791_v63, %v3787_v56  ;;  %v4605_v63 = vld [vmem:[%s7288_s3 + $0x8] sm:$0xff]  ;;  %p4925_p0 = pneg %p4924_p13 }
 0x4a9   : > { %v3806_v5 = vadd.f32 %v3804_v57, %v3800_v0 }
 0x4aa   : > { %4633 = vmatmul.msk.f32.gmra.mxu0 %vm925_vm14, %v7415_v24  ;;  %4635 = vmatmul.msk.f32.gmra.mxu1 %vm925_vm14, %v7416_v35  ;;  %v3799_v21 = vadd.f32 %v3797_v4, %v3793_v38  ;;  %p4930_p9 = pnand %p4929_p8, %p4925_p0 }
 0x4ab   : > { %v3812_v29 = vadd.f32 %v3810_v12, %v3806_v5 }
 0x4ac   : > { %v3805_v24 = vadd.f32 %v3803_v58, %v3799_v21  ;;  %v4606_v21 = vld [vmem:[%s7289_s4 + $0x8] sm:$0xff] }
 0x4ae   : > { %v3811_v33 = vadd.f32 %v3809_v37, %v3805_v24 }
 0x4af   : > { %v3356_v12 = vpop.f32.mrf.mxu3 }
 0x4b2   : > { %4658 = vmatmul.msk.f32.vlgmr.msrb.gmra.mxu0 %vm925_vm14, %v6364_v22 }
 0x4b3   : > { %3827 = vmatpush.msrb.mxu0 %v3812_v29 }
 0x4b5   : > { %3828 = vmatpush.msrb.mxu0 %v3811_v33 }
 0x4b7   : > { %v3553_v37 = vpop.f32.mrf.mxu3 }
 0x4ba   : > { %4659 = vmatmul.msk.f32.gmra.mxu0 %vm925_vm14, %v6416_v25 }
 0x4c2   : > { %4684 = vmatmul.msk.f32.vlgmr.msra.gmra.mxu0 %vm925_vm14, %v6364_v22 }
 0x4c3   : > { %4729 = vmatpush.msk.msra.mxu0 %vm747_vm4, %v7410_v46  ;;  %vm1947_vm4 = vcmask 15360  }
 0x4c5   : > { %4730 = vmatpush.msk.msra.mxu0 %vm745_vm5, %v7410_v46 }
 0x4ca   : > { %4685 = vmatmul.msk.f32.gmra.mxu0 %vm925_vm14, %v6416_v25 }
 0x4d2   : > { %4710 = vmatmul.msk.f32.vlgmr.msrb.gmra.mxu0 %vm925_vm14, %v6364_v22 }
 0x4da   : > { %4711 = vmatmul.msk.f32.gmra.mxu0 %vm925_vm14, %v6416_v25 }
 0x50f   : > { %v2958_v59 = vpop.f32.mrf.mxu0  ;;  %v2981_v60 = vpop.f32.mrf.mxu1 }
 0x510   : > { %v2987_v11 = vmul.f32 %v7417_v13, %v2958_v59  ;;  %v2988_v32 = vmul.f32 %v7418_v14, %v2981_v60 }
 0x517   : > { %v2961_v49 = vpop.f32.mrf.mxu0  ;;  %v2984_v10 = vpop.f32.mrf.mxu1 }
 0x518   : > { %v2989_v34 = vmul.f32 %v7419_v43, %v2961_v49  ;;  %v2990_v35 = vmul.f32 %v7420_v51, %v2984_v10  ;;  %v3556_v49 = vpop.f32.mrf.mxu3 }
 0x51a   : > { %v2991_v48 = vadd.f32 %v2989_v34, %v2987_v11  ;;  %v2998_v8 = vadd.f32 %v2990_v35, %v2988_v32 }
 0x51c   : > { %v2992_v31 = vrot.slane %v2991_v48, 4  ;;  %v2999_v26 = vrot.slane %v2998_v8, 4 }
 0x51e   : > { %v2993_v22 = vadd.f32 %v2992_v31, %v2991_v48  ;;  %v3000_v9 = vadd.f32 %v2999_v26, %v2998_v8 }
 0x51f   : > { %v3232_v16 = vpop.f32.mrf.mxu0  ;;  %v3255_v4 = vpop.f32.mrf.mxu1 }
 0x520   : > { %v2994_v25 = vrot.slane %v2993_v22, 2  ;;  %v3001_v42 = vrot.slane %v3000_v9, 2  ;;  %v3753_v11 = vpop.f32.mrf.mxu3  ;;  %v3256_v32 = vadd.f32 %v3255_v4, %v3232_v16 }
 0x522   : > { %v2995_v2 = vadd.f32 %v2994_v25, %v2993_v22  ;;  %v3002_v36 = vadd.f32 %v3001_v42, %v3000_v9  ;;  %v3359_v35 = vadd.f32 %v3353_v23, %v3256_v32 }
 0x524   : > { %v2996_v39 = vrot.slane %v2995_v2, 1  ;;  %v3003_v7 = vrot.slane %v3002_v36, 1 }
 0x526   : > { %v2997_v52 = vadd.f32 %v2996_v39, %v2995_v2  ;;  %v3004_v53 = vadd.f32 %v3003_v7, %v3002_v36 }
 0x527   : > { %v3235_v54 = vpop.f32.mrf.mxu0  ;;  %v3258_v24 = vpop.f32.mrf.mxu1 }
 0x528   : > { %v7173_v61 = vmul.f32 %v6944_v47, %v2997_v52  ;;  %v7176_v62 = vmul.f32 %v6950_v45, %v3004_v53  ;;  %v3756_v48 = vpop.f32.mrf.mxu3  ;;  %v3259_v31 = vadd.f32 %v3258_v24, %v3235_v54 }
 0x52a   : > { %v3007_v40 = vmax.f32 %v7173_v61, %v7176_v62  ;;  %v3360_v9 = vadd.f32 %v3356_v12, %v3259_v31 }
 0x52c   : > { %3008 = vmax.xlane.f32.xlu0 %v3007_v40 }
 0x52f   : > { %v3430_v41 = vpop.f32.mrf.mxu0 }
 0x530   : > { %v3953_v2 = vpop.f32.mrf.mxu3 }
 0x537   : > { %v3433_v3 = vpop.f32.mrf.mxu0 }
 0x538   : > { %3450 = vmatpush.msrb.mxu1 %v3433_v3 }
 0x53a   : > { %3451 = vmatpush.msrb.mxu1 %v3430_v41 }
 0x53b   : > { %4660 = vmatmul.msk.f32.vlgmr.msrb.gmra.mxu1 %vm925_vm14, %v7423_v17 }
 0x53f   : > { %v3630_v44 = vpop.f32.mrf.mxu0 }
 0x543   : > { %4661 = vmatmul.msk.f32.gmra.mxu1 %vm925_vm14, %v7424_v27 }
 0x547   : > { %v3633_v19 = vpop.f32.mrf.mxu0 }
 0x548   : > { %3650 = vmatpush.msra.mxu1 %v3633_v19 }
 0x54a   : > { %3651 = vmatpush.msra.mxu1 %v3630_v44  ;;  %v3956_v44 = vpop.f32.mrf.mxu3 }
 0x54b   : > { %4686 = vmatmul.msk.f32.vlgmr.msra.gmra.mxu1 %vm925_vm14, %v7433_v18 }
 0x54f   : > { %v3830_v55 = vpop.f32.mrf.mxu0 }
 0x553   : > { %4687 = vmatmul.msk.f32.gmra.mxu1 %vm925_vm14, %v7434_v1 }
 0x557   : > { %v3833_v30 = vpop.f32.mrf.mxu0 }
 0x558   : > { %3850 = vmatpush.msrb.mxu1 %v3833_v30 }
 0x55a   : > { %3851 = vmatpush.msrb.mxu1 %v3830_v55 }
 0x55b   : > { %4712 = vmatmul.msk.f32.vlgmr.msrb.gmra.mxu1 %vm925_vm14, %v7435_v50 }
 0x55c   : > { %4733 = vmatpush.msk.msra.mxu1 %vm748_vm15, %v7410_v46 }
 0x55e   : > { %4734 = vmatpush.msk.msra.mxu1 %vm746_vm0, %v7410_v46 }
 0x563   : > { %4713 = vmatmul.msk.f32.gmra.mxu1 %vm925_vm14, %v7438_v20 }
 0x59f   : > { %v3009_v6 = vpop.xlane.xlu0 %3008 }
 0x5a0   : > { %v3012_v56 = vmul.f32 %v4605_v63, %v3009_v6 }
 0x5a2   : > { %v3013_v0 = vsel %vm1947_vm4, %v3012_v56, 0.0 }
 0x5a3   : > { %v3014_v57 = vrot.slane %v3013_v0, 4 }
 0x5a5   : > { %v3015_v15 = vadd.f32 %v3014_v57, %v3013_v0 }
 0x5a7   : > { %v3016_v46 = vrot.slane %v3015_v15, 2 }
 0x5a9   : > { %v3017_v38 = vadd.f32 %v3016_v46, %v3015_v15 }
 0x5ab   : > { %v3018_v58 = vrot.slane %v3017_v38, 1 }
 0x5ad   : > { %v3019_v5 = vadd.f32 %v3018_v58, %v3017_v38  ;;  %v4857_v38 = vld [vmem:[%s5114_s2 + $0x20] sm:$0xff] }
 0x5af   : > { %v3020_v29 = vmax.f32 %v3019_v5, 0.0 }
 0x5b1   : > { %v3023_v33 = vmul.f32 %v4606_v21, %v3020_v29 }
 0x5b3   : > { %v3024_v59 = vsel %vm1947_vm4, %v3023_v33, 0.0 }
 0x5b4   : > { %3025 = vadd.xlane.f32.xlu2 %v3024_v59 }
 0x5b8   : > { %v3453_v60 = vpop.f32.mrf.mxu1 }
 0x5b9   : > { %v3459_v8 = vadd.f32 %v3453_v60, %v3359_v35  ;;  %v4858_v60 = vld [vmem:[%s5114_s2 + $0x28] sm:$0xff] }
 0x5bb   : > { %v3559_v22 = vadd.f32 %v3553_v37, %v3459_v8 }
 0x5c0   : > { %v3456_v10 = vpop.f32.mrf.mxu1 }
 0x5c1   : > { %v3460_v42 = vadd.f32 %v3456_v10, %v3360_v9  ;;  %v1945_v10 = vld [vmem:[%s7288_s3] sm:$0xff] }
 0x5c3   : > { %v3560_v7 = vadd.f32 %v3556_v49, %v3460_v42 }
 0x5c8   : > { %v3653_v34 = vpop.f32.mrf.mxu1 }
 0x5c9   : > { %v3659_v25 = vadd.f32 %v3653_v34, %v3559_v22 }
 0x5cb   : > { %v3759_v36 = vadd.f32 %v3753_v11, %v3659_v25  ;;  %v1946_v11 = vmul.f32 %v1945_v10, %v7198_v28 }
 0x5cd   : > { %v1948_v35 = vsel %vm1947_vm4, %v1946_v11, 0.0 }
 0x5d0   : > { %v3656_v26 = vpop.f32.mrf.mxu1 }
 0x5d1   : > { %v3660_v53 = vadd.f32 %v3656_v26, %v3560_v7 }
 0x5d3   : > { %v3760_v3 = vadd.f32 %v3756_v48, %v3660_v53  ;;  %v1949_v48 = vrot.slane %v1948_v35, 4 }
 0x5d5   : > { %v1950_v8 = vadd.f32 %v1949_v48, %v1948_v35 }
 0x5d8   : > { %v3853_v39 = vpop.f32.mrf.mxu1 }
 0x5d9   : > { %v3859_v52 = vadd.f32 %v3853_v39, %v3759_v36  ;;  %v1951_v39 = vrot.slane %v1950_v8, 2 }
 0x5db   : > { %v3959_v40 = vadd.f32 %v3953_v2, %v3859_v52 }
 0x5dd   : > { %v4727_v41 = vmul.f32 -1.442695, %v3959_v40  ;;  %v1952_v40 = vadd.f32 %v1951_v39, %v1950_v8 }
 0x5df   : > { %4831 = vpow2.f32 %v4727_v41 }
 0x5e0   : > { %v3856_v16 = vpop.f32.mrf.mxu1 }
 0x5e1   : > { %v3860_v19 = vadd.f32 %v3856_v16, %v3760_v3 }
 0x5e3   : > { %v3960_v18 = vadd.f32 %v3956_v44, %v3860_v19  ;;  %v1953_v19 = vrot.slane %v1952_v40, 1 }
 0x5e5   : > { %v4832_v54 = vpop.eup %4831  ;;  %v4728_v55 = vmul.f32 -1.442695, %v3960_v18 }
 0x5e6   : > { %v3967_v1 = vadd.f32 1.0, %v4832_v54 }
 0x5e7   : > { %4833 = vpow2.f32 %v4728_v55 }
 0x5e8   : > { %4835 = vrcp.f32 %v3967_v1  ;;  %v3980_v23 = vand.u32 2147483648, %v3967_v1  ;;  %v3978_v6 = vand.u32 2147483647, %v3967_v1  ;;  %vm3974_vm0 = vweird.f32 %v3967_v1 }
 0x5ea   : > { %v3981_v57 = vor.u32 1.1754944e-38, %v3980_v23  ;;  %vm3979_vm11 = vcmp.eq.f32.partialorder %v3978_v6, 8.507059e+37 }
 0x5ed   : > { %v4834_v30 = vpop.eup %4833 }
 0x5ee   : > { %v4836_v50 = vpop.eup %4835  ;;  %v3968_v17 = vadd.f32 1.0, %v4834_v30 }
 0x5ef   : > { %v3970_v27 = vmul.f32 %v4836_v50, %v3967_v1  ;;  %vm3975_vm15 = vweird.f32 %v4836_v50 }
 0x5f0   : > { %4837 = vrcp.f32 %v3968_v17  ;;  %vm3976_vm5 = vmor %vm3974_vm0, %vm3975_vm15  ;;  %v3995_v5 = vand.u32 2147483648, %v3968_v17  ;;  %v3993_v37 = vand.u32 2147483647, %v3968_v17  ;;  %vm3989_vm13 = vweird.f32 %v3968_v17 }
 0x5f1   : > { %v3971_v20 = vsub.f32 1.0, %v3970_v27 }
 0x5f2   : > { %v3996_v24 = vor.u32 1.1754944e-38, %v3995_v5  ;;  %vm3994_vm2 = vcmp.eq.f32.partialorder %v3993_v37, 8.507059e+37 }
 0x5f3   : > { %v3972_v63 = vmul.f32 %v4836_v50, %v3971_v20 }
 0x5f5   : > { %v3973_v56 = vadd.f32 %v4836_v50, %v3972_v63 }
 0x5f6   : > { %v4838_v0 = vpop.eup %4837 }
 0x5f7   : > { %v3977_v15 = vsel %vm3976_vm5, %v4836_v50, %v3973_v56  ;;  %v3985_v4 = vmul.f32 %v4838_v0, %v3968_v17  ;;  %vm3990_vm12 = vweird.f32 %v4838_v0  ;;  %v1956_v50 = vld [vmem:[%s7289_s4] sm:$0xff] }
 0x5f8   : > { %v3982_v12 = vsel %vm3979_vm11, %v3981_v57, %v3977_v15  ;;  %vm3991_vm1 = vmor %vm3989_vm13, %vm3990_vm12 }
 0x5f9   : > { %v3986_v46 = vsub.f32 1.0, %v3985_v4  ;;  %v3999_v58 = vmul.f32 %v4857_v38, %v3982_v12  ;;  %v4738_v4 = vld [vmem:[%s7289_s4 + $0x10] sm:$0xff] }
 0x5fb   : > { %4731 = vmatmul.msk.f32.vlgmr.msra.gmra.mxu0 %vm925_vm14, %v3999_v58  ;;  %4735 = vmatmul.msk.f32.vlgmr.msra.gmra.mxu1 %vm925_vm14, %v3999_v58  ;;  %v3987_v21 = vmul.f32 %v4838_v0, %v3986_v46 }
 0x5fd   : > { %v3988_v29 = vadd.f32 %v4838_v0, %v3987_v21 }
 0x5ff   : > { %v3992_v33 = vsel %vm3991_vm1, %v4838_v0, %v3988_v29 }
 0x600   : > { %v3997_v59 = vsel %vm3994_vm2, %v3996_v24, %v3992_v33 }
 0x601   : > { %v4000_v49 = vmul.f32 %v4858_v60, %v3997_v59 }
 0x603   : > { %4732 = vmatmul.msk.f32.gmra.mxu0 %vm925_vm14, %v4000_v49  ;;  %4736 = vmatmul.msk.f32.gmra.mxu1 %vm925_vm14, %v4000_v49 }
 0x627   : > { %v3026_v21 = vpop.xlane.xlu2 %3025 }
 0x628   : > { %v4607_v37 = vmul.f32 -1.442695, %v3026_v21 }
 0x678   : > { %v4024_v32 = vpop.f32.mrf.mxu0  ;;  %v4047_v34 = vpop.f32.mrf.mxu1 }
 0x679   : > { %v4053_v22 = vmul.f32 %v7417_v13, %v4024_v32  ;;  %v4054_v9 = vmul.f32 %v7418_v14, %v4047_v34 }
 0x680   : > { %v4027_v31 = vpop.f32.mrf.mxu0  ;;  %v4050_v26 = vpop.f32.mrf.mxu1 }
 0x681   : > { %v4055_v25 = vmul.f32 %v7419_v43, %v4027_v31  ;;  %v4056_v42 = vmul.f32 %v7420_v51, %v4050_v26  ;;  %v1954_v43 = vadd.f32 %v1953_v19, %v1952_v40 }
 0x683   : > { %v4057_v2 = vadd.f32 %v4055_v25, %v4053_v22  ;;  %v4064_v36 = vadd.f32 %v4056_v42, %v4054_v9  ;;  %v1955_v30 = vmax.f32 %v1954_v43, 0.0 }
 0x685   : > { %v4058_v28 = vrot.slane %v4057_v2, 4  ;;  %v4065_v7 = vrot.slane %v4064_v36, 4  ;;  %v1957_v17 = vmul.f32 %v1956_v50, %v1955_v30  ;;  %v4859_v50 = vld [vmem:[%s5239_s26] sm:$0xff] }
 0x687   : > { %v4059_v52 = vadd.f32 %v4058_v28, %v4057_v2  ;;  %v4066_v53 = vadd.f32 %v4065_v7, %v4064_v36  ;;  %v1958_v27 = vsel %vm1947_vm4, %v1957_v17, 0.0 }
 0x689   : > { %v4060_v41 = vrot.slane %v4059_v52, 2  ;;  %v4067_v3 = vrot.slane %v4066_v53, 2 }
 0x68b   : > { %v4061_v16 = vadd.f32 %v4060_v41, %v4059_v52  ;;  %v4068_v44 = vadd.f32 %v4067_v3, %v4066_v53  ;;  %v7441_v3 = vld [vmem:[#allocation25_spill] sm:$0xff] }
 0x68d   : > { %v4062_v13 = vrot.slane %v4061_v16, 1  ;;  %v4069_v18 = vrot.slane %v4068_v44, 1 }
 0x68f   : > { %v4063_v14 = vadd.f32 %v4062_v13, %v4061_v16  ;;  %v4070_v54 = vadd.f32 %v4069_v18, %v4068_v44  ;;  %v7442_v44 = vld [vmem:[#allocation26_spill] sm:$0xff] }
 0x691   : > { %v7224_v51 = vmul.f32 %v6944_v47, %v4063_v14  ;;  %v7227_v55 = vmul.f32 %v6950_v45, %v4070_v54  ;;  %v4737_v47 = vld [vmem:[%s7288_s3 + $0x10] sm:$0xff] }
 0x693   : > { %v4073_v1 = vmax.f32 %v7224_v51, %v7227_v55 }
 0x695   : > { %4074 = vmax.xlane.f32.xlu1 %v4073_v1 }
 0x69d   : > { %1959 = vadd.xlane.f32.xlu1 %v1958_v27  ;;  %v4860_v27 = vld [vmem:[%s5239_s26 + $0x8] sm:$0xff] }
 0x708   : > { %v4075_v20 = vpop.xlane.xlu1 %4074 }
 0x709   : > { %v4078_v45 = vmul.f32 %v4737_v47, %v4075_v20 }
 0x70b   : > { %v4079_v23 = vsel %vm1947_vm4, %v4078_v45, 0.0 }
 0x70c   : > { %v4080_v63 = vrot.slane %v4079_v23, 4 }
 0x70e   : > { %v4081_v6 = vadd.f32 %v4080_v63, %v4079_v23 }
 0x710   : > { %v4082_v56 = vrot.slane %v4081_v6, 2  ;;  %v1960_v58 = vpop.xlane.xlu1 %1959 }
 0x711   : > { %v4475_v5 = vmul.f32 -1.442695, %v1960_v58 }
 0x712   : > { %v4083_v0 = vadd.f32 %v4082_v56, %v4081_v6 }
 0x713   : > { %4839 = vpow2.f32 %v4475_v5 }
 0x714   : > { %v4084_v57 = vrot.slane %v4083_v0, 1  ;;  %4841 = vpow2.f32 %v4607_v37 }
 0x716   : > { %v4085_v15 = vadd.f32 %v4084_v57, %v4083_v0 }
 0x718   : > { %v4086_v12 = vmax.f32 %v4085_v15, 0.0 }
 0x719   : > { %v4840_v29 = vpop.eup %4839 }
 0x71a   : > { %v4089_v46 = vmul.f32 %v4738_v4, %v4086_v12  ;;  %v1964_v24 = vadd.f32 1.0, %v4840_v29  ;;  %v4842_v33 = vpop.eup %4841 }
 0x71b   : > { %v3030_v59 = vadd.f32 1.0, %v4842_v33 }
 0x71c   : > { %v4090_v38 = vsel %vm1947_vm4, %v4089_v46, 0.0  ;;  %4843 = vrcp.f32 %v1964_v24  ;;  %v1976_v9 = vand.u32 2147483648, %v1964_v24  ;;  %vm1970_vm3 = vweird.f32 %v1964_v24 }
 0x71d   : > { %4091 = vadd.xlane.f32.xlu2 %v4090_v38  ;;  %4845 = vrcp.f32 %v3030_v59  ;;  %v1974_v42 = vand.u32 2147483647, %v1964_v24  ;;  %v3042_v7 = vand.u32 2147483648, %v3030_v59  ;;  %vm3036_vm9 = vweird.f32 %v3030_v59 }
 0x71e   : > { %v1977_v36 = vor.u32 1.1754944e-38, %v1976_v9  ;;  %v3040_v53 = vand.u32 2147483647, %v3030_v59 }
 0x71f   : > { %vm1975_vm8 = vcmp.eq.f32.partialorder %v1974_v42, 8.507059e+37  ;;  %v3043_v18 = vor.u32 1.1754944e-38, %v3042_v7 }
 0x720   : > { %vm3041_vm4 = vcmp.eq.f32.partialorder %v3040_v53, 8.507059e+37 }
 0x722   : > { %v4844_v60 = vpop.eup %4843 }
 0x723   : > { %v1966_v49 = vmul.f32 %v4844_v60, %v1964_v24  ;;  %v4846_v32 = vpop.eup %4845  ;;  %vm1971_vm14 = vweird.f32 %v4844_v60 }
 0x724   : > { %v3032_v35 = vmul.f32 %v4846_v32, %v3030_v59  ;;  %vm1972_vm6 = vmor %vm1970_vm3, %vm1971_vm14  ;;  %vm3037_vm7 = vweird.f32 %v4846_v32 }
 0x725   : > { %v1967_v34 = vsub.f32 1.0, %v1966_v49  ;;  %vm3038_vm10 = vmor %vm3036_vm9, %vm3037_vm7 }
 0x726   : > { %v3033_v31 = vsub.f32 1.0, %v3032_v35 }
 0x727   : > { %v1968_v48 = vmul.f32 %v4844_v60, %v1967_v34 }
 0x728   : > { %v3034_v25 = vmul.f32 %v4846_v32, %v3033_v31 }
 0x729   : > { %v1969_v22 = vadd.f32 %v4844_v60, %v1968_v48 }
 0x72a   : > { %v3035_v39 = vadd.f32 %v4846_v32, %v3034_v25 }
 0x72b   : > { %v1973_v2 = vsel %vm1972_vm6, %v4844_v60, %v1969_v22 }
 0x72c   : > { %v1978_v52 = vsel %vm1975_vm8, %v1977_v36, %v1973_v2  ;;  %v3039_v41 = vsel %vm3038_vm10, %v4846_v32, %v3035_v39 }
 0x72d   : > { %v1982_v16 = vmul.f32 %v1978_v52, %v7441_v3  ;;  %v1983_v19 = vmul.f32 %v1978_v52, %v7442_v44  ;;  %v3044_v1 = vsel %vm3041_vm4, %v3043_v18, %v3039_v41 }
 0x72e   : > { %v3048_v45 = vmul.f32 %v3044_v1, %v7173_v61  ;;  %v3049_v23 = vmul.f32 %v3044_v1, %v7176_v62 }
 0x72f   : > { %v1984_v17 = vadd.f32 %v4859_v50, %v1982_v16  ;;  %v1985_v47 = vadd.f32 %v4860_v27, %v1983_v19 }
 0x731   : > { %v3050_v56 = vadd.f32 %v3048_v45, %v1984_v17  ;;  %v3051_v0 = vadd.f32 %v3049_v23, %v1985_v47 }
 0x790   : > { %v4092_v10 = vpop.xlane.xlu2 %4091 }
 0x791   : > { %v4739_v11 = vmul.f32 -1.442695, %v4092_v10 }
 0x793   : > { %4847 = vpow2.f32 %v4739_v11 }
 0x799   : > { %v4848_v8 = vpop.eup %4847 }
 0x79a   : > { %v4096_v26 = vadd.f32 1.0, %v4848_v8 }
 0x79c   : > { %4849 = vrcp.f32 %v4096_v26  ;;  %v4108_v14 = vand.u32 2147483648, %v4096_v26  ;;  %v4106_v43 = vand.u32 2147483647, %v4096_v26  ;;  %vm4102_vm0 = vweird.f32 %v4096_v26 }
 0x79e   : > { %v4109_v20 = vor.u32 1.1754944e-38, %v4108_v14  ;;  %vm4107_vm11 = vcmp.eq.f32.partialorder %v4106_v43, 8.507059e+37 }
 0x7a2   : > { %v4850_v28 = vpop.eup %4849 }
 0x7a3   : > { %v4098_v40 = vmul.f32 %v4850_v28, %v4096_v26  ;;  %vm4103_vm15 = vweird.f32 %v4850_v28 }
 0x7a4   : > { %vm4104_vm5 = vmor %vm4102_vm0, %vm4103_vm15 }
 0x7a5   : > { %v4099_v13 = vsub.f32 1.0, %v4098_v40 }
 0x7a7   : > { %v4100_v54 = vmul.f32 %v4850_v28, %v4099_v13 }
 0x7a9   : > { %v4101_v30 = vadd.f32 %v4850_v28, %v4100_v54 }
 0x7ab   : > { %v4105_v63 = vsel %vm4104_vm5, %v4850_v28, %v4101_v30 }
 0x7ac   : > { %v4110_v6 = vsel %vm4107_vm11, %v4109_v20, %v4105_v63 }
 0x7ad   : > { %v4114_v57 = vmul.f32 %v4110_v6, %v7224_v51  ;;  %v4115_v15 = vmul.f32 %v4110_v6, %v7227_v55 }
 0x7af   : > { %v4116_v4 = vadd.f32 %v4114_v57, %v3050_v56  ;;  %v4117_v12 = vadd.f32 %v4115_v15, %v3051_v0 }
 0x7b1   : > { %4118 = vst [vmem:[%s273_s16] sm:$0xff] %v4116_v4 }
 0x7b2   : > { %4119 = vst [vmem:[%s273_s16 + $0x8] sm:$0xff] %v4117_v12 }
 0x7b3   : > { %4933 = shalt.err (!%p4930_p9)
}
 0x7b4   : > { %4760 = dma.vmem_to_hbm [thread:$0]  (%p5065_p11), %s4135_s11, 256, %s4137_s27, %s4121_s25  }
 0x7b5 PF: > { %s7445_s8 = sld [smem:[#allocation11_spill]] }
 0x7b6   : > { %s7447_s28 = sld [smem:[#allocation14_spill]] }
 0x7bb   : > { %s4148_s2 = sand.u32 1, %s7445_s8  }
 0x7bc   : > { %p7448_p10 = scmp.ge.s32.totalorder %s7447_s28, 2  ;;  %s4149_s10 = scalar_lea.sflag [#allocation4], %s4148_s2 }
 0x7be   : > { %p4771_p1 = pnand %p7448_p10, %p5069_p12 }
 0x7c0   : > { %p4772_p2 = pneg %p4771_p1 }
 0x7c2   : > { %4959 = dma.done.wait (%p4772_p2), %s4149_s10, 256  }
 0x7c3   : > { %4961 = vsyncadd (%p4772_p2), %s4149_s10, 4294967040  ;;  %s7449_s21 = sld [smem:[#allocation16_spill]] }
 0x7c4   : > { %s7450_s18 = sld [smem:[#allocation12_spill]] }
 0x7c5   : > { %s7451_s19 = sld [smem:[#allocation13_spill]] }
 0x7c6   : > { %s7452_s20 = sld [smem:[#allocation17_spill]] }
 0x7c9   : > { %p19_p7 = scmp.ge.s32.totalorder %s7449_s21, 4  }
 0x7cb   :  { %21 = sbr.rel (!%p19_p7) target bundleno = 11 (0xb), region = 99 }
 0x7d0   :  { %4155 = vsyncpa [#allocation3], 1 }
 0x7d1   :  { %4157 = vsyncpa [#allocation3 + $0x1], 1 }
 0x7d2   :  { %4158 = vsyncpa [#allocation4], 1 }
 0x7d3   :  { %4160 = vsyncpa [#allocation4 + $0x1], 1 }
 0x7d4   :  { %4161 = vsyncpa [#allocation5], 1 }
 0x7d5   :  { %4163 = vsyncpa [#allocation5 + $0x1], 1 }

</bundles_post_ra>
